<compile_context>
chip_gen: v7x
topology: tpu7x:2x2x1
jax: 0.10.0
libtpu: 0.0.40
codegen_flags: <defaults>
</compile_context>

<pallas_src>
import functools

import jax
import jax.numpy as jnp
from jax.experimental import pallas as pl
from jax.experimental.pallas import tpu as pltpu


def make_resblock_kernel(H, W, C):
    """Fused 3x3 conv -> bias -> ReLU -> 3x3 conv -> bias -> residual add."""

    def kernel(x_ref, w_ref, b_ref, o_ref, pad_scr):
        # x_ref  : (1, H, W, C)      input block, NHWC, one batch element
        # w_ref  : (3, 3, C, C)      HWIO weights (same weights for both passes)
        # b_ref  : (1, C)            bias
        # o_ref  : (1, H, W, C)      output block
        # pad_scr: (H+2, W+2, C) f32 zero-padded scratch, reused for both convs

        def conv3x3():
            # 3x3 'SAME' conv on the padded scratch as 9 shifted matmuls.
            # Hoist the dx (sublane, non-8-aligned) shift: 3 copies instead of 9.
            cols = [pad_scr[:, dx:dx + W, :] for dx in range(3)]  # (H+2, W, C)
            acc = jnp.zeros((H, W, C), jnp.float32)
            for dy in range(3):
                for dx in range(3):
                    patch = cols[dx][dy:dy + H]                   # (H, W, C)
                    acc = acc + jnp.einsum(
                        "hwc,cd->hwd", patch, w_ref[dy, dx],
                        preferred_element_type=jnp.float32)
            return acc + b_ref[...]                               # (1, C) bcast

        # Zero the scratch once; both passes only overwrite the interior so
        # the 1-pixel border stays zero ('SAME' padding) for both convs.
        pad_scr[...] = jnp.zeros_like(pad_scr)

        # Pass 1: pad x in VMEM, conv + bias + ReLU.
        pad_scr[1:H + 1, 1:W + 1, :] = x_ref[0].astype(jnp.float32)
        h = jnp.maximum(conv3x3(), 0.0)                           # (H, W, C)

        # Pass 2: pad h in VMEM (interior overwrite only), conv + bias + x.
        pad_scr[1:H + 1, 1:W + 1, :] = h
        y = conv3x3() + x_ref[0].astype(jnp.float32)              # residual

        o_ref[0] = y.astype(o_ref.dtype)

    return kernel


@jax.jit
def resblock_forward(x_nchw, w_hwio, bias):
    """ResBlock.forward:  conv1(relu(conv1(x))) + x   (x is NCHW)."""
    N, C, H, W = x_nchw.shape
    x = jnp.transpose(x_nchw, (0, 2, 3, 1))   # NCHW -> NHWC (C on lanes)
    b2 = bias.reshape(1, C)

    y = pl.pallas_call(
        make_resblock_kernel(H, W, C),
        out_shape=jax.ShapeDtypeStruct((N, H, W, C), x.dtype),
        grid=(N,),
        in_specs=[
            pl.BlockSpec((1, H, W, C), lambda n: (n, 0, 0, 0)),
            pl.BlockSpec((3, 3, C, C), lambda n: (0, 0, 0, 0)),
            pl.BlockSpec((1, C), lambda n: (0, 0)),
        ],
        out_specs=pl.BlockSpec((1, H, W, C), lambda n: (n, 0, 0, 0)),
        scratch_shapes=[pltpu.VMEM((H + 2, W + 2, C), jnp.float32)],
        compiler_params=pltpu.CompilerParams(
            dimension_semantics=("parallel",)),
    )(x, w_hwio, b2)

    return jnp.transpose(y, (0, 3, 1, 2))     # NHWC -> NCHW


def _reference(x_nchw, w_hwio, bias):
    """Pure-JAX reference (lax conv) for a correctness check."""
    x = jnp.transpose(x_nchw, (0, 2, 3, 1))

    def conv(inp):
        y = jax.lax.conv_general_dilated(
            inp, w_hwio, (1, 1), ((1, 1), (1, 1)),
            dimension_numbers=("NHWC", "HWIO", "NHWC"))
        return y + bias.reshape(1, 1, 1, -1)

    h = jnp.maximum(conv(x), 0.0)
    y = conv(h) + x
    return jnp.transpose(y, (0, 3, 1, 2))


if __name__ == "__main__":
    # Small shapes consistent with the module: residual requires in == out ch.
    N, C, H, W = 2, 4, 16, 16

    key = jax.random.PRNGKey(0)
    kx, kw, kb = jax.random.split(key, 3)

    x = jax.random.normal(kx, (N, C, H, W), dtype=jnp.float32)
    # Deterministic synthetic params (PyTorch-like fan-in scaling), HWIO layout.
    fan_in = C * 3 * 3
    w = jax.random.normal(kw, (3, 3, C, C), dtype=jnp.float32) / jnp.sqrt(
        jnp.float32(fan_in))
    b = jax.random.normal(kb, (C,), dtype=jnp.float32) * 0.01

    out = jax.block_until_ready(resblock_forward(x, w, b))
    ref = jax.block_until_ready(_reference(x, w, b))

    assert out.shape == (N, C, H, W)
    assert jnp.allclose(out, ref, atol=1e-4, rtol=1e-4), "mismatch vs reference"
    print("KERNEL_OK")
</pallas_src>

<mosaic_0001>
module attributes {stable_mosaic.version = 11 : i64} {
  func.func @kernel(%arg0: i32, %arg1: memref<1x16x16x4xf32, #tpu.memory_space<vmem>>, %arg2: memref<3x3x4x4xf32, #tpu.memory_space<vmem>>, %arg3: memref<1x4xf32, #tpu.memory_space<vmem>>, %arg4: memref<1x16x16x4xf32, #tpu.memory_space<vmem>>, %arg5: memref<18x18x4xf32, #tpu.memory_space<vmem>>) attributes {dimension_semantics = [#tpu.dimension_semantics<parallel>], iteration_bounds = array<i64: 2>, scalar_prefetch = 0 : i64, scratch_operands = 1 : i64, tpu.core_type = #tpu.core_type<tc>, window_params = [{transform_indices = @transform_0, window_bounds = array<i64: 1, 16, 16, 4>}, {pipeline_mode = #tpu.pipeline_mode<synchronous>, transform_indices = @transform_1, window_bounds = array<i64: 3, 3, 4, 4>}, {pipeline_mode = #tpu.pipeline_mode<synchronous>, transform_indices = @transform_2, window_bounds = array<i64: 1, 4>}, {transform_indices = @transform_3, window_bounds = array<i64: 1, 16, 16, 4>}]} {
    %cst = arith.constant 0.000000e+00 : f32
    %0 = vector.broadcast %cst : f32 to vector<18x18x4xf32>
    %c0 = arith.constant 0 : index
    %c0_0 = arith.constant 0 : index
    %c0_1 = arith.constant 0 : index
    %1 = vector.load %arg5[%c0, %c0_0, %c0_1] : memref<18x18x4xf32, #tpu.memory_space<vmem>>, vector<18x18x4xf32>
    tpu.vector_store %arg5[%c0, %c0_0, %c0_1], %0 {strides = array<i32>} : memref<18x18x4xf32, #tpu.memory_space<vmem>>, vector<18x18x4xf32>,
    %c0_2 = arith.constant 0 : index
    %c0_3 = arith.constant 0 : index
    %c0_4 = arith.constant 0 : index
    %c0_5 = arith.constant 0 : index
    %2 = vector.load %arg1[%c0_2, %c0_3, %c0_4, %c0_5] : memref<1x16x16x4xf32, #tpu.memory_space<vmem>>, vector<1x16x16x4xf32>
    %3 = vector.shape_cast %2 : vector<1x16x16x4xf32> to vector<16x16x4xf32>
    %c1 = arith.constant 1 : index
    %c1_6 = arith.constant 1 : index
    %c0_7 = arith.constant 0 : index
    %4 = vector.load %arg5[%c1, %c1_6, %c0_7] : memref<18x18x4xf32, #tpu.memory_space<vmem>>, vector<16x16x4xf32>
    tpu.vector_store %arg5[%c1, %c1_6, %c0_7], %3 {strides = array<i32>} : memref<18x18x4xf32, #tpu.memory_space<vmem>>, vector<16x16x4xf32>,
    %c0_8 = arith.constant 0 : index
    %c0_9 = arith.constant 0 : index
    %c0_10 = arith.constant 0 : index
    %5 = vector.load %arg5[%c0_8, %c0_9, %c0_10] : memref<18x18x4xf32, #tpu.memory_space<vmem>>, vector<18x16x4xf32>
    %c0_11 = arith.constant 0 : index
    %c1_12 = arith.constant 1 : index
    %c0_13 = arith.constant 0 : index
    %6 = vector.load %arg5[%c0_11, %c1_12, %c0_13] : memref<18x18x4xf32, #tpu.memory_space<vmem>>, vector<18x16x4xf32>
    %c0_14 = arith.constant 0 : index
    %c2 = arith.constant 2 : index
    %c0_15 = arith.constant 0 : index
    %7 = vector.load %arg5[%c0_14, %c2, %c0_15] : memref<18x18x4xf32, #tpu.memory_space<vmem>>, vector<18x16x4xf32>
    %cst_16 = arith.constant 0.000000e+00 : f32
    %8 = vector.broadcast %cst_16 : f32 to vector<16x16x4xf32>
    %9 = vector.extract_strided_slice %5 {offsets = [0, 0, 0], sizes = [16, 16, 4], strides = [1, 1, 1]} : vector<18x16x4xf32> to vector<16x16x4xf32>
    %c0_17 = arith.constant 0 : index
    %c0_18 = arith.constant 0 : index
    %c0_19 = arith.constant 0 : index
    %c0_20 = arith.constant 0 : index
    %10 = vector.load %arg2[%c0_17, %c0_18, %c0_19, %c0_20] : memref<3x3x4x4xf32, #tpu.memory_space<vmem>>, vector<1x1x4x4xf32>
    %11 = vector.shape_cast %10 : vector<1x1x4x4xf32> to vector<4x4xf32>
    "tpu.trace_start"() <{level = 10 : i32, message = "hwc,cd->hwd"}> : () -> ()
    %cst_21 = arith.constant dense<0.000000e+00> : vector<16x16x4xf32>
    %12 = tpu.matmul %9, %11, %cst_21 {dimension_numbers = #tpu.dot_dimension_numbers<[2], [0], [0, 1], [1], [0, 0, 0, 1, 1, 1], [], []>} : vector<16x16x4xf32>, vector<4x4xf32>, vector<16x16x4xf32> -> vector<16x16x4xf32>
    "tpu.trace_stop"() : () -> ()
    %13 = arith.addf %8, %12 : vector<16x16x4xf32>
    %14 = vector.extract_strided_slice %6 {offsets = [0, 0, 0], sizes = [16, 16, 4], strides = [1, 1, 1]} : vector<18x16x4xf32> to vector<16x16x4xf32>
    %c0_22 = arith.constant 0 : index
    %c1_23 = arith.constant 1 : index
    %c0_24 = arith.constant 0 : index
    %c0_25 = arith.constant 0 : index
    %15 = vector.load %arg2[%c0_22, %c1_23, %c0_24, %c0_25] : memref<3x3x4x4xf32, #tpu.memory_space<vmem>>, vector<1x1x4x4xf32>
    %16 = vector.shape_cast %15 : vector<1x1x4x4xf32> to vector<4x4xf32>
    "tpu.trace_start"() <{level = 10 : i32, message = "hwc,cd->hwd"}> : () -> ()
    %cst_26 = arith.constant dense<0.000000e+00> : vector<16x16x4xf32>
    %17 = tpu.matmul %14, %16, %cst_26 {dimension_numbers = #tpu.dot_dimension_numbers<[2], [0], [0, 1], [1], [0, 0, 0, 1, 1, 1], [], []>} : vector<16x16x4xf32>, vector<4x4xf32>, vector<16x16x4xf32> -> vector<16x16x4xf32>
    "tpu.trace_stop"() : () -> ()
    %18 = arith.addf %13, %17 : vector<16x16x4xf32>
    %19 = vector.extract_strided_slice %7 {offsets = [0, 0, 0], sizes = [16, 16, 4], strides = [1, 1, 1]} : vector<18x16x4xf32> to vector<16x16x4xf32>
    %c0_27 = arith.constant 0 : index
    %c2_28 = arith.constant 2 : index
    %c0_29 = arith.constant 0 : index
    %c0_30 = arith.constant 0 : index
    %20 = vector.load %arg2[%c0_27, %c2_28, %c0_29, %c0_30] : memref<3x3x4x4xf32, #tpu.memory_space<vmem>>, vector<1x1x4x4xf32>
    %21 = vector.shape_cast %20 : vector<1x1x4x4xf32> to vector<4x4xf32>
    "tpu.trace_start"() <{level = 10 : i32, message = "hwc,cd->hwd"}> : () -> ()
    %cst_31 = arith.constant dense<0.000000e+00> : vector<16x16x4xf32>
    %22 = tpu.matmul %19, %21, %cst_31 {dimension_numbers = #tpu.dot_dimension_numbers<[2], [0], [0, 1], [1], [0, 0, 0, 1, 1, 1], [], []>} : vector<16x16x4xf32>, vector<4x4xf32>, vector<16x16x4xf32> -> vector<16x16x4xf32>
    "tpu.trace_stop"() : () -> ()
    %23 = arith.addf %18, %22 : vector<16x16x4xf32>
    %24 = vector.extract_strided_slice %5 {offsets = [1, 0, 0], sizes = [16, 16, 4], strides = [1, 1, 1]} : vector<18x16x4xf32> to vector<16x16x4xf32>
    %c1_32 = arith.constant 1 : index
    %c0_33 = arith.constant 0 : index
    %c0_34 = arith.constant 0 : index
    %c0_35 = arith.constant 0 : index
    %25 = vector.load %arg2[%c1_32, %c0_33, %c0_34, %c0_35] : memref<3x3x4x4xf32, #tpu.memory_space<vmem>>, vector<1x1x4x4xf32>
    %26 = vector.shape_cast %25 : vector<1x1x4x4xf32> to vector<4x4xf32>
    "tpu.trace_start"() <{level = 10 : i32, message = "hwc,cd->hwd"}> : () -> ()
    %cst_36 = arith.constant dense<0.000000e+00> : vector<16x16x4xf32>
    %27 = tpu.matmul %24, %26, %cst_36 {dimension_numbers = #tpu.dot_dimension_numbers<[2], [0], [0, 1], [1], [0, 0, 0, 1, 1, 1], [], []>} : vector<16x16x4xf32>, vector<4x4xf32>, vector<16x16x4xf32> -> vector<16x16x4xf32>
    "tpu.trace_stop"() : () -> ()
    %28 = arith.addf %23, %27 : vector<16x16x4xf32>
    %29 = vector.extract_strided_slice %6 {offsets = [1, 0, 0], sizes = [16, 16, 4], strides = [1, 1, 1]} : vector<18x16x4xf32> to vector<16x16x4xf32>
    %c1_37 = arith.constant 1 : index
    %c1_38 = arith.constant 1 : index
    %c0_39 = arith.constant 0 : index
    %c0_40 = arith.constant 0 : index
    %30 = vector.load %arg2[%c1_37, %c1_38, %c0_39, %c0_40] : memref<3x3x4x4xf32, #tpu.memory_space<vmem>>, vector<1x1x4x4xf32>
    %31 = vector.shape_cast %30 : vector<1x1x4x4xf32> to vector<4x4xf32>
    "tpu.trace_start"() <{level = 10 : i32, message = "hwc,cd->hwd"}> : () -> ()
    %cst_41 = arith.constant dense<0.000000e+00> : vector<16x16x4xf32>
    %32 = tpu.matmul %29, %31, %cst_41 {dimension_numbers = #tpu.dot_dimension_numbers<[2], [0], [0, 1], [1], [0, 0, 0, 1, 1, 1], [], []>} : vector<16x16x4xf32>, vector<4x4xf32>, vector<16x16x4xf32> -> vector<16x16x4xf32>
    "tpu.trace_stop"() : () -> ()
    %33 = arith.addf %28, %32 : vector<16x16x4xf32>
    %34 = vector.extract_strided_slice %7 {offsets = [1, 0, 0], sizes = [16, 16, 4], strides = [1, 1, 1]} : vector<18x16x4xf32> to vector<16x16x4xf32>
    %c1_42 = arith.constant 1 : index
    %c2_43 = arith.constant 2 : index
    %c0_44 = arith.constant 0 : index
    %c0_45 = arith.constant 0 : index
    %35 = vector.load %arg2[%c1_42, %c2_43, %c0_44, %c0_45] : memref<3x3x4x4xf32, #tpu.memory_space<vmem>>, vector<1x1x4x4xf32>
    %36 = vector.shape_cast %35 : vector<1x1x4x4xf32> to vector<4x4xf32>
    "tpu.trace_start"() <{level = 10 : i32, message = "hwc,cd->hwd"}> : () -> ()
    %cst_46 = arith.constant dense<0.000000e+00> : vector<16x16x4xf32>
    %37 = tpu.matmul %34, %36, %cst_46 {dimension_numbers = #tpu.dot_dimension_numbers<[2], [0], [0, 1], [1], [0, 0, 0, 1, 1, 1], [], []>} : vector<16x16x4xf32>, vector<4x4xf32>, vector<16x16x4xf32> -> vector<16x16x4xf32>
    "tpu.trace_stop"() : () -> ()
    %38 = arith.addf %33, %37 : vector<16x16x4xf32>
    %39 = vector.extract_strided_slice %5 {offsets = [2, 0, 0], sizes = [16, 16, 4], strides = [1, 1, 1]} : vector<18x16x4xf32> to vector<16x16x4xf32>
    %c2_47 = arith.constant 2 : index
    %c0_48 = arith.constant 0 : index
    %c0_49 = arith.constant 0 : index
    %c0_50 = arith.constant 0 : index
    %40 = vector.load %arg2[%c2_47, %c0_48, %c0_49, %c0_50] : memref<3x3x4x4xf32, #tpu.memory_space<vmem>>, vector<1x1x4x4xf32>
    %41 = vector.shape_cast %40 : vector<1x1x4x4xf32> to vector<4x4xf32>
    "tpu.trace_start"() <{level = 10 : i32, message = "hwc,cd->hwd"}> : () -> ()
    %cst_51 = arith.constant dense<0.000000e+00> : vector<16x16x4xf32>
    %42 = tpu.matmul %39, %41, %cst_51 {dimension_numbers = #tpu.dot_dimension_numbers<[2], [0], [0, 1], [1], [0, 0, 0, 1, 1, 1], [], []>} : vector<16x16x4xf32>, vector<4x4xf32>, vector<16x16x4xf32> -> vector<16x16x4xf32>
    "tpu.trace_stop"() : () -> ()
    %43 = arith.addf %38, %42 : vector<16x16x4xf32>
    %44 = vector.extract_strided_slice %6 {offsets = [2, 0, 0], sizes = [16, 16, 4], strides = [1, 1, 1]} : vector<18x16x4xf32> to vector<16x16x4xf32>
    %c2_52 = arith.constant 2 : index
    %c1_53 = arith.constant 1 : index
    %c0_54 = arith.constant 0 : index
    %c0_55 = arith.constant 0 : index
    %45 = vector.load %arg2[%c2_52, %c1_53, %c0_54, %c0_55] : memref<3x3x4x4xf32, #tpu.memory_space<vmem>>, vector<1x1x4x4xf32>
    %46 = vector.shape_cast %45 : vector<1x1x4x4xf32> to vector<4x4xf32>
    "tpu.trace_start"() <{level = 10 : i32, message = "hwc,cd->hwd"}> : () -> ()
    %cst_56 = arith.constant dense<0.000000e+00> : vector<16x16x4xf32>
    %47 = tpu.matmul %44, %46, %cst_56 {dimension_numbers = #tpu.dot_dimension_numbers<[2], [0], [0, 1], [1], [0, 0, 0, 1, 1, 1], [], []>} : vector<16x16x4xf32>, vector<4x4xf32>, vector<16x16x4xf32> -> vector<16x16x4xf32>
    "tpu.trace_stop"() : () -> ()
    %48 = arith.addf %43, %47 : vector<16x16x4xf32>
    %49 = vector.extract_strided_slice %7 {offsets = [2, 0, 0], sizes = [16, 16, 4], strides = [1, 1, 1]} : vector<18x16x4xf32> to vector<16x16x4xf32>
    %c2_57 = arith.constant 2 : index
    %c2_58 = arith.constant 2 : index
    %c0_59 = arith.constant 0 : index
    %c0_60 = arith.constant 0 : index
    %50 = vector.load %arg2[%c2_57, %c2_58, %c0_59, %c0_60] : memref<3x3x4x4xf32, #tpu.memory_space<vmem>>, vector<1x1x4x4xf32>
    %51 = vector.shape_cast %50 : vector<1x1x4x4xf32> to vector<4x4xf32>
    "tpu.trace_start"() <{level = 10 : i32, message = "hwc,cd->hwd"}> : () -> ()
    %cst_61 = arith.constant dense<0.000000e+00> : vector<16x16x4xf32>
    %52 = tpu.matmul %49, %51, %cst_61 {dimension_numbers = #tpu.dot_dimension_numbers<[2], [0], [0, 1], [1], [0, 0, 0, 1, 1, 1], [], []>} : vector<16x16x4xf32>, vector<4x4xf32>, vector<16x16x4xf32> -> vector<16x16x4xf32>
    "tpu.trace_stop"() : () -> ()
    %53 = arith.addf %48, %52 : vector<16x16x4xf32>
    %c0_62 = arith.constant 0 : index
    %c0_63 = arith.constant 0 : index
    %54 = vector.load %arg3[%c0_62, %c0_63] : memref<1x4xf32, #tpu.memory_space<vmem>>, vector<1x4xf32>
    %55 = vector.shape_cast %54 : vector<1x4xf32> to vector<1x1x4xf32>
    %56 = vector.broadcast %55 : vector<1x1x4xf32> to vector<16x16x4xf32>
    %57 = arith.addf %53, %56 : vector<16x16x4xf32>
    %cst_64 = arith.constant 0.000000e+00 : f32
    %58 = vector.broadcast %cst_64 : f32 to vector<16x16x4xf32>
    %59 = arith.maximumf %57, %58 : vector<16x16x4xf32>
    %c1_65 = arith.constant 1 : index
    %c1_66 = arith.constant 1 : index
    %c0_67 = arith.constant 0 : index
    %60 = vector.load %arg5[%c1_65, %c1_66, %c0_67] : memref<18x18x4xf32, #tpu.memory_space<vmem>>, vector<16x16x4xf32>
    tpu.vector_store %arg5[%c1_65, %c1_66, %c0_67], %59 {strides = array<i32>} : memref<18x18x4xf32, #tpu.memory_space<vmem>>, vector<16x16x4xf32>,
    %c0_68 = arith.constant 0 : index
    %c0_69 = arith.constant 0 : index
    %c0_70 = arith.constant 0 : index
    %61 = vector.load %arg5[%c0_68, %c0_69, %c0_70] : memref<18x18x4xf32, #tpu.memory_space<vmem>>, vector<18x16x4xf32>
    %c0_71 = arith.constant 0 : index
    %c1_72 = arith.constant 1 : index
    %c0_73 = arith.constant 0 : index
    %62 = vector.load %arg5[%c0_71, %c1_72, %c0_73] : memref<18x18x4xf32, #tpu.memory_space<vmem>>, vector<18x16x4xf32>
    %c0_74 = arith.constant 0 : index
    %c2_75 = arith.constant 2 : index
    %c0_76 = arith.constant 0 : index
    %63 = vector.load %arg5[%c0_74, %c2_75, %c0_76] : memref<18x18x4xf32, #tpu.memory_space<vmem>>, vector<18x16x4xf32>
    %cst_77 = arith.constant 0.000000e+00 : f32
    %64 = vector.broadcast %cst_77 : f32 to vector<16x16x4xf32>
    %65 = vector.extract_strided_slice %61 {offsets = [0, 0, 0], sizes = [16, 16, 4], strides = [1, 1, 1]} : vector<18x16x4xf32> to vector<16x16x4xf32>
    %c0_78 = arith.constant 0 : index
    %c0_79 = arith.constant 0 : index
    %c0_80 = arith.constant 0 : index
    %c0_81 = arith.constant 0 : index
    %66 = vector.load %arg2[%c0_78, %c0_79, %c0_80, %c0_81] : memref<3x3x4x4xf32, #tpu.memory_space<vmem>>, vector<1x1x4x4xf32>
    %67 = vector.shape_cast %66 : vector<1x1x4x4xf32> to vector<4x4xf32>
    "tpu.trace_start"() <{level = 10 : i32, message = "hwc,cd->hwd"}> : () -> ()
    %cst_82 = arith.constant dense<0.000000e+00> : vector<16x16x4xf32>
    %68 = tpu.matmul %65, %67, %cst_82 {dimension_numbers = #tpu.dot_dimension_numbers<[2], [0], [0, 1], [1], [0, 0, 0, 1, 1, 1], [], []>} : vector<16x16x4xf32>, vector<4x4xf32>, vector<16x16x4xf32> -> vector<16x16x4xf32>
    "tpu.trace_stop"() : () -> ()
    %69 = arith.addf %64, %68 : vector<16x16x4xf32>
    %70 = vector.extract_strided_slice %62 {offsets = [0, 0, 0], sizes = [16, 16, 4], strides = [1, 1, 1]} : vector<18x16x4xf32> to vector<16x16x4xf32>
    %c0_83 = arith.constant 0 : index
    %c1_84 = arith.constant 1 : index
    %c0_85 = arith.constant 0 : index
    %c0_86 = arith.constant 0 : index
    %71 = vector.load %arg2[%c0_83, %c1_84, %c0_85, %c0_86] : memref<3x3x4x4xf32, #tpu.memory_space<vmem>>, vector<1x1x4x4xf32>
    %72 = vector.shape_cast %71 : vector<1x1x4x4xf32> to vector<4x4xf32>
    "tpu.trace_start"() <{level = 10 : i32, message = "hwc,cd->hwd"}> : () -> ()
    %cst_87 = arith.constant dense<0.000000e+00> : vector<16x16x4xf32>
    %73 = tpu.matmul %70, %72, %cst_87 {dimension_numbers = #tpu.dot_dimension_numbers<[2], [0], [0, 1], [1], [0, 0, 0, 1, 1, 1], [], []>} : vector<16x16x4xf32>, vector<4x4xf32>, vector<16x16x4xf32> -> vector<16x16x4xf32>
    "tpu.trace_stop"() : () -> ()
    %74 = arith.addf %69, %73 : vector<16x16x4xf32>
    %75 = vector.extract_strided_slice %63 {offsets = [0, 0, 0], sizes = [16, 16, 4], strides = [1, 1, 1]} : vector<18x16x4xf32> to vector<16x16x4xf32>
    %c0_88 = arith.constant 0 : index
    %c2_89 = arith.constant 2 : index
    %c0_90 = arith.constant 0 : index
    %c0_91 = arith.constant 0 : index
    %76 = vector.load %arg2[%c0_88, %c2_89, %c0_90, %c0_91] : memref<3x3x4x4xf32, #tpu.memory_space<vmem>>, vector<1x1x4x4xf32>
    %77 = vector.shape_cast %76 : vector<1x1x4x4xf32> to vector<4x4xf32>
    "tpu.trace_start"() <{level = 10 : i32, message = "hwc,cd->hwd"}> : () -> ()
    %cst_92 = arith.constant dense<0.000000e+00> : vector<16x16x4xf32>
    %78 = tpu.matmul %75, %77, %cst_92 {dimension_numbers = #tpu.dot_dimension_numbers<[2], [0], [0, 1], [1], [0, 0, 0, 1, 1, 1], [], []>} : vector<16x16x4xf32>, vector<4x4xf32>, vector<16x16x4xf32> -> vector<16x16x4xf32>
    "tpu.trace_stop"() : () -> ()
    %79 = arith.addf %74, %78 : vector<16x16x4xf32>
    %80 = vector.extract_strided_slice %61 {offsets = [1, 0, 0], sizes = [16, 16, 4], strides = [1, 1, 1]} : vector<18x16x4xf32> to vector<16x16x4xf32>
    %c1_93 = arith.constant 1 : index
    %c0_94 = arith.constant 0 : index
    %c0_95 = arith.constant 0 : index
    %c0_96 = arith.constant 0 : index
    %81 = vector.load %arg2[%c1_93, %c0_94, %c0_95, %c0_96] : memref<3x3x4x4xf32, #tpu.memory_space<vmem>>, vector<1x1x4x4xf32>
    %82 = vector.shape_cast %81 : vector<1x1x4x4xf32> to vector<4x4xf32>
    "tpu.trace_start"() <{level = 10 : i32, message = "hwc,cd->hwd"}> : () -> ()
    %cst_97 = arith.constant dense<0.000000e+00> : vector<16x16x4xf32>
    %83 = tpu.matmul %80, %82, %cst_97 {dimension_numbers = #tpu.dot_dimension_numbers<[2], [0], [0, 1], [1], [0, 0, 0, 1, 1, 1], [], []>} : vector<16x16x4xf32>, vector<4x4xf32>, vector<16x16x4xf32> -> vector<16x16x4xf32>
    "tpu.trace_stop"() : () -> ()
    %84 = arith.addf %79, %83 : vector<16x16x4xf32>
    %85 = vector.extract_strided_slice %62 {offsets = [1, 0, 0], sizes = [16, 16, 4], strides = [1, 1, 1]} : vector<18x16x4xf32> to vector<16x16x4xf32>
    %c1_98 = arith.constant 1 : index
    %c1_99 = arith.constant 1 : index
    %c0_100 = arith.constant 0 : index
    %c0_101 = arith.constant 0 : index
    %86 = vector.load %arg2[%c1_98, %c1_99, %c0_100, %c0_101] : memref<3x3x4x4xf32, #tpu.memory_space<vmem>>, vector<1x1x4x4xf32>
    %87 = vector.shape_cast %86 : vector<1x1x4x4xf32> to vector<4x4xf32>
    "tpu.trace_start"() <{level = 10 : i32, message = "hwc,cd->hwd"}> : () -> ()
    %cst_102 = arith.constant dense<0.000000e+00> : vector<16x16x4xf32>
    %88 = tpu.matmul %85, %87, %cst_102 {dimension_numbers = #tpu.dot_dimension_numbers<[2], [0], [0, 1], [1], [0, 0, 0, 1, 1, 1], [], []>} : vector<16x16x4xf32>, vector<4x4xf32>, vector<16x16x4xf32> -> vector<16x16x4xf32>
    "tpu.trace_stop"() : () -> ()
    %89 = arith.addf %84, %88 : vector<16x16x4xf32>
    %90 = vector.extract_strided_slice %63 {offsets = [1, 0, 0], sizes = [16, 16, 4], strides = [1, 1, 1]} : vector<18x16x4xf32> to vector<16x16x4xf32>
    %c1_103 = arith.constant 1 : index
    %c2_104 = arith.constant 2 : index
    %c0_105 = arith.constant 0 : index
    %c0_106 = arith.constant 0 : index
    %91 = vector.load %arg2[%c1_103, %c2_104, %c0_105, %c0_106] : memref<3x3x4x4xf32, #tpu.memory_space<vmem>>, vector<1x1x4x4xf32>
    %92 = vector.shape_cast %91 : vector<1x1x4x4xf32> to vector<4x4xf32>
    "tpu.trace_start"() <{level = 10 : i32, message = "hwc,cd->hwd"}> : () -> ()
    %cst_107 = arith.constant dense<0.000000e+00> : vector<16x16x4xf32>
    %93 = tpu.matmul %90, %92, %cst_107 {dimension_numbers = #tpu.dot_dimension_numbers<[2], [0], [0, 1], [1], [0, 0, 0, 1, 1, 1], [], []>} : vector<16x16x4xf32>, vector<4x4xf32>, vector<16x16x4xf32> -> vector<16x16x4xf32>
    "tpu.trace_stop"() : () -> ()
    %94 = arith.addf %89, %93 : vector<16x16x4xf32>
    %95 = vector.extract_strided_slice %61 {offsets = [2, 0, 0], sizes = [16, 16, 4], strides = [1, 1, 1]} : vector<18x16x4xf32> to vector<16x16x4xf32>
    %c2_108 = arith.constant 2 : index
    %c0_109 = arith.constant 0 : index
    %c0_110 = arith.constant 0 : index
    %c0_111 = arith.constant 0 : index
    %96 = vector.load %arg2[%c2_108, %c0_109, %c0_110, %c0_111] : memref<3x3x4x4xf32, #tpu.memory_space<vmem>>, vector<1x1x4x4xf32>
    %97 = vector.shape_cast %96 : vector<1x1x4x4xf32> to vector<4x4xf32>
    "tpu.trace_start"() <{level = 10 : i32, message = "hwc,cd->hwd"}> : () -> ()
    %cst_112 = arith.constant dense<0.000000e+00> : vector<16x16x4xf32>
    %98 = tpu.matmul %95, %97, %cst_112 {dimension_numbers = #tpu.dot_dimension_numbers<[2], [0], [0, 1], [1], [0, 0, 0, 1, 1, 1], [], []>} : vector<16x16x4xf32>, vector<4x4xf32>, vector<16x16x4xf32> -> vector<16x16x4xf32>
    "tpu.trace_stop"() : () -> ()
    %99 = arith.addf %94, %98 : vector<16x16x4xf32>
    %100 = vector.extract_strided_slice %62 {offsets = [2, 0, 0], sizes = [16, 16, 4], strides = [1, 1, 1]} : vector<18x16x4xf32> to vector<16x16x4xf32>
    %c2_113 = arith.constant 2 : index
    %c1_114 = arith.constant 1 : index
    %c0_115 = arith.constant 0 : index
    %c0_116 = arith.constant 0 : index
    %101 = vector.load %arg2[%c2_113, %c1_114, %c0_115, %c0_116] : memref<3x3x4x4xf32, #tpu.memory_space<vmem>>, vector<1x1x4x4xf32>
    %102 = vector.shape_cast %101 : vector<1x1x4x4xf32> to vector<4x4xf32>
    "tpu.trace_start"() <{level = 10 : i32, message = "hwc,cd->hwd"}> : () -> ()
    %cst_117 = arith.constant dense<0.000000e+00> : vector<16x16x4xf32>
    %103 = tpu.matmul %100, %102, %cst_117 {dimension_numbers = #tpu.dot_dimension_numbers<[2], [0], [0, 1], [1], [0, 0, 0, 1, 1, 1], [], []>} : vector<16x16x4xf32>, vector<4x4xf32>, vector<16x16x4xf32> -> vector<16x16x4xf32>
    "tpu.trace_stop"() : () -> ()
    %104 = arith.addf %99, %103 : vector<16x16x4xf32>
    %105 = vector.extract_strided_slice %63 {offsets = [2, 0, 0], sizes = [16, 16, 4], strides = [1, 1, 1]} : vector<18x16x4xf32> to vector<16x16x4xf32>
    %c2_118 = arith.constant 2 : index
    %c2_119 = arith.constant 2 : index
    %c0_120 = arith.constant 0 : index
    %c0_121 = arith.constant 0 : index
    %106 = vector.load %arg2[%c2_118, %c2_119, %c0_120, %c0_121] : memref<3x3x4x4xf32, #tpu.memory_space<vmem>>, vector<1x1x4x4xf32>
    %107 = vector.shape_cast %106 : vector<1x1x4x4xf32> to vector<4x4xf32>
    "tpu.trace_start"() <{level = 10 : i32, message = "hwc,cd->hwd"}> : () -> ()
    %cst_122 = arith.constant dense<0.000000e+00> : vector<16x16x4xf32>
    %108 = tpu.matmul %105, %107, %cst_122 {dimension_numbers = #tpu.dot_dimension_numbers<[2], [0], [0, 1], [1], [0, 0, 0, 1, 1, 1], [], []>} : vector<16x16x4xf32>, vector<4x4xf32>, vector<16x16x4xf32> -> vector<16x16x4xf32>
    "tpu.trace_stop"() : () -> ()
    %109 = arith.addf %104, %108 : vector<16x16x4xf32>
    %c0_123 = arith.constant 0 : index
    %c0_124 = arith.constant 0 : index
    %110 = vector.load %arg3[%c0_123, %c0_124] : memref<1x4xf32, #tpu.memory_space<vmem>>, vector<1x4xf32>
    %111 = vector.shape_cast %110 : vector<1x4xf32> to vector<1x1x4xf32>
    %112 = vector.broadcast %111 : vector<1x1x4xf32> to vector<16x16x4xf32>
    %113 = arith.addf %109, %112 : vector<16x16x4xf32>
    %c0_125 = arith.constant 0 : index
    %c0_126 = arith.constant 0 : index
    %c0_127 = arith.constant 0 : index
    %c0_128 = arith.constant 0 : index
    %114 = vector.load %arg1[%c0_125, %c0_126, %c0_127, %c0_128] : memref<1x16x16x4xf32, #tpu.memory_space<vmem>>, vector<1x16x16x4xf32>
    %115 = vector.shape_cast %114 : vector<1x16x16x4xf32> to vector<16x16x4xf32>
    %116 = arith.addf %113, %115 : vector<16x16x4xf32>
    %c0_129 = arith.constant 0 : index
    %c0_130 = arith.constant 0 : index
    %c0_131 = arith.constant 0 : index
    %c0_132 = arith.constant 0 : index
    %117 = vector.load %arg4[%c0_129, %c0_130, %c0_131, %c0_132] : memref<1x16x16x4xf32, #tpu.memory_space<vmem>>, vector<1x16x16x4xf32>
    %118 = vector.shape_cast %117 : vector<1x16x16x4xf32> to vector<16x16x4xf32>
    %119 = vector.shape_cast %116 : vector<16x16x4xf32> to vector<1x16x16x4xf32>
    tpu.vector_store %arg4[%c0_129, %c0_130, %c0_131, %c0_132], %119 {strides = array<i32>} : memref<1x16x16x4xf32, #tpu.memory_space<vmem>>, vector<1x16x16x4xf32>,
    return
  }
  func.func @transform_0(%arg0: i32) -> (i32, i32, i32, i32) {
    %c0_i32 = arith.constant 0 : i32
    %c0_i32_0 = arith.constant 0 : i32
    %c0_i32_1 = arith.constant 0 : i32
    %c0_i32_2 = arith.constant 0 : i32
    return %arg0, %c0_i32, %c0_i32_0, %c0_i32_1 : i32, i32, i32, i32
  }
  func.func @transform_1(%arg0: i32) -> (i32, i32, i32, i32) {
    %c0_i32 = arith.constant 0 : i32
    %c0_i32_0 = arith.constant 0 : i32
    %c0_i32_1 = arith.constant 0 : i32
    %c0_i32_2 = arith.constant 0 : i32
    %c0_i32_3 = arith.constant 0 : i32
    return %c0_i32, %c0_i32_0, %c0_i32_1, %c0_i32_2 : i32, i32, i32, i32
  }
  func.func @transform_2(%arg0: i32) -> (i32, i32) {
    %c0_i32 = arith.constant 0 : i32
    %c0_i32_0 = arith.constant 0 : i32
    %c0_i32_1 = arith.constant 0 : i32
    return %c0_i32, %c0_i32_0 : i32, i32
  }
  func.func @transform_3(%arg0: i32) -> (i32, i32, i32, i32) {
    %c0_i32 = arith.constant 0 : i32
    %c0_i32_0 = arith.constant 0 : i32
    %c0_i32_1 = arith.constant 0 : i32
    %c0_i32_2 = arith.constant 0 : i32
    return %arg0, %c0_i32, %c0_i32_0, %c0_i32_1 : i32, i32, i32, i32
  }
}

</mosaic_0001>

<bundles_post_ra>
// kernel: resblock_forward.1
= control target key start
LH: loop header
LB: loop body
LE: loop exit
PB: predicated region body
PF: predicated region fallthrough
CT: control target
= control target key end

     0   :  { %s8697_s12 = smov 0   ;;  %s10675_s0 = inlined_call_operand.vmem [shape: f32[2,16,16,4], index: 0, kind: input, shape index: {}]   ;;  %s10676_s1 = inlined_call_operand.vmem [shape: f32[3,3,4,4], index: 1, kind: input, shape index: {}]   ;;  %s10677_s2 = inlined_call_operand.vmem [shape: f32[1,4], index: 2, kind: input, shape index: {}]   ;;  %s10678_s3 = inlined_call_operand.vmem [shape: f32[2,16,16,4], index: 3, kind: output, shape index: {}]  }
   0x1 LB: > { %s6028_s13 = sadd.s32 4294967295, %s8674_s12   ;;  %p6032_p0 = scmp.ge.s32.totalorder %s8674_s12, 1  ;;  %s8674_s12 = sphi %s8697_s12, %s13_s12  }
   0x2   : > { %p137_p1 = scmp.lt.s32.totalorder %s8674_s12, 3 }
   0x4   : > { %p138_p2 = pnand %p6032_p0, %p137_p1 }
   0x6   : > { %141 = sbr.rel (%p138_p2) target bundleno = 1570 (0x622), region = 32 }
   0xd   : > { %v6037_v0 = vld [vmem:[%s10676_s1 + $0x4] sm:$0xf]  ;;  %vm499_vm0 = vcmask 1043456   ;;  %vm171_vm1 = vcmask 31744   ;;  %vm174_vm2 = vcmask 25600   ;;  %v8676_v1 = vmov 0.0  }
   0xe   : > { %7247 = vmatprep.subr.msk.mxu0 %vm499_vm0, %v6037_v0  ;;  %172 = vst.msk [vmem:[#allocation2] sm:$0xff] %vm171_vm1, %v8676_v1  ;;  %173 = vst.msk [vmem:[#allocation2 + $0x8] sm:$0xff] %vm171_vm1, %v8676_v1  ;;  %v400_v2 = vld [vmem:[%s10676_s1] sm:$0xf]  ;;  %p161_p3 = scmp.lt.s32.totalorder %s6028_s13, 1 }
   0xf   : > { %176 = vst.msk [vmem:[#allocation2 + $0x18] sm:$0xff] %vm171_vm1, %v8676_v1  ;;  %177 = vst.msk [vmem:[#allocation2 + $0x20] sm:$0xff] %vm171_vm1, %v8676_v1  ;;  %7248 = vmatpush3.msk.msra.mxu0 %vm499_vm0, %v6037_v0  ;;  %v8788_v6 = vld [vmem:[%s10676_s1 + $0x8] sm:$0xf] }
  0x10   : > { %179 = vst.msk [vmem:[#allocation2 + $0x30] sm:$0xff] %vm171_vm1, %v8676_v1  ;;  %180 = vst.msk [vmem:[#allocation2 + $0x38] sm:$0xff] %vm171_vm1, %v8676_v1  ;;  %7297 = vmatprep.subr.msk.mxu0 %vm499_vm0, %v400_v2  ;;  %s10988_s13 = smov (!%p161_p3, %s6028_s13), 1 }
  0x11   : > { %182 = vst.msk [vmem:[#allocation2 + $0x48] sm:$0xff] %vm171_vm1, %v8676_v1  ;;  %183 = vst.msk [vmem:[#allocation2 + $0x50] sm:$0xff] %vm171_vm1, %v8676_v1  ;;  %s6651_s18 = sshll.u32 %s10988_s13, 8 }
  0x12   : > { %185 = vst.msk [vmem:[#allocation2 + $0x60] sm:$0xff] %vm171_vm1, %v8676_v1  ;;  %186 = vst.msk [vmem:[#allocation2 + $0x68] sm:$0xff] %vm171_vm1, %v8676_v1  ;;  %s8780_s21 = scalar_lea.vmem %s10675_s0, %s6651_s18  ;;  %s10545_s10 = scalar_lea.vmem %s10678_s3, %s6651_s18 }
  0x13   : > { %188 = vst.msk [vmem:[#allocation2 + $0x78] sm:$0xff] %vm171_vm1, %v8676_v1  ;;  %189 = vst.msk [vmem:[#allocation2 + $0x80] sm:$0xff] %vm171_vm1, %v8676_v1  ;;  %v227_v3 = vld [vmem:[%s8780_s21] sm:$0xff]  ;;  %v228_v4 = vld [vmem:[%s8780_s21 + $0x8] sm:$0xff] }
  0x14   : > { %191 = vst.msk [vmem:[#allocation2 + $0x90] sm:$0xff] %vm171_vm1, %v8676_v1  ;;  %192 = vst.msk [vmem:[#allocation2 + $0x98] sm:$0xff] %vm171_vm1, %v8676_v1  ;;  %v229_v5 = vld [vmem:[%s8780_s21 + $0x10] sm:$0xff]  ;;  %v230_v9 = vld [vmem:[%s8780_s21 + $0x18] sm:$0xff] }
  0x15   : > { %194 = vst.msk [vmem:[#allocation2 + $0xa8] sm:$0xff] %vm171_vm1, %v8676_v1  ;;  %195 = vst.msk [vmem:[#allocation2 + $0xb0] sm:$0xff] %vm171_vm1, %v8676_v1  ;;  %v328_v7 = vld [vmem:[#allocation2 + $0x1] sm:$0xff]  ;;  %v233_v12 = vld [vmem:[%s8780_s21 + $0x30] sm:$0xff] }
  0x16   : > { %197 = vst.msk [vmem:[#allocation2 + $0xc0] sm:$0xff] %vm171_vm1, %v8676_v1  ;;  %198 = vst.msk [vmem:[#allocation2 + $0xc8] sm:$0xff] %vm171_vm1, %v8676_v1  ;;  %7249 = vmatprep.mubr.msk.f32.mxu0 %vm171_vm1, %v328_v7  ;;  %v231_v10 = vld [vmem:[%s8780_s21 + $0x20] sm:$0xff]  ;;  %v232_v11 = vld [vmem:[%s8780_s21 + $0x28] sm:$0xff] }
  0x17   : > { %200 = vst.msk [vmem:[#allocation2 + $0xd8] sm:$0xff] %vm171_vm1, %v8676_v1  ;;  %201 = vst.msk [vmem:[#allocation2 + $0xe0] sm:$0xff] %vm171_vm1, %v8676_v1  ;;  %v234_v13 = vld [vmem:[%s8780_s21 + $0x38] sm:$0xff]  ;;  %v235_v14 = vld [vmem:[%s8780_s21 + $0x40] sm:$0xff] }
  0x18   : > { %203 = vst.msk [vmem:[#allocation2 + $0xf0] sm:$0xff] %vm171_vm1, %v8676_v1  ;;  %204 = vst.msk [vmem:[#allocation2 + $0xf8] sm:$0xff] %vm171_vm1, %v8676_v1  ;;  %v236_v15 = vld [vmem:[%s8780_s21 + $0x48] sm:$0xff]  ;;  %v237_v16 = vld [vmem:[%s8780_s21 + $0x50] sm:$0xff] }
  0x19   : > { %206 = vst.msk [vmem:[#allocation2 + $0x108] sm:$0xff] %vm171_vm1, %v8676_v1  ;;  %207 = vst.msk [vmem:[#allocation2 + $0x110] sm:$0xff] %vm171_vm1, %v8676_v1  ;;  %v238_v17 = vld [vmem:[%s8780_s21 + $0x58] sm:$0xff]  ;;  %v239_v18 = vld [vmem:[%s8780_s21 + $0x60] sm:$0xff] }
  0x1a   : > { %209 = vst.msk [vmem:[#allocation2 + $0x120] sm:$0xff] %vm171_vm1, %v8676_v1  ;;  %210 = vst.msk [vmem:[#allocation2 + $0x128] sm:$0xff] %vm171_vm1, %v8676_v1  ;;  %v240_v19 = vld [vmem:[%s8780_s21 + $0x68] sm:$0xff]  ;;  %v241_v20 = vld [vmem:[%s8780_s21 + $0x70] sm:$0xff] }
  0x1b   : > { %212 = vst.msk [vmem:[#allocation2 + $0x138] sm:$0xff] %vm171_vm1, %v8676_v1  ;;  %213 = vst.msk [vmem:[#allocation2 + $0x140] sm:$0xff] %vm171_vm1, %v8676_v1  ;;  %v242_v21 = vld [vmem:[%s8780_s21 + $0x78] sm:$0xff]  ;;  %v243_v22 = vld [vmem:[%s8780_s21 + $0x80] sm:$0xff] }
  0x1c   : > { %215 = vst.msk [vmem:[#allocation2 + $0x150] sm:$0xff] %vm171_vm1, %v8676_v1  ;;  %216 = vst.msk [vmem:[#allocation2 + $0x158] sm:$0xff] %vm171_vm1, %v8676_v1  ;;  %v244_v23 = vld [vmem:[%s8780_s21 + $0x88] sm:$0xff]  ;;  %v245_v24 = vld [vmem:[%s8780_s21 + $0x90] sm:$0xff] }
  0x1d   : > { %218 = vst.msk [vmem:[#allocation2 + $0x168] sm:$0xff] %vm171_vm1, %v8676_v1  ;;  %219 = vst.msk [vmem:[#allocation2 + $0x170] sm:$0xff] %vm171_vm1, %v8676_v1  ;;  %v246_v25 = vld [vmem:[%s8780_s21 + $0x98] sm:$0xff]  ;;  %v247_v26 = vld [vmem:[%s8780_s21 + $0xa0] sm:$0xff] }
  0x1e   : > { %221 = vst.msk [vmem:[#allocation2 + $0x180] sm:$0xff] %vm171_vm1, %v8676_v1  ;;  %222 = vst.msk [vmem:[#allocation2 + $0x188] sm:$0xff] %vm171_vm1, %v8676_v1  ;;  %v248_v27 = vld [vmem:[%s8780_s21 + $0xa8] sm:$0xff]  ;;  %v249_v31 = vld [vmem:[%s8780_s21 + $0xb0] sm:$0xff] }
  0x1f   : > { %224 = vst.msk [vmem:[#allocation2 + $0x198] sm:$0xff] %vm171_vm1, %v8676_v1  ;;  %225 = vst.msk [vmem:[#allocation2 + $0x1a0] sm:$0xff] %vm171_vm1, %v8676_v1  ;;  %v250_v32 = vld [vmem:[%s8780_s21 + $0xb8] sm:$0xff]  ;;  %v251_v37 = vld [vmem:[%s8780_s21 + $0xc0] sm:$0xff] }
  0x20   : > { %175 = vst.msk [vmem:[#allocation2 + $0x10] sm:$0x3] %vm174_vm2, %v8676_v1  ;;  %178 = vst.msk [vmem:[#allocation2 + $0x28] sm:$0x3] %vm174_vm2, %v8676_v1  ;;  %v252_v38 = vld [vmem:[%s8780_s21 + $0xc8] sm:$0xff]  ;;  %v253_v39 = vld [vmem:[%s8780_s21 + $0xd0] sm:$0xff] }
  0x21   : > { %181 = vst.msk [vmem:[#allocation2 + $0x40] sm:$0x3] %vm174_vm2, %v8676_v1  ;;  %184 = vst.msk [vmem:[#allocation2 + $0x58] sm:$0x3] %vm174_vm2, %v8676_v1  ;;  %v254_v40 = vld [vmem:[%s8780_s21 + $0xd8] sm:$0xff]  ;;  %v255_v41 = vld [vmem:[%s8780_s21 + $0xe0] sm:$0xff] }
  0x22   : > { %187 = vst.msk [vmem:[#allocation2 + $0x70] sm:$0x3] %vm174_vm2, %v8676_v1  ;;  %190 = vst.msk [vmem:[#allocation2 + $0x88] sm:$0x3] %vm174_vm2, %v8676_v1  ;;  %v256_v42 = vld [vmem:[%s8780_s21 + $0xe8] sm:$0xff] }
  0x23   : > { %193 = vst.msk [vmem:[#allocation2 + $0xa0] sm:$0x3] %vm174_vm2, %v8676_v1  ;;  %196 = vst.msk [vmem:[#allocation2 + $0xb8] sm:$0x3] %vm174_vm2, %v8676_v1 }
  0x24   : > { %199 = vst.msk [vmem:[#allocation2 + $0xd0] sm:$0x3] %vm174_vm2, %v8676_v1  ;;  %202 = vst.msk [vmem:[#allocation2 + $0xe8] sm:$0x3] %vm174_vm2, %v8676_v1 }
  0x25   : > { %205 = vst.msk [vmem:[#allocation2 + $0x100] sm:$0x3] %vm174_vm2, %v8676_v1  ;;  %208 = vst.msk [vmem:[#allocation2 + $0x118] sm:$0x3] %vm174_vm2, %v8676_v1 }
  0x26   : > { %211 = vst.msk [vmem:[#allocation2 + $0x130] sm:$0x3] %vm174_vm2, %v8676_v1  ;;  %214 = vst.msk [vmem:[#allocation2 + $0x148] sm:$0x3] %vm174_vm2, %v8676_v1 }
  0x27   : > { %217 = vst.msk [vmem:[#allocation2 + $0x160] sm:$0x3] %vm174_vm2, %v8676_v1  ;;  %220 = vst.msk [vmem:[#allocation2 + $0x178] sm:$0x3] %vm174_vm2, %v8676_v1  ;;  %v329_v8 = vld [vmem:[#allocation2 + $0x9] sm:$0xff] }
  0x28   : > { %223 = vst.msk [vmem:[#allocation2 + $0x190] sm:$0x3] %vm174_vm2, %v8676_v1  ;;  %226 = vst.msk [vmem:[#allocation2 + $0x1a8] sm:$0x3] %vm174_vm2, %v8676_v1  ;;  %7250 = vmatmul.mubr.msk.f32.vlgmr.msra.gmra.mrb[0].mxu0 %vm171_vm1, %v329_v8 }
  0x29   : > { %260 = vst.msk [vmem:[#allocation2 + $0x19] sm:$0xff] %vm171_vm1, %v227_v3  ;;  %261 = vst.msk [vmem:[#allocation2 + $0x21] sm:$0xff] %vm171_vm1, %v228_v4  ;;  %7298 = vmatpush3.msk.msra.mxu0 %vm499_vm0, %v400_v2  ;;  %v292_v2 = vld [vmem:[#allocation2] sm:$0xff]  ;;  %v293_v3 = vld [vmem:[#allocation2 + $0x8] sm:$0xff] }
  0x2a   : > { %262 = vst.msk [vmem:[#allocation2 + $0x31] sm:$0xff] %vm171_vm1, %v229_v5  ;;  %263 = vst.msk [vmem:[#allocation2 + $0x39] sm:$0xff] %vm171_vm1, %v230_v9  ;;  %7347 = vmatprep.subr.msk.mxu0 %vm499_vm0, %v8788_v6  ;;  %v8978_v5 = vld [vmem:[%s10676_s1 + $0xc] sm:$0xf] }
  0x2b   : > { %264 = vst.msk [vmem:[#allocation2 + $0x49] sm:$0xff] %vm171_vm1, %v231_v10  ;;  %265 = vst.msk [vmem:[#allocation2 + $0x51] sm:$0xff] %vm171_vm1, %v232_v11 }
  0x2c   : > { %266 = vst.msk [vmem:[#allocation2 + $0x61] sm:$0xff] %vm171_vm1, %v233_v12  ;;  %267 = vst.msk [vmem:[#allocation2 + $0x69] sm:$0xff] %vm171_vm1, %v234_v13 }
  0x2d   : > { %268 = vst.msk [vmem:[#allocation2 + $0x79] sm:$0xff] %vm171_vm1, %v235_v14  ;;  %269 = vst.msk [vmem:[#allocation2 + $0x81] sm:$0xff] %vm171_vm1, %v236_v15 }
  0x2e   : > { %270 = vst.msk [vmem:[#allocation2 + $0x91] sm:$0xff] %vm171_vm1, %v237_v16  ;;  %271 = vst.msk [vmem:[#allocation2 + $0x99] sm:$0xff] %vm171_vm1, %v238_v17 }
  0x2f   : > { %272 = vst.msk [vmem:[#allocation2 + $0xa9] sm:$0xff] %vm171_vm1, %v239_v18  ;;  %273 = vst.msk [vmem:[#allocation2 + $0xb1] sm:$0xff] %vm171_vm1, %v240_v19 }
  0x30   : > { %274 = vst.msk [vmem:[#allocation2 + $0xc1] sm:$0xff] %vm171_vm1, %v241_v20  ;;  %275 = vst.msk [vmem:[#allocation2 + $0xc9] sm:$0xff] %vm171_vm1, %v242_v21  ;;  %v8833_v28 = vld [vmem:[#allocation2 + $0x19] sm:$0xff]  ;;  %v8835_v29 = vld [vmem:[#allocation2 + $0x21] sm:$0xff] }
  0x31   : > { %276 = vst.msk [vmem:[#allocation2 + $0xd9] sm:$0xff] %vm171_vm1, %v243_v22  ;;  %277 = vst.msk [vmem:[#allocation2 + $0xe1] sm:$0xff] %vm171_vm1, %v244_v23  ;;  %v8837_v30 = vld [vmem:[#allocation2 + $0x31] sm:$0xff]  ;;  %7252 = vmatprep.mubr.msk.f32.mxu0 %vm171_vm1, %v8833_v28  ;;  %v8852_v33 = vld [vmem:[#allocation2 + $0x39] sm:$0xff] }
  0x32   : > { %278 = vst.msk [vmem:[#allocation2 + $0xf1] sm:$0xff] %vm171_vm1, %v245_v24  ;;  %279 = vst.msk [vmem:[#allocation2 + $0xf9] sm:$0xff] %vm171_vm1, %v246_v25  ;;  %7253 = vmatmul.mubr.msk.f32.gmra.mrb[2].mxu0 %vm171_vm1, %v8835_v29  ;;  %v8854_v34 = vld [vmem:[#allocation2 + $0x49] sm:$0xff]  ;;  %v8860_v35 = vld [vmem:[#allocation2 + $0x51] sm:$0xff] }
  0x33   : > { %280 = vst.msk [vmem:[#allocation2 + $0x109] sm:$0xff] %vm171_vm1, %v247_v26  ;;  %281 = vst.msk [vmem:[#allocation2 + $0x111] sm:$0xff] %vm171_vm1, %v248_v27  ;;  %7255 = vmatprep.mubr.msk.f32.mxu0 %vm171_vm1, %v8837_v30  ;;  %v8862_v36 = vld [vmem:[#allocation2 + $0x61] sm:$0xff]  ;;  %v8878_v43 = vld [vmem:[#allocation2 + $0x69] sm:$0xff] }
  0x34   : > { %282 = vst.msk [vmem:[#allocation2 + $0x121] sm:$0xff] %vm171_vm1, %v249_v31  ;;  %283 = vst.msk [vmem:[#allocation2 + $0x129] sm:$0xff] %vm171_vm1, %v250_v32  ;;  %v8882_v44 = vld [vmem:[#allocation2 + $0x79] sm:$0xff]  ;;  %v8888_v45 = vld [vmem:[#allocation2 + $0x81] sm:$0xff] }
  0x35   : > { %284 = vst.msk [vmem:[#allocation2 + $0x139] sm:$0xff] %vm171_vm1, %v251_v37  ;;  %285 = vst.msk [vmem:[#allocation2 + $0x141] sm:$0xff] %vm171_vm1, %v252_v38  ;;  %v8890_v46 = vld [vmem:[#allocation2 + $0x91] sm:$0xff]  ;;  %v8896_v47 = vld [vmem:[#allocation2 + $0x99] sm:$0xff] }
  0x36   : > { %7256 = vmatmul.mubr.msk.f32.gmra.mrb[4].mxu0 %vm171_vm1, %v8852_v33  ;;  %286 = vst.msk [vmem:[#allocation2 + $0x151] sm:$0xff] %vm171_vm1, %v253_v39  ;;  %287 = vst.msk [vmem:[#allocation2 + $0x159] sm:$0xff] %vm171_vm1, %v254_v40  ;;  %v8898_v48 = vld [vmem:[#allocation2 + $0xa9] sm:$0xff]  ;;  %v8904_v49 = vld [vmem:[#allocation2 + $0xb1] sm:$0xff] }
  0x37   : > { %7258 = vmatprep.mubr.msk.f32.mxu0 %vm171_vm1, %v8854_v34  ;;  %288 = vst.msk [vmem:[#allocation2 + $0x169] sm:$0xff] %vm171_vm1, %v255_v41  ;;  %289 = vst.msk [vmem:[#allocation2 + $0x171] sm:$0xff] %vm171_vm1, %v256_v42  ;;  %v8906_v50 = vld [vmem:[#allocation2 + $0xc1] sm:$0xff]  ;;  %v8912_v51 = vld [vmem:[#allocation2 + $0xc9] sm:$0xff] }
  0x38   : > { %v8914_v52 = vld [vmem:[#allocation2 + $0xd9] sm:$0xff]  ;;  %v8920_v53 = vld [vmem:[#allocation2 + $0xe1] sm:$0xff]  ;;  %v8987_v8 = vld [vmem:[#allocation2 + $0x30] sm:$0xff] }
  0x39   : > { %v8922_v54 = vld [vmem:[#allocation2 + $0xf1] sm:$0xff]  ;;  %v8928_v55 = vld [vmem:[#allocation2 + $0xf9] sm:$0xff]  ;;  %v8997_v10 = vld [vmem:[#allocation2 + $0x48] sm:$0xff] }
  0x3a   : > { %7259 = vmatmul.mubr.msk.f32.gmra.mrb[6].mxu0 %vm171_vm1, %v8860_v35  ;;  %v8930_v56 = vld [vmem:[#allocation2 + $0x109] sm:$0xff]  ;;  %v8936_v57 = vld [vmem:[#allocation2 + $0x111] sm:$0xff]  ;;  %v8985_v7 = vld [vmem:[#allocation2 + $0x20] sm:$0xff] }
  0x3b   : > { %7261 = vmatprep.mubr.msk.f32.mxu0 %vm171_vm1, %v8862_v36  ;;  %v8938_v58 = vld [vmem:[#allocation2 + $0x121] sm:$0xff]  ;;  %v8944_v59 = vld [vmem:[#allocation2 + $0x129] sm:$0xff]  ;;  %v8973_v4 = vld [vmem:[#allocation2 + $0x18] sm:$0xff] }
  0x3c   : > { %10803 = vst [vmem:[#allocation3_spill] sm:$0xff] %v8938_v58  ;;  %10804 = vst [vmem:[#allocation4_spill] sm:$0xff] %v8944_v59  ;;  %v8946_v60 = vld [vmem:[#allocation2 + $0x139] sm:$0xff]  ;;  %v8952_v61 = vld [vmem:[#allocation2 + $0x141] sm:$0xff] }
  0x3d   : > { %10805 = vst [vmem:[#allocation5_spill] sm:$0xff] %v8946_v60  ;;  %10806 = vst [vmem:[#allocation6_spill] sm:$0xff] %v8952_v61  ;;  %v8954_v62 = vld [vmem:[#allocation2 + $0x151] sm:$0xff]  ;;  %v8960_v63 = vld [vmem:[#allocation2 + $0x159] sm:$0xff] }
  0x3e   : > { %7262 = vmatmul.mubr.msk.f32.gmra.mrb[8].mxu0 %vm171_vm1, %v8878_v43  ;;  %10807 = vst [vmem:[#allocation7_spill] sm:$0xff] %v8954_v62  ;;  %10808 = vst [vmem:[#allocation8_spill] sm:$0xff] %v8960_v63  ;;  %v8962_v0 = vld [vmem:[#allocation2 + $0x169] sm:$0xff]  ;;  %v8968_v1 = vld [vmem:[#allocation2 + $0x171] sm:$0xff] }
  0x3f   : > { %7264 = vmatprep.mubr.msk.f32.mxu0 %vm171_vm1, %v8882_v44  ;;  %10809 = vst [vmem:[#allocation9_spill] sm:$0xff] %v8962_v0  ;;  %10810 = vst [vmem:[#allocation10_spill] sm:$0xff] %v8968_v1  ;;  %v8995_v9 = vld [vmem:[#allocation2 + $0x38] sm:$0xff]  ;;  %v9005_v11 = vld [vmem:[#allocation2 + $0x60] sm:$0xff] }
  0x40   : > { %v9011_v12 = vld [vmem:[#allocation2 + $0x68] sm:$0xff]  ;;  %v9013_v13 = vld [vmem:[#allocation2 + $0x78] sm:$0xff]  ;;  %v9019_v14 = vld [vmem:[#allocation2 + $0x80] sm:$0xff] }
  0x41   : > { %v9021_v15 = vld [vmem:[#allocation2 + $0x90] sm:$0xff]  ;;  %v9027_v16 = vld [vmem:[#allocation2 + $0x98] sm:$0xff]  ;;  %v9029_v17 = vld [vmem:[#allocation2 + $0xa8] sm:$0xff] }
  0x42   : > { %7265 = vmatmul.mubr.msk.f32.gmra.mrb[10].mxu0 %vm171_vm1, %v8888_v45  ;;  %v9035_v18 = vld [vmem:[#allocation2 + $0xb0] sm:$0xff]  ;;  %v9037_v19 = vld [vmem:[#allocation2 + $0xc0] sm:$0xff]  ;;  %v9043_v20 = vld [vmem:[#allocation2 + $0xc8] sm:$0xff] }
  0x43   : > { %7267 = vmatprep.mubr.msk.f32.mxu0 %vm171_vm1, %v8890_v46  ;;  %v9045_v21 = vld [vmem:[#allocation2 + $0xd8] sm:$0xff]  ;;  %v9051_v22 = vld [vmem:[#allocation2 + $0xe0] sm:$0xff]  ;;  %v9053_v23 = vld [vmem:[#allocation2 + $0xf0] sm:$0xff] }
  0x44   : > { %v9059_v24 = vld [vmem:[#allocation2 + $0xf8] sm:$0xff]  ;;  %v9061_v25 = vld [vmem:[#allocation2 + $0x108] sm:$0xff]  ;;  %v9067_v26 = vld [vmem:[#allocation2 + $0x110] sm:$0xff] }
  0x45   : > { %v9069_v27 = vld [vmem:[#allocation2 + $0x120] sm:$0xff]  ;;  %v9075_v31 = vld [vmem:[#allocation2 + $0x128] sm:$0xff]  ;;  %v9077_v32 = vld [vmem:[#allocation2 + $0x138] sm:$0xff] }
  0x46   : > { %7268 = vmatmul.mubr.msk.f32.gmra.mrb[12].mxu0 %vm171_vm1, %v8896_v47  ;;  %v9083_v37 = vld [vmem:[#allocation2 + $0x140] sm:$0xff]  ;;  %v9085_v38 = vld [vmem:[#allocation2 + $0x150] sm:$0xff]  ;;  %v258_v40 = vld [vmem:[%s8780_s21 + $0xf8] sm:$0xff] }
  0x47   : > { %7270 = vmatprep.mubr.msk.f32.mxu0 %vm171_vm1, %v8898_v48  ;;  %v257_v39 = vld [vmem:[%s8780_s21 + $0xf0] sm:$0xff]  ;;  %291 = vst.msk [vmem:[#allocation2 + $0x189] sm:$0xff] %vm171_vm1, %v258_v40  ;;  %v9095_v41 = vld [vmem:[#allocation2 + $0x158] sm:$0xff]  ;;  %v9097_v42 = vld [vmem:[#allocation2 + $0x168] sm:$0xff] }
  0x48   : > { %290 = vst.msk [vmem:[#allocation2 + $0x181] sm:$0xff] %vm171_vm1, %v257_v39  ;;  %v365_v39 = vld [vmem:[#allocation2 + $0xa] sm:$0xff]  ;;  %v9108_v40 = vld [vmem:[#allocation2 + $0x1a] sm:$0xff] }
  0x49   : > { %10811 = vst [vmem:[#allocation11_spill] sm:$0xff] %v9108_v40 }
  0x4a   : > { %7271 = vmatmul.mubr.msk.f32.gmra.mrb[14].mxu0 %vm171_vm1, %v8904_v49 }
  0x4b   : > { %7273 = vmatprep.mubr.msk.f32.mxu0 %vm171_vm1, %v8906_v50 }
  0x4e   : > { %7274 = vmatmul.mubr.msk.f32.gmra.mrb[16].mxu0 %vm171_vm1, %v8912_v51 }
  0x4f   : > { %7276 = vmatprep.mubr.msk.f32.mxu0 %vm171_vm1, %v8914_v52 }
  0x52   : > { %7277 = vmatmul.mubr.msk.f32.gmra.mrb[18].mxu0 %vm171_vm1, %v8920_v53 }
  0x53   : > { %7279 = vmatprep.mubr.msk.f32.mxu0 %vm171_vm1, %v8922_v54 }
  0x56   : > { %7280 = vmatmul.mubr.msk.f32.gmra.mrb[20].mxu0 %vm171_vm1, %v8928_v55 }
  0x57   : > { %7282 = vmatprep.mubr.msk.f32.mxu0 %vm171_vm1, %v8930_v56 }
  0x5a   : > { %7283 = vmatmul.mubr.msk.f32.gmra.mrb[22].mxu0 %vm171_vm1, %v8936_v57 }
  0x5b   : > { %7285 = vmatprep.mubr.msk.f32.mxu0 %vm171_vm1, %v8938_v58 }
  0x5e   : > { %7286 = vmatmul.mubr.msk.f32.gmra.mrb[24].mxu0 %vm171_vm1, %v8944_v59 }
  0x5f   : > { %7288 = vmatprep.mubr.msk.f32.mxu0 %vm171_vm1, %v8946_v60 }
  0x62   : > { %7289 = vmatmul.mubr.msk.f32.gmra.mrb[26].mxu0 %vm171_vm1, %v8952_v61 }
  0x63   : > { %7291 = vmatprep.mubr.msk.f32.mxu0 %vm171_vm1, %v8954_v62 }
  0x66   : > { %7292 = vmatmul.mubr.msk.f32.gmra.mrb[28].mxu0 %vm171_vm1, %v8960_v63  ;;  %v9122_v63 = vld [vmem:[#allocation2 + $0x32] sm:$0xff] }
  0x67   : > { %7294 = vmatprep.mubr.msk.f32.mxu0 %vm171_vm1, %v8962_v0  ;;  %v9120_v0 = vld [vmem:[#allocation2 + $0x22] sm:$0xff]  ;;  %10813 = vst [vmem:[#allocation13_spill] sm:$0xff] %v9122_v63 }
  0x68   : > { %10812 = vst [vmem:[#allocation12_spill] sm:$0xff] %v9120_v0 }
  0x6a   : > { %7295 = vmatmul.mubr.msk.f32.gmra.mrb[30].mxu0 %vm171_vm1, %v8968_v1  ;;  %v9113_v1 = vld [vmem:[%s10676_s1 + $0x10] sm:$0xf] }
  0x6b   : > { %7299 = vmatprep.mubr.msk.f32.mxu0 %vm171_vm1, %v292_v2  ;;  %v9103_v2 = vld [vmem:[#allocation2 + $0x170] sm:$0xff] }
  0x6e   : > { %7300 = vmatmul.mubr.msk.f32.vlgmr.msra.gmra.mrb[0].mxu0 %vm171_vm1, %v293_v3  ;;  %v364_v3 = vld [vmem:[#allocation2 + $0x2] sm:$0xff] }
  0x6f   : > { %7348 = vmatpush3.msk.msra.mxu0 %vm499_vm0, %v8788_v6  ;;  %7302 = vmatprep.mubr.msk.f32.mxu0 %vm171_vm1, %v8973_v4  ;;  %v9003_v6 = vld [vmem:[#allocation2 + $0x50] sm:$0xff] }
  0x70   : > { %7397 = vmatprep.subr.msk.mxu0 %vm499_vm0, %v8978_v5 }
  0x72   : > { %7303 = vmatmul.mubr.msk.f32.gmra.mrb[2].mxu0 %vm171_vm1, %v8985_v7 }
  0x73   : > { %7305 = vmatprep.mubr.msk.f32.mxu0 %vm171_vm1, %v8987_v8 }
  0x76   : > { %7306 = vmatmul.mubr.msk.f32.gmra.mrb[4].mxu0 %vm171_vm1, %v8995_v9 }
  0x77   : > { %7308 = vmatprep.mubr.msk.f32.mxu0 %vm171_vm1, %v8997_v10 }
  0x7a   : > { %7309 = vmatmul.mubr.msk.f32.gmra.mrb[6].mxu0 %vm171_vm1, %v9003_v6 }
  0x7b   : > { %7311 = vmatprep.mubr.msk.f32.mxu0 %vm171_vm1, %v9005_v11 }
  0x7e   : > { %7312 = vmatmul.mubr.msk.f32.gmra.mrb[8].mxu0 %vm171_vm1, %v9011_v12 }
  0x7f   : > { %7314 = vmatprep.mubr.msk.f32.mxu0 %vm171_vm1, %v9013_v13 }
  0x82   : > { %7315 = vmatmul.mubr.msk.f32.gmra.mrb[10].mxu0 %vm171_vm1, %v9019_v14 }
  0x83   : > { %7317 = vmatprep.mubr.msk.f32.mxu0 %vm171_vm1, %v9021_v15 }
  0x86   : > { %7318 = vmatmul.mubr.msk.f32.gmra.mrb[12].mxu0 %vm171_vm1, %v9027_v16 }
  0x87   : > { %7320 = vmatprep.mubr.msk.f32.mxu0 %vm171_vm1, %v9029_v17 }
  0x8a   : > { %7321 = vmatmul.mubr.msk.f32.gmra.mrb[14].mxu0 %vm171_vm1, %v9035_v18 }
  0x8b   : > { %7323 = vmatprep.mubr.msk.f32.mxu0 %vm171_vm1, %v9037_v19 }
  0x8e   : > { %7324 = vmatmul.mubr.msk.f32.gmra.mrb[16].mxu0 %vm171_vm1, %v9043_v20 }
  0x8f   : > { %7326 = vmatprep.mubr.msk.f32.mxu0 %vm171_vm1, %v9045_v21 }
  0x92   : > { %7327 = vmatmul.mubr.msk.f32.gmra.mrb[18].mxu0 %vm171_vm1, %v9051_v22 }
  0x93   : > { %7329 = vmatprep.mubr.msk.f32.mxu0 %vm171_vm1, %v9053_v23 }
  0x96   : > { %7330 = vmatmul.mubr.msk.f32.gmra.mrb[20].mxu0 %vm171_vm1, %v9059_v24 }
  0x97   : > { %7332 = vmatprep.mubr.msk.f32.mxu0 %vm171_vm1, %v9061_v25 }
  0x9a   : > { %7333 = vmatmul.mubr.msk.f32.gmra.mrb[22].mxu0 %vm171_vm1, %v9067_v26 }
  0x9b   : > { %7335 = vmatprep.mubr.msk.f32.mxu0 %vm171_vm1, %v9069_v27 }
  0x9e   : > { %7336 = vmatmul.mubr.msk.f32.gmra.mrb[24].mxu0 %vm171_vm1, %v9075_v31 }
  0x9f   : > { %7338 = vmatprep.mubr.msk.f32.mxu0 %vm171_vm1, %v9077_v32 }
  0xa2   : > { %7339 = vmatmul.mubr.msk.f32.gmra.mrb[26].mxu0 %vm171_vm1, %v9083_v37 }
  0xa3   : > { %7341 = vmatprep.mubr.msk.f32.mxu0 %vm171_vm1, %v9085_v38 }
  0xa6   : > { %7342 = vmatmul.mubr.msk.f32.gmra.mrb[28].mxu0 %vm171_vm1, %v9095_v41 }
  0xa7   : > { %7344 = vmatprep.mubr.msk.f32.mxu0 %vm171_vm1, %v9097_v42 }
  0xaa   : > { %7345 = vmatmul.mubr.msk.f32.gmra.mrb[30].mxu0 %vm171_vm1, %v9103_v2 }
  0xab   : > { %7349 = vmatprep.mubr.msk.f32.mxu0 %vm171_vm1, %v364_v3  ;;  %v9130_v3 = vld [vmem:[#allocation2 + $0x3a] sm:$0xff] }
  0xac   : > { %10814 = vst [vmem:[#allocation14_spill] sm:$0xff] %v9130_v3 }
  0xae   : > { %7350 = vmatmul.mubr.msk.f32.vlgmr.msra.gmra.mrb[0].mxu0 %vm171_vm1, %v365_v39  ;;  %v9132_v39 = vld [vmem:[#allocation2 + $0x4a] sm:$0xff] }
  0xaf   : > { %7398 = vmatpush3.msk.msra.mxu0 %vm499_vm0, %v8978_v5  ;;  %7352 = vmatprep.mubr.msk.f32.mxu0 %vm171_vm1, %v9108_v40  ;;  %10815 = vst [vmem:[#allocation15_spill] sm:$0xff] %v9132_v39  ;;  %v9138_v5 = vld [vmem:[#allocation2 + $0x52] sm:$0xff]  ;;  %v9140_v40 = vld [vmem:[#allocation2 + $0x62] sm:$0xff] }
  0xb0   : > { %7447 = vmatprep.subr.msk.mxu0 %vm499_vm0, %v9113_v1  ;;  %10816 = vst [vmem:[#allocation16_spill] sm:$0xff] %v9138_v5  ;;  %10817 = vst [vmem:[#allocation17_spill] sm:$0xff] %v9140_v40 }
  0xb2   : > { %7353 = vmatmul.mubr.msk.f32.gmra.mrb[2].mxu0 %vm171_vm1, %v9120_v0  ;;  %v9148_v0 = vld [vmem:[#allocation2 + $0x7a] sm:$0xff] }
  0xb3   : > { %7355 = vmatprep.mubr.msk.f32.mxu0 %vm171_vm1, %v9122_v63  ;;  %v9146_v63 = vld [vmem:[#allocation2 + $0x6a] sm:$0xff]  ;;  %10819 = vst [vmem:[#allocation19_spill] sm:$0xff] %v9148_v0 }
  0xb4   : > { %10818 = vst [vmem:[#allocation18_spill] sm:$0xff] %v9146_v63 }
  0xb6   : > { %7356 = vmatmul.mubr.msk.f32.gmra.mrb[4].mxu0 %vm171_vm1, %v9130_v3  ;;  %v9156_v3 = vld [vmem:[#allocation2 + $0x92] sm:$0xff] }
  0xb7   : > { %7358 = vmatprep.mubr.msk.f32.mxu0 %vm171_vm1, %v9132_v39  ;;  %v9154_v39 = vld [vmem:[#allocation2 + $0x82] sm:$0xff]  ;;  %10821 = vst [vmem:[#allocation21_spill] sm:$0xff] %v9156_v3 }
  0xb8   : > { %10820 = vst [vmem:[#allocation20_spill] sm:$0xff] %v9154_v39 }
  0xba   : > { %7359 = vmatmul.mubr.msk.f32.gmra.mrb[6].mxu0 %vm171_vm1, %v9138_v5  ;;  %v9164_v5 = vld [vmem:[#allocation2 + $0xaa] sm:$0xff] }
  0xbb   : > { %7361 = vmatprep.mubr.msk.f32.mxu0 %vm171_vm1, %v9140_v40  ;;  %v9162_v40 = vld [vmem:[#allocation2 + $0x9a] sm:$0xff]  ;;  %10823 = vst [vmem:[#allocation23_spill] sm:$0xff] %v9164_v5 }
  0xbc   : > { %10822 = vst [vmem:[#allocation22_spill] sm:$0xff] %v9162_v40 }
  0xbe   : > { %7362 = vmatmul.mubr.msk.f32.gmra.mrb[8].mxu0 %vm171_vm1, %v9146_v63  ;;  %v9172_v63 = vld [vmem:[#allocation2 + $0xc2] sm:$0xff] }
  0xbf   : > { %7364 = vmatprep.mubr.msk.f32.mxu0 %vm171_vm1, %v9148_v0  ;;  %v9170_v0 = vld [vmem:[#allocation2 + $0xb2] sm:$0xff]  ;;  %10825 = vst [vmem:[#allocation25_spill] sm:$0xff] %v9172_v63 }
  0xc0   : > { %10824 = vst [vmem:[#allocation24_spill] sm:$0xff] %v9170_v0 }
  0xc2   : > { %7365 = vmatmul.mubr.msk.f32.gmra.mrb[10].mxu0 %vm171_vm1, %v9154_v39  ;;  %v9180_v39 = vld [vmem:[#allocation2 + $0xda] sm:$0xff] }
  0xc3   : > { %7367 = vmatprep.mubr.msk.f32.mxu0 %vm171_vm1, %v9156_v3  ;;  %v9178_v3 = vld [vmem:[#allocation2 + $0xca] sm:$0xff]  ;;  %10827 = vst [vmem:[#allocation27_spill] sm:$0xff] %v9180_v39 }
  0xc4   : > { %10826 = vst [vmem:[#allocation26_spill] sm:$0xff] %v9178_v3 }
  0xc6   : > { %7368 = vmatmul.mubr.msk.f32.gmra.mrb[12].mxu0 %vm171_vm1, %v9162_v40  ;;  %v9188_v40 = vld [vmem:[#allocation2 + $0xf2] sm:$0xff] }
  0xc7   : > { %7370 = vmatprep.mubr.msk.f32.mxu0 %vm171_vm1, %v9164_v5  ;;  %v9186_v5 = vld [vmem:[#allocation2 + $0xe2] sm:$0xff]  ;;  %10829 = vst [vmem:[#allocation29_spill] sm:$0xff] %v9188_v40 }
  0xc8   : > { %10828 = vst [vmem:[#allocation28_spill] sm:$0xff] %v9186_v5 }
  0xca   : > { %7371 = vmatmul.mubr.msk.f32.gmra.mrb[14].mxu0 %vm171_vm1, %v9170_v0  ;;  %v9196_v0 = vld [vmem:[#allocation2 + $0x10a] sm:$0xff] }
  0xcb   : > { %7373 = vmatprep.mubr.msk.f32.mxu0 %vm171_vm1, %v9172_v63  ;;  %v9194_v63 = vld [vmem:[#allocation2 + $0xfa] sm:$0xff]  ;;  %10831 = vst [vmem:[#allocation31_spill] sm:$0xff] %v9196_v0 }
  0xcc   : > { %10830 = vst [vmem:[#allocation30_spill] sm:$0xff] %v9194_v63 }
  0xce   : > { %7374 = vmatmul.mubr.msk.f32.gmra.mrb[16].mxu0 %vm171_vm1, %v9178_v3  ;;  %v9204_v3 = vld [vmem:[#allocation2 + $0x122] sm:$0xff] }
  0xcf   : > { %7376 = vmatprep.mubr.msk.f32.mxu0 %vm171_vm1, %v9180_v39  ;;  %v9202_v39 = vld [vmem:[#allocation2 + $0x112] sm:$0xff]  ;;  %10833 = vst [vmem:[#allocation33_spill] sm:$0xff] %v9204_v3 }
  0xd0   : > { %10832 = vst [vmem:[#allocation32_spill] sm:$0xff] %v9202_v39 }
  0xd2   : > { %7377 = vmatmul.mubr.msk.f32.gmra.mrb[18].mxu0 %vm171_vm1, %v9186_v5  ;;  %v9212_v5 = vld [vmem:[#allocation2 + $0x13a] sm:$0xff] }
  0xd3   : > { %7379 = vmatprep.mubr.msk.f32.mxu0 %vm171_vm1, %v9188_v40  ;;  %v9210_v40 = vld [vmem:[#allocation2 + $0x12a] sm:$0xff]  ;;  %10834 = vst [vmem:[#allocation34_spill] sm:$0xff] %v9212_v5 }
  0xd6   : > { %7380 = vmatmul.mubr.msk.f32.gmra.mrb[20].mxu0 %vm171_vm1, %v9194_v63  ;;  %v9220_v63 = vld [vmem:[#allocation2 + $0x152] sm:$0xff] }
  0xd7   : > { %7382 = vmatprep.mubr.msk.f32.mxu0 %vm171_vm1, %v9196_v0  ;;  %v9218_v0 = vld [vmem:[#allocation2 + $0x142] sm:$0xff]  ;;  %10835 = vst [vmem:[#allocation35_spill] sm:$0xff] %v9220_v63 }
  0xda   : > { %7383 = vmatmul.mubr.msk.f32.gmra.mrb[22].mxu0 %vm171_vm1, %v9202_v39  ;;  %v9228_v39 = vld [vmem:[#allocation2 + $0x16a] sm:$0xff] }
  0xdb   : > { %7385 = vmatprep.mubr.msk.f32.mxu0 %vm171_vm1, %v9204_v3  ;;  %v9226_v3 = vld [vmem:[#allocation2 + $0x15a] sm:$0xff]  ;;  %10836 = vst [vmem:[#allocation36_spill] sm:$0xff] %v9228_v39 }
  0xde   : > { %7386 = vmatmul.mubr.msk.f32.gmra.mrb[24].mxu0 %vm171_vm1, %v9210_v40 }
  0xdf   : > { %7388 = vmatprep.mubr.msk.f32.mxu0 %vm171_vm1, %v9212_v5  ;;  %v9234_v5 = vld [vmem:[#allocation2 + $0x172] sm:$0xff] }
  0xe2   : > { %7389 = vmatmul.mubr.msk.f32.gmra.mrb[26].mxu0 %vm171_vm1, %v9218_v0 }
  0xe3   : > { %7391 = vmatprep.mubr.msk.f32.mxu0 %vm171_vm1, %v9220_v63  ;;  %v6206_v63 = vld [vmem:[%s10676_s1 + $0x14] sm:$0xf] }
  0xe6   : > { %7392 = vmatmul.mubr.msk.f32.gmra.mrb[28].mxu0 %vm171_vm1, %v9226_v3 }
  0xe7   : > { %7394 = vmatprep.mubr.msk.f32.mxu0 %vm171_vm1, %v9228_v39 }
  0xea   : > { %7395 = vmatmul.mubr.msk.f32.gmra.mrb[30].mxu0 %vm171_vm1, %v9234_v5 }
  0xeb   : > { %7399 = vmatprep.mubr.msk.f32.mxu0 %vm171_vm1, %v8973_v4  ;;  %v9308_v4 = vld [vmem:[#allocation2 + $0x188] sm:$0xff] }
  0xee   : > { %7400 = vmatmul.mubr.msk.f32.vlgmr.msra.gmra.mrb[0].mxu0 %vm171_vm1, %v8985_v7  ;;  %v6240_v7 = vld [vmem:[%s10676_s1 + $0x18] sm:$0xf] }
  0xef   : > { %7448 = vmatpush3.msk.msra.mxu0 %vm499_vm0, %v9113_v1  ;;  %7402 = vmatprep.mubr.msk.f32.mxu0 %vm171_vm1, %v8987_v8  ;;  %v9302_v1 = vld [vmem:[#allocation2 + $0x180] sm:$0xff] }
  0xf0   : > { %7497 = vmatprep.subr.msk.mxu0 %vm499_vm0, %v6206_v63 }
  0xf2   : > { %7403 = vmatmul.mubr.msk.f32.gmra.mrb[2].mxu0 %vm171_vm1, %v8995_v9 }
  0xf3   : > { %7405 = vmatprep.mubr.msk.f32.mxu0 %vm171_vm1, %v8997_v10 }
  0xf6   : > { %7406 = vmatmul.mubr.msk.f32.gmra.mrb[4].mxu0 %vm171_vm1, %v9003_v6 }
  0xf7   : > { %7408 = vmatprep.mubr.msk.f32.mxu0 %vm171_vm1, %v9005_v11 }
  0xfa   : > { %7409 = vmatmul.mubr.msk.f32.gmra.mrb[6].mxu0 %vm171_vm1, %v9011_v12 }
  0xfb   : > { %7411 = vmatprep.mubr.msk.f32.mxu0 %vm171_vm1, %v9013_v13 }
  0xfe   : > { %7412 = vmatmul.mubr.msk.f32.gmra.mrb[8].mxu0 %vm171_vm1, %v9019_v14 }
  0xff   : > { %7414 = vmatprep.mubr.msk.f32.mxu0 %vm171_vm1, %v9021_v15 }
 0x102   : > { %7415 = vmatmul.mubr.msk.f32.gmra.mrb[10].mxu0 %vm171_vm1, %v9027_v16 }
 0x103   : > { %7417 = vmatprep.mubr.msk.f32.mxu0 %vm171_vm1, %v9029_v17 }
 0x106   : > { %7418 = vmatmul.mubr.msk.f32.gmra.mrb[12].mxu0 %vm171_vm1, %v9035_v18 }
 0x107   : > { %7420 = vmatprep.mubr.msk.f32.mxu0 %vm171_vm1, %v9037_v19 }
 0x10a   : > { %7421 = vmatmul.mubr.msk.f32.gmra.mrb[14].mxu0 %vm171_vm1, %v9043_v20 }
 0x10b   : > { %7423 = vmatprep.mubr.msk.f32.mxu0 %vm171_vm1, %v9045_v21 }
 0x10e   : > { %7424 = vmatmul.mubr.msk.f32.gmra.mrb[16].mxu0 %vm171_vm1, %v9051_v22 }
 0x10f   : > { %7426 = vmatprep.mubr.msk.f32.mxu0 %vm171_vm1, %v9053_v23 }
 0x112   : > { %7427 = vmatmul.mubr.msk.f32.gmra.mrb[18].mxu0 %vm171_vm1, %v9059_v24 }
 0x113   : > { %7429 = vmatprep.mubr.msk.f32.mxu0 %vm171_vm1, %v9061_v25 }
 0x116   : > { %7430 = vmatmul.mubr.msk.f32.gmra.mrb[20].mxu0 %vm171_vm1, %v9067_v26 }
 0x117   : > { %7432 = vmatprep.mubr.msk.f32.mxu0 %vm171_vm1, %v9069_v27 }
 0x11a   : > { %7433 = vmatmul.mubr.msk.f32.gmra.mrb[22].mxu0 %vm171_vm1, %v9075_v31 }
 0x11b   : > { %7435 = vmatprep.mubr.msk.f32.mxu0 %vm171_vm1, %v9077_v32 }
 0x11e   : > { %7436 = vmatmul.mubr.msk.f32.gmra.mrb[24].mxu0 %vm171_vm1, %v9083_v37 }
 0x11f   : > { %7438 = vmatprep.mubr.msk.f32.mxu0 %vm171_vm1, %v9085_v38 }
 0x122   : > { %7439 = vmatmul.mubr.msk.f32.gmra.mrb[26].mxu0 %vm171_vm1, %v9095_v41 }
 0x123   : > { %7441 = vmatprep.mubr.msk.f32.mxu0 %vm171_vm1, %v9097_v42 }
 0x126   : > { %7442 = vmatmul.mubr.msk.f32.gmra.mrb[28].mxu0 %vm171_vm1, %v9103_v2 }
 0x127   : > { %7444 = vmatprep.mubr.msk.f32.mxu0 %vm171_vm1, %v9302_v1 }
 0x12a   : > { %7445 = vmatmul.mubr.msk.f32.gmra.mrb[30].mxu0 %vm171_vm1, %v9308_v4 }
 0x12b   : > { %7449 = vmatprep.mubr.msk.f32.mxu0 %vm171_vm1, %v8833_v28  ;;  %v10837_v28 = vld [vmem:[#allocation8_spill] sm:$0xff] }
 0x12e   : > { %7450 = vmatmul.mubr.msk.f32.vlgmr.msra.gmra.mrb[0].mxu0 %vm171_vm1, %v8835_v29  ;;  %v10838_v29 = vld [vmem:[#allocation9_spill] sm:$0xff] }
 0x12f   : > { %7498 = vmatpush3.msk.msra.mxu0 %vm499_vm0, %v6206_v63  ;;  %7452 = vmatprep.mubr.msk.f32.mxu0 %vm171_vm1, %v8837_v30  ;;  %v9375_v63 = vld [vmem:[#allocation2 + $0x181] sm:$0xff] }
 0x130   : > { %7547 = vmatprep.subr.msk.mxu0 %vm499_vm0, %v6240_v7  ;;  %10839 = vst [vmem:[#allocation37_spill] sm:$0xff] %v9375_v63 }
 0x132   : > { %7453 = vmatmul.mubr.msk.f32.gmra.mrb[2].mxu0 %vm171_vm1, %v8852_v33 }
 0x133   : > { %7455 = vmatprep.mubr.msk.f32.mxu0 %vm171_vm1, %v8854_v34 }
 0x136   : > { %7456 = vmatmul.mubr.msk.f32.gmra.mrb[4].mxu0 %vm171_vm1, %v8860_v35 }
 0x137   : > { %7458 = vmatprep.mubr.msk.f32.mxu0 %vm171_vm1, %v8862_v36 }
 0x13a   : > { %7459 = vmatmul.mubr.msk.f32.gmra.mrb[6].mxu0 %vm171_vm1, %v8878_v43 }
 0x13b   : > { %7461 = vmatprep.mubr.msk.f32.mxu0 %vm171_vm1, %v8882_v44 }
 0x13e   : > { %7462 = vmatmul.mubr.msk.f32.gmra.mrb[8].mxu0 %vm171_vm1, %v8888_v45 }
 0x13f   : > { %7464 = vmatprep.mubr.msk.f32.mxu0 %vm171_vm1, %v8890_v46 }
 0x142   : > { %7465 = vmatmul.mubr.msk.f32.gmra.mrb[10].mxu0 %vm171_vm1, %v8896_v47 }
 0x143   : > { %7467 = vmatprep.mubr.msk.f32.mxu0 %vm171_vm1, %v8898_v48 }
 0x146   : > { %7468 = vmatmul.mubr.msk.f32.gmra.mrb[12].mxu0 %vm171_vm1, %v8904_v49 }
 0x147   : > { %7470 = vmatprep.mubr.msk.f32.mxu0 %vm171_vm1, %v8906_v50 }
 0x14a   : > { %7471 = vmatmul.mubr.msk.f32.gmra.mrb[14].mxu0 %vm171_vm1, %v8912_v51 }
 0x14b   : > { %7473 = vmatprep.mubr.msk.f32.mxu0 %vm171_vm1, %v8914_v52 }
 0x14e   : > { %7474 = vmatmul.mubr.msk.f32.gmra.mrb[16].mxu0 %vm171_vm1, %v8920_v53 }
 0x14f   : > { %7476 = vmatprep.mubr.msk.f32.mxu0 %vm171_vm1, %v8922_v54 }
 0x152   : > { %7477 = vmatmul.mubr.msk.f32.gmra.mrb[18].mxu0 %vm171_vm1, %v8928_v55 }
 0x153   : > { %7479 = vmatprep.mubr.msk.f32.mxu0 %vm171_vm1, %v8930_v56 }
 0x156   : > { %7480 = vmatmul.mubr.msk.f32.gmra.mrb[20].mxu0 %vm171_vm1, %v8936_v57 }
 0x157   : > { %7482 = vmatprep.mubr.msk.f32.mxu0 %vm171_vm1, %v8938_v58  ;;  %v10840_v58 = vld [vmem:[#allocation10_spill] sm:$0xff] }
 0x15a   : > { %7483 = vmatmul.mubr.msk.f32.gmra.mrb[22].mxu0 %vm171_vm1, %v8944_v59  ;;  %v10852_v59 = vld [vmem:[#allocation21_spill] sm:$0xff] }
 0x15b   : > { %7485 = vmatprep.mubr.msk.f32.mxu0 %vm171_vm1, %v8946_v60  ;;  %v9381_v60 = vld [vmem:[#allocation2 + $0x189] sm:$0xff] }
 0x15c   : > { %10841 = vst [vmem:[#allocation38_spill] sm:$0xff] %v9381_v60 }
 0x15e   : > { %7486 = vmatmul.mubr.msk.f32.gmra.mrb[24].mxu0 %vm171_vm1, %v8952_v61  ;;  %v10848_v61 = vld [vmem:[#allocation17_spill] sm:$0xff] }
 0x15f   : > { %7488 = vmatprep.mubr.msk.f32.mxu0 %vm171_vm1, %v8954_v62  ;;  %v10842_v62 = vld [vmem:[#allocation11_spill] sm:$0xff] }
 0x162   : > { %7489 = vmatmul.mubr.msk.f32.gmra.mrb[26].mxu0 %vm171_vm1, %v10837_v28  ;;  %v10843_v28 = vld [vmem:[#allocation12_spill] sm:$0xff] }
 0x163   : > { %7491 = vmatprep.mubr.msk.f32.mxu0 %vm171_vm1, %v10838_v29  ;;  %v6274_v29 = vld [vmem:[%s10676_s1 + $0x1c] sm:$0xf] }
 0x166   : > { %7492 = vmatmul.mubr.msk.f32.gmra.mrb[28].mxu0 %vm171_vm1, %v10840_v58  ;;  %v10844_v58 = vld [vmem:[#allocation13_spill] sm:$0xff] }
 0x167   : > { %7494 = vmatprep.mubr.msk.f32.mxu0 %vm171_vm1, %v9375_v63  ;;  %v10845_v63 = vld [vmem:[#allocation14_spill] sm:$0xff] }
 0x16a   : > { %7495 = vmatmul.mubr.msk.f32.gmra.mrb[30].mxu0 %vm171_vm1, %v9381_v60  ;;  %v10846_v60 = vld [vmem:[#allocation15_spill] sm:$0xff] }
 0x16b   : > { %7499 = vmatprep.mubr.msk.f32.mxu0 %vm171_vm1, %v10842_v62  ;;  %v10847_v62 = vld [vmem:[#allocation16_spill] sm:$0xff] }
 0x16e   : > { %7500 = vmatmul.mubr.msk.f32.vlgmr.msra.gmra.mrb[0].mxu0 %vm171_vm1, %v10843_v28  ;;  %v10849_v28 = vld [vmem:[#allocation18_spill] sm:$0xff] }
 0x16f   : > { %7548 = vmatpush3.msk.msra.mxu0 %vm499_vm0, %v6240_v7  ;;  %7502 = vmatprep.mubr.msk.f32.mxu0 %vm171_vm1, %v10844_v58  ;;  %v10850_v7 = vld [vmem:[#allocation19_spill] sm:$0xff]  ;;  %v10851_v58 = vld [vmem:[#allocation20_spill] sm:$0xff] }
 0x170   : > { %7597 = vmatprep.subr.msk.mxu0 %vm499_vm0, %v6274_v29 }
 0x172   : > { %7503 = vmatmul.mubr.msk.f32.gmra.mrb[2].mxu0 %vm171_vm1, %v10845_v63  ;;  %v10853_v63 = vld [vmem:[#allocation22_spill] sm:$0xff] }
 0x173   : > { %7505 = vmatprep.mubr.msk.f32.mxu0 %vm171_vm1, %v10846_v60  ;;  %v10854_v60 = vld [vmem:[#allocation23_spill] sm:$0xff] }
 0x176   : > { %7506 = vmatmul.mubr.msk.f32.gmra.mrb[4].mxu0 %vm171_vm1, %v10847_v62  ;;  %v10855_v62 = vld [vmem:[#allocation24_spill] sm:$0xff] }
 0x177   : > { %7508 = vmatprep.mubr.msk.f32.mxu0 %vm171_vm1, %v10848_v61  ;;  %v10856_v61 = vld [vmem:[#allocation25_spill] sm:$0xff] }
 0x17a   : > { %7509 = vmatmul.mubr.msk.f32.gmra.mrb[6].mxu0 %vm171_vm1, %v10849_v28  ;;  %v10857_v28 = vld [vmem:[#allocation26_spill] sm:$0xff] }
 0x17b   : > { %7511 = vmatprep.mubr.msk.f32.mxu0 %vm171_vm1, %v10850_v7  ;;  %v10858_v7 = vld [vmem:[#allocation27_spill] sm:$0xff] }
 0x17e   : > { %7512 = vmatmul.mubr.msk.f32.gmra.mrb[8].mxu0 %vm171_vm1, %v10851_v58  ;;  %v10859_v58 = vld [vmem:[#allocation28_spill] sm:$0xff] }
 0x17f   : > { %7514 = vmatprep.mubr.msk.f32.mxu0 %vm171_vm1, %v10852_v59  ;;  %v10860_v59 = vld [vmem:[#allocation29_spill] sm:$0xff] }
 0x182   : > { %7515 = vmatmul.mubr.msk.f32.gmra.mrb[10].mxu0 %vm171_vm1, %v10853_v63  ;;  %v10861_v63 = vld [vmem:[#allocation30_spill] sm:$0xff] }
 0x183   : > { %7517 = vmatprep.mubr.msk.f32.mxu0 %vm171_vm1, %v10854_v60  ;;  %v10862_v60 = vld [vmem:[#allocation31_spill] sm:$0xff] }
 0x186   : > { %7518 = vmatmul.mubr.msk.f32.gmra.mrb[12].mxu0 %vm171_vm1, %v10855_v62  ;;  %v10863_v62 = vld [vmem:[#allocation32_spill] sm:$0xff] }
 0x187   : > { %7520 = vmatprep.mubr.msk.f32.mxu0 %vm171_vm1, %v10856_v61  ;;  %v10864_v61 = vld [vmem:[#allocation33_spill] sm:$0xff] }
 0x18a   : > { %7521 = vmatmul.mubr.msk.f32.gmra.mrb[14].mxu0 %vm171_vm1, %v10857_v28 }
 0x18b   : > { %7523 = vmatprep.mubr.msk.f32.mxu0 %vm171_vm1, %v10858_v7  ;;  %v10865_v7 = vld [vmem:[#allocation34_spill] sm:$0xff] }
 0x18e   : > { %7524 = vmatmul.mubr.msk.f32.gmra.mrb[16].mxu0 %vm171_vm1, %v10859_v58 }
 0x18f   : > { %7526 = vmatprep.mubr.msk.f32.mxu0 %vm171_vm1, %v10860_v59  ;;  %v10866_v59 = vld [vmem:[#allocation35_spill] sm:$0xff] }
 0x192   : > { %7527 = vmatmul.mubr.msk.f32.gmra.mrb[18].mxu0 %vm171_vm1, %v10861_v63 }
 0x193   : > { %7529 = vmatprep.mubr.msk.f32.mxu0 %vm171_vm1, %v10862_v60 }
 0x196   : > { %7530 = vmatmul.mubr.msk.f32.gmra.mrb[20].mxu0 %vm171_vm1, %v10863_v62  ;;  %v9448_v62 = vld [vmem:[#allocation2 + $0x182] sm:$0xff] }
 0x197   : > { %7532 = vmatprep.mubr.msk.f32.mxu0 %vm171_vm1, %v10864_v61 }
 0x19a   : > { %7533 = vmatmul.mubr.msk.f32.gmra.mrb[22].mxu0 %vm171_vm1, %v9210_v40 }
 0x19b   : > { %7535 = vmatprep.mubr.msk.f32.mxu0 %vm171_vm1, %v10865_v7  ;;  %v9454_v7 = vld [vmem:[#allocation2 + $0x18a] sm:$0xff] }
 0x19e   : > { %7536 = vmatmul.mubr.msk.f32.gmra.mrb[24].mxu0 %vm171_vm1, %v9218_v0 }
 0x19f   : > { %7538 = vmatprep.mubr.msk.f32.mxu0 %vm171_vm1, %v10866_v59 }
 0x1a2   : > { %7539 = vmatmul.mubr.msk.f32.gmra.mrb[26].mxu0 %vm171_vm1, %v9226_v3 }
 0x1a3   : > { %7541 = vmatprep.mubr.msk.f32.mxu0 %vm171_vm1, %v9228_v39  ;;  %v6308_v39 = vld [vmem:[%s10676_s1 + $0x20] sm:$0xf] }
 0x1a6   : > { %7542 = vmatmul.mubr.msk.f32.gmra.mrb[28].mxu0 %vm171_vm1, %v9234_v5 }
 0x1a7   : > { %7544 = vmatprep.mubr.msk.f32.mxu0 %vm171_vm1, %v9448_v62 }
 0x1aa   : > { %7545 = vmatmul.mubr.msk.f32.gmra.mrb[30].mxu0 %vm171_vm1, %v9454_v7 }
 0x1ab   : > { %7549 = vmatprep.mubr.msk.f32.mxu0 %vm171_vm1, %v8987_v8  ;;  %v326_v8 = vld [vmem:[#allocation2 + $0x198] sm:$0xff] }
 0x1ae   : > { %7550 = vmatmul.mubr.msk.f32.vlgmr.msra.gmra.mrb[0].mxu0 %vm171_vm1, %v8995_v9  ;;  %v327_v9 = vld [vmem:[#allocation2 + $0x1a0] sm:$0xff] }
 0x1af   : > { %7598 = vmatpush3.msk.msra.mxu0 %vm499_vm0, %v6274_v29  ;;  %7552 = vmatprep.mubr.msk.f32.mxu0 %vm171_vm1, %v8997_v10  ;;  %v10885_v10 = vld [vmem:[#allocation21_spill] sm:$0xff] }
 0x1b0   : > { %7647 = vmatprep.subr.msk.mxu0 %vm499_vm0, %v6308_v39 }
 0x1b2   : > { %7553 = vmatmul.mubr.msk.f32.gmra.mrb[2].mxu0 %vm171_vm1, %v9003_v6  ;;  %v10886_v6 = vld [vmem:[#allocation22_spill] sm:$0xff] }
 0x1b3   : > { %7555 = vmatprep.mubr.msk.f32.mxu0 %vm171_vm1, %v9005_v11  ;;  %v10887_v11 = vld [vmem:[#allocation23_spill] sm:$0xff] }
 0x1b6   : > { %7556 = vmatmul.mubr.msk.f32.gmra.mrb[4].mxu0 %vm171_vm1, %v9011_v12  ;;  %v10888_v12 = vld [vmem:[#allocation24_spill] sm:$0xff] }
 0x1b7   : > { %7558 = vmatprep.mubr.msk.f32.mxu0 %vm171_vm1, %v9013_v13  ;;  %v10889_v13 = vld [vmem:[#allocation25_spill] sm:$0xff] }
 0x1ba   : > { %7559 = vmatmul.mubr.msk.f32.gmra.mrb[6].mxu0 %vm171_vm1, %v9019_v14  ;;  %v10890_v14 = vld [vmem:[#allocation27_spill] sm:$0xff] }
 0x1bb   : > { %7561 = vmatprep.mubr.msk.f32.mxu0 %vm171_vm1, %v9021_v15  ;;  %v10891_v15 = vld [vmem:[#allocation29_spill] sm:$0xff] }
 0x1be   : > { %7562 = vmatmul.mubr.msk.f32.gmra.mrb[8].mxu0 %vm171_vm1, %v9027_v16  ;;  %v10892_v16 = vld [vmem:[#allocation32_spill] sm:$0xff] }
 0x1bf   : > { %7564 = vmatprep.mubr.msk.f32.mxu0 %vm171_vm1, %v9029_v17  ;;  %v10893_v17 = vld [vmem:[#allocation34_spill] sm:$0xff] }
 0x1c2   : > { %7565 = vmatmul.mubr.msk.f32.gmra.mrb[10].mxu0 %vm171_vm1, %v9035_v18  ;;  %v3158_v18 = vld [vmem:[#allocation2 + $0x9] sm:$0xff] }
 0x1c3   : > { %7567 = vmatprep.mubr.msk.f32.mxu0 %vm171_vm1, %v9037_v19  ;;  %v3229_v19 = vld [vmem:[%s10676_s1] sm:$0xf] }
 0x1c6   : > { %7568 = vmatmul.mubr.msk.f32.gmra.mrb[12].mxu0 %vm171_vm1, %v9043_v20  ;;  %v9665_v20 = vld [vmem:[%s10676_s1 + $0x8] sm:$0xf] }
 0x1c7   : > { %7570 = vmatprep.mubr.msk.f32.mxu0 %vm171_vm1, %v9045_v21  ;;  %v9672_v21 = vld [vmem:[%s10677_s2] ss:$0 sm:$0xff] }
 0x1ca   : > { %7571 = vmatmul.mubr.msk.f32.gmra.mrb[14].mxu0 %vm171_vm1, %v9051_v22 }
 0x1cb   : > { %7573 = vmatprep.mubr.msk.f32.mxu0 %vm171_vm1, %v9053_v23 }
 0x1ce   : > { %7574 = vmatmul.mubr.msk.f32.gmra.mrb[16].mxu0 %vm171_vm1, %v9059_v24 }
 0x1cf   : > { %7576 = vmatprep.mubr.msk.f32.mxu0 %vm171_vm1, %v9061_v25 }
 0x1d2   : > { %7577 = vmatmul.mubr.msk.f32.gmra.mrb[18].mxu0 %vm171_vm1, %v9067_v26 }
 0x1d3   : > { %7579 = vmatprep.mubr.msk.f32.mxu0 %vm171_vm1, %v9069_v27 }
 0x1d6   : > { %7580 = vmatmul.mubr.msk.f32.gmra.mrb[20].mxu0 %vm171_vm1, %v9075_v31 }
 0x1d7   : > { %7582 = vmatprep.mubr.msk.f32.mxu0 %vm171_vm1, %v9077_v32 }
 0x1da   : > { %7583 = vmatmul.mubr.msk.f32.gmra.mrb[22].mxu0 %vm171_vm1, %v9083_v37 }
 0x1db   : > { %7585 = vmatprep.mubr.msk.f32.mxu0 %vm171_vm1, %v9085_v38 }
 0x1de   : > { %7586 = vmatmul.mubr.msk.f32.gmra.mrb[24].mxu0 %vm171_vm1, %v9095_v41 }
 0x1df   : > { %7588 = vmatprep.mubr.msk.f32.mxu0 %vm171_vm1, %v9097_v42 }
 0x1e2   : > { %7589 = vmatmul.mubr.msk.f32.gmra.mrb[26].mxu0 %vm171_vm1, %v9103_v2 }
 0x1e3   : > { %7591 = vmatprep.mubr.msk.f32.mxu0 %vm171_vm1, %v9302_v1 }
 0x1e6   : > { %7592 = vmatmul.mubr.msk.f32.gmra.mrb[28].mxu0 %vm171_vm1, %v9308_v4 }
 0x1e7   : > { %7594 = vmatprep.mubr.msk.f32.mxu0 %vm171_vm1, %v326_v8 }
 0x1ea   : > { %7595 = vmatmul.mubr.msk.f32.gmra.mrb[30].mxu0 %vm171_vm1, %v327_v9 }
 0x1eb   : > { %7599 = vmatprep.mubr.msk.f32.mxu0 %vm171_vm1, %v8837_v30  ;;  %v10867_v30 = vld [vmem:[#allocation3_spill] sm:$0xff] }
 0x1ee   : > { %7600 = vmatmul.mubr.msk.f32.vlgmr.msra.gmra.mrb[0].mxu0 %vm171_vm1, %v8852_v33  ;;  %v10868_v33 = vld [vmem:[#allocation4_spill] sm:$0xff] }
 0x1ef   : > { %7648 = vmatpush3.msk.msra.mxu0 %vm499_vm0, %v6308_v39  ;;  %7602 = vmatprep.mubr.msk.f32.mxu0 %vm171_vm1, %v8854_v34  ;;  %v10869_v34 = vld [vmem:[#allocation5_spill] sm:$0xff] }
 0x1f2   : > { %7603 = vmatmul.mubr.msk.f32.gmra.mrb[2].mxu0 %vm171_vm1, %v8860_v35  ;;  %v10870_v35 = vld [vmem:[#allocation6_spill] sm:$0xff] }
 0x1f3   : > { %7605 = vmatprep.mubr.msk.f32.mxu0 %vm171_vm1, %v8862_v36  ;;  %v10871_v36 = vld [vmem:[#allocation7_spill] sm:$0xff] }
 0x1f6   : > { %7606 = vmatmul.mubr.msk.f32.gmra.mrb[4].mxu0 %vm171_vm1, %v8878_v43  ;;  %v10872_v43 = vld [vmem:[#allocation8_spill] sm:$0xff] }
 0x1f7   : > { %7608 = vmatprep.mubr.msk.f32.mxu0 %vm171_vm1, %v8882_v44  ;;  %v10873_v44 = vld [vmem:[#allocation9_spill] sm:$0xff] }
 0x1fa   : > { %7609 = vmatmul.mubr.msk.f32.gmra.mrb[6].mxu0 %vm171_vm1, %v8888_v45  ;;  %v10874_v45 = vld [vmem:[#allocation10_spill] sm:$0xff] }
 0x1fb   : > { %7611 = vmatprep.mubr.msk.f32.mxu0 %vm171_vm1, %v8890_v46  ;;  %v10875_v46 = vld [vmem:[#allocation37_spill] sm:$0xff] }
 0x1fe   : > { %7612 = vmatmul.mubr.msk.f32.gmra.mrb[8].mxu0 %vm171_vm1, %v8896_v47  ;;  %v362_v47 = vld [vmem:[#allocation2 + $0x199] sm:$0xff] }
 0x1ff   : > { %7614 = vmatprep.mubr.msk.f32.mxu0 %vm171_vm1, %v8898_v48  ;;  %v10876_v48 = vld [vmem:[#allocation38_spill] sm:$0xff] }
 0x202   : > { %7615 = vmatmul.mubr.msk.f32.gmra.mrb[10].mxu0 %vm171_vm1, %v8904_v49  ;;  %v363_v49 = vld [vmem:[#allocation2 + $0x1a1] sm:$0xff] }
 0x203   : > { %7617 = vmatprep.mubr.msk.f32.mxu0 %vm171_vm1, %v8906_v50  ;;  %v10877_v50 = vld [vmem:[#allocation13_spill] sm:$0xff] }
 0x206   : > { %7618 = vmatmul.mubr.msk.f32.gmra.mrb[12].mxu0 %vm171_vm1, %v8912_v51  ;;  %v10878_v51 = vld [vmem:[#allocation14_spill] sm:$0xff] }
 0x207   : > { %7620 = vmatprep.mubr.msk.f32.mxu0 %vm171_vm1, %v8914_v52  ;;  %v10879_v52 = vld [vmem:[#allocation15_spill] sm:$0xff] }
 0x20a   : > { %7621 = vmatmul.mubr.msk.f32.gmra.mrb[14].mxu0 %vm171_vm1, %v8920_v53  ;;  %v10880_v53 = vld [vmem:[#allocation16_spill] sm:$0xff] }
 0x20b   : > { %7623 = vmatprep.mubr.msk.f32.mxu0 %vm171_vm1, %v8922_v54  ;;  %v10881_v54 = vld [vmem:[#allocation17_spill] sm:$0xff] }
 0x20e   : > { %7624 = vmatmul.mubr.msk.f32.gmra.mrb[16].mxu0 %vm171_vm1, %v8928_v55  ;;  %v10882_v55 = vld [vmem:[#allocation18_spill] sm:$0xff] }
 0x20f   : > { %7626 = vmatprep.mubr.msk.f32.mxu0 %vm171_vm1, %v8930_v56  ;;  %v10883_v56 = vld [vmem:[#allocation19_spill] sm:$0xff] }
 0x212   : > { %7627 = vmatmul.mubr.msk.f32.gmra.mrb[18].mxu0 %vm171_vm1, %v8936_v57  ;;  %v10884_v57 = vld [vmem:[#allocation20_spill] sm:$0xff] }
 0x213   : > { %7629 = vmatprep.mubr.msk.f32.mxu0 %vm171_vm1, %v10867_v30 }
 0x216   : > { %7630 = vmatmul.mubr.msk.f32.gmra.mrb[20].mxu0 %vm171_vm1, %v10868_v33 }
 0x217   : > { %7632 = vmatprep.mubr.msk.f32.mxu0 %vm171_vm1, %v10869_v34 }
 0x21a   : > { %7633 = vmatmul.mubr.msk.f32.gmra.mrb[22].mxu0 %vm171_vm1, %v10870_v35 }
 0x21b   : > { %7635 = vmatprep.mubr.msk.f32.mxu0 %vm171_vm1, %v10871_v36 }
 0x21e   : > { %7636 = vmatmul.mubr.msk.f32.gmra.mrb[24].mxu0 %vm171_vm1, %v10872_v43 }
 0x21f   : > { %7638 = vmatprep.mubr.msk.f32.mxu0 %vm171_vm1, %v10873_v44 }
 0x222   : > { %7639 = vmatmul.mubr.msk.f32.gmra.mrb[26].mxu0 %vm171_vm1, %v10874_v45 }
 0x223   : > { %7641 = vmatprep.mubr.msk.f32.mxu0 %vm171_vm1, %v10875_v46 }
 0x226   : > { %7642 = vmatmul.mubr.msk.f32.gmra.mrb[28].mxu0 %vm171_vm1, %v10876_v48 }
 0x227   : > { %7644 = vmatprep.mubr.msk.f32.mxu0 %vm171_vm1, %v362_v47 }
 0x22a   : > { %7645 = vmatmul.mubr.msk.f32.gmra.mrb[30].mxu0 %vm171_vm1, %v363_v49 }
 0x22b   : > { %7649 = vmatprep.mubr.msk.f32.mxu0 %vm171_vm1, %v10877_v50 }
 0x22e   : > { %7650 = vmatmul.mubr.msk.f32.vlgmr.msra.gmra.mrb[0].mxu0 %vm171_vm1, %v10878_v51 }
 0x22f   : > { %7652 = vmatprep.mubr.msk.f32.mxu0 %vm171_vm1, %v10879_v52 }
 0x232   : > { %7653 = vmatmul.mubr.msk.f32.gmra.mrb[2].mxu0 %vm171_vm1, %v10880_v53 }
 0x233   : > { %7655 = vmatprep.mubr.msk.f32.mxu0 %vm171_vm1, %v10881_v54 }
 0x236   : > { %7656 = vmatmul.mubr.msk.f32.gmra.mrb[4].mxu0 %vm171_vm1, %v10882_v55 }
 0x237   : > { %7658 = vmatprep.mubr.msk.f32.mxu0 %vm171_vm1, %v10883_v56 }
 0x23a   : > { %7659 = vmatmul.mubr.msk.f32.gmra.mrb[6].mxu0 %vm171_vm1, %v10884_v57 }
 0x23b   : > { %7661 = vmatprep.mubr.msk.f32.mxu0 %vm171_vm1, %v10885_v10 }
 0x23e   : > { %7662 = vmatmul.mubr.msk.f32.gmra.mrb[8].mxu0 %vm171_vm1, %v10886_v6 }
 0x23f   : > { %7664 = vmatprep.mubr.msk.f32.mxu0 %vm171_vm1, %v10887_v11 }
 0x242   : > { %7665 = vmatmul.mubr.msk.f32.gmra.mrb[10].mxu0 %vm171_vm1, %v10888_v12 }
 0x243   : > { %7667 = vmatprep.mubr.msk.f32.mxu0 %vm171_vm1, %v10889_v13 }
 0x246   : > { %7668 = vmatmul.mubr.msk.f32.gmra.mrb[12].mxu0 %vm171_vm1, %v10857_v28 }
 0x247   : > { %7670 = vmatprep.mubr.msk.f32.mxu0 %vm171_vm1, %v10890_v14 }
 0x24a   : > { %7671 = vmatmul.mubr.msk.f32.gmra.mrb[14].mxu0 %vm171_vm1, %v10859_v58  ;;  %v10894_v58 = vld [vmem:[#allocation36_spill] sm:$0xff] }
 0x24b   : > { %7673 = vmatprep.mubr.msk.f32.mxu0 %vm171_vm1, %v10891_v15 }
 0x24e   : > { %7674 = vmatmul.mubr.msk.f32.gmra.mrb[16].mxu0 %vm171_vm1, %v10861_v63 }
 0x24f   : > { %7676 = vmatprep.mubr.msk.f32.mxu0 %vm171_vm1, %v10862_v60  ;;  %v398_v60 = vld [vmem:[#allocation2 + $0x19a] sm:$0xff] }
 0x252   : > { %7677 = vmatmul.mubr.msk.f32.gmra.mrb[18].mxu0 %vm171_vm1, %v10892_v16 }
 0x253   : > { %7679 = vmatprep.mubr.msk.f32.mxu0 %vm171_vm1, %v10864_v61  ;;  %v399_v61 = vld [vmem:[#allocation2 + $0x1a2] sm:$0xff] }
 0x256   : > { %7680 = vmatmul.mubr.msk.f32.gmra.mrb[20].mxu0 %vm171_vm1, %v9210_v40 }
 0x257   : > { %7682 = vmatprep.mubr.msk.f32.mxu0 %vm171_vm1, %v10893_v17 }
 0x25a   : > { %7683 = vmatmul.mubr.msk.f32.gmra.mrb[22].mxu0 %vm171_vm1, %v9218_v0  ;;  %v3157_v0 = vld [vmem:[#allocation2 + $0x1] sm:$0xff] }
 0x25b   : > { %7685 = vmatprep.mubr.msk.f32.mxu0 %vm171_vm1, %v10866_v59  ;;  %v6343_v59 = vld [vmem:[%s10676_s1 + $0x4] sm:$0xf]  ;;  %7699 = vmatprep.mubr.msk.f32.mxu1 %vm171_vm1, %v3157_v0 }
 0x25c   : > { %7697 = vmatprep.subr.msk.mxu1 %vm499_vm0, %v6343_v59 }
 0x25d   : > { %7698 = vmatpush3.msk.msra.mxu1 %vm499_vm0, %v6343_v59 }
 0x25e   : > { %7686 = vmatmul.mubr.msk.f32.gmra.mrb[24].mxu0 %vm171_vm1, %v9226_v3  ;;  %7700 = vmatmul.mubr.msk.f32.vlgmr.msra.gmra.mrb[0].mxu1 %vm171_vm1, %v3158_v18 }
 0x25f   : > { %7688 = vmatprep.mubr.msk.f32.mxu0 %vm171_vm1, %v10894_v58  ;;  %7747 = vmatprep.subr.msk.mxu1 %vm499_vm0, %v3229_v19 }
 0x260   : > { %7748 = vmatpush3.msk.msra.mxu1 %vm499_vm0, %v3229_v19 }
 0x261   : > { %7797 = vmatprep.subr.msk.mxu1 %vm499_vm0, %v9665_v20 }
 0x262   : > { %7689 = vmatmul.mubr.msk.f32.gmra.mrb[26].mxu0 %vm171_vm1, %v9234_v5 }
 0x263   : > { %7691 = vmatprep.mubr.msk.f32.mxu0 %vm171_vm1, %v9448_v62 }
 0x266   : > { %7692 = vmatmul.mubr.msk.f32.gmra.mrb[28].mxu0 %vm171_vm1, %v9454_v7 }
 0x267   : > { %7694 = vmatprep.mubr.msk.f32.mxu0 %vm171_vm1, %v398_v60 }
 0x26a   : > { %7695 = vmatmul.mubr.msk.f32.gmra.mrb[30].mxu0 %vm171_vm1, %v399_v61 }
 0x301   : > { %v7651_v22 = vpop.f32.mrb[0].mxu0 }
 0x302   : > { %v3026_v23 = vadd.f32 %v7651_v22, %v9672_v21  ;;  %v2827_v24 = vpop.f32.mrb[1].mxu0 }
 0x303   : > { %v3025_v25 = vadd.f32 %v9672_v21, %v2827_v24 }
 0x304   : > { %v3058_v26 = vmax.f32 %v3026_v23, 0.0 }
 0x305   : > { %v3057_v27 = vmax.f32 %v3025_v25, 0.0  ;;  %v7654_v31 = vpop.f32.mrb[2].mxu0 }
 0x306   : > { %3090 = vst.msk [vmem:[#allocation2 + $0x21] sm:$0xff] %vm171_vm1, %v3058_v26  ;;  %v3028_v32 = vadd.f32 %v7654_v31, %v9672_v21  ;;  %v2837_v37 = vpop.f32.mrb[3].mxu0 }
 0x307   : > { %3089 = vst.msk [vmem:[#allocation2 + $0x19] sm:$0xff] %vm171_vm1, %v3057_v27  ;;  %v3027_v38 = vadd.f32 %v9672_v21, %v2837_v37 }
 0x308   : > { %v3060_v41 = vmax.f32 %v3028_v32, 0.0 }
 0x309   : > { %v3059_v42 = vmax.f32 %v3027_v38, 0.0  ;;  %v7657_v2 = vpop.f32.mrb[4].mxu0 }
 0x30a   : > { %3092 = vst.msk [vmem:[#allocation2 + $0x39] sm:$0xff] %vm171_vm1, %v3060_v41  ;;  %v3030_v40 = vadd.f32 %v7657_v2, %v9672_v21  ;;  %v2847_v3 = vpop.f32.mrb[5].mxu0 }
 0x30b   : > { %3091 = vst.msk [vmem:[#allocation2 + $0x31] sm:$0xff] %vm171_vm1, %v3059_v42  ;;  %v3029_v39 = vadd.f32 %v9672_v21, %v2847_v3 }
 0x30c   : > { %v3062_v5 = vmax.f32 %v3030_v40, 0.0 }
 0x30d   : > { %v3061_v1 = vmax.f32 %v3029_v39, 0.0  ;;  %v7660_v4 = vpop.f32.mrb[6].mxu0  ;;  %v9692_v7 = vld [vmem:[#allocation2 + $0x21] sm:$0xff] }
 0x30e   : > { %3094 = vst.msk [vmem:[#allocation2 + $0x51] sm:$0xff] %vm171_vm1, %v3062_v5  ;;  %v3032_v29 = vadd.f32 %v7660_v4, %v9672_v21  ;;  %v2857_v63 = vpop.f32.mrb[7].mxu0  ;;  %v9686_v62 = vld [vmem:[#allocation2 + $0x19] sm:$0xff] }
 0x30f   : > { %3093 = vst.msk [vmem:[#allocation2 + $0x49] sm:$0xff] %vm171_vm1, %v3061_v1  ;;  %v3031_v28 = vadd.f32 %v9672_v21, %v2857_v63  ;;  %7702 = vmatprep.mubr.msk.f32.mxu1 %vm171_vm1, %v9686_v62 }
 0x310   : > { %v3064_v8 = vmax.f32 %v3032_v29, 0.0  ;;  %7703 = vmatmul.mubr.msk.f32.gmra.mrb[2].mxu1 %vm171_vm1, %v9692_v7 }
 0x311   : > { %v3063_v9 = vmax.f32 %v3031_v28, 0.0  ;;  %v7663_v30 = vpop.f32.mrb[8].mxu0  ;;  %v9704_v43 = vld [vmem:[#allocation2 + $0x39] sm:$0xff] }
 0x312   : > { %3096 = vst.msk [vmem:[#allocation2 + $0x69] sm:$0xff] %vm171_vm1, %v3064_v8  ;;  %v3034_v33 = vadd.f32 %v7663_v30, %v9672_v21  ;;  %v2867_v34 = vpop.f32.mrb[9].mxu0  ;;  %v9698_v35 = vld [vmem:[#allocation2 + $0x31] sm:$0xff] }
 0x313   : > { %3095 = vst.msk [vmem:[#allocation2 + $0x61] sm:$0xff] %vm171_vm1, %v3063_v9  ;;  %v3033_v36 = vadd.f32 %v9672_v21, %v2867_v34  ;;  %7705 = vmatprep.mubr.msk.f32.mxu1 %vm171_vm1, %v9698_v35 }
 0x314   : > { %v3066_v44 = vmax.f32 %v3034_v33, 0.0  ;;  %7706 = vmatmul.mubr.msk.f32.gmra.mrb[4].mxu1 %vm171_vm1, %v9704_v43 }
 0x315   : > { %v3065_v45 = vmax.f32 %v3033_v36, 0.0  ;;  %v7666_v46 = vpop.f32.mrb[10].mxu0  ;;  %v9716_v51 = vld [vmem:[#allocation2 + $0x51] sm:$0xff] }
 0x316   : > { %3098 = vst.msk [vmem:[#allocation2 + $0x81] sm:$0xff] %vm171_vm1, %v3066_v44  ;;  %v3036_v47 = vadd.f32 %v7666_v46, %v9672_v21  ;;  %v2877_v48 = vpop.f32.mrb[11].mxu0  ;;  %v9710_v49 = vld [vmem:[#allocation2 + $0x49] sm:$0xff] }
 0x317   : > { %3097 = vst.msk [vmem:[#allocation2 + $0x79] sm:$0xff] %vm171_vm1, %v3065_v45  ;;  %v3035_v50 = vadd.f32 %v9672_v21, %v2877_v48  ;;  %7708 = vmatprep.mubr.msk.f32.mxu1 %vm171_vm1, %v9710_v49 }
 0x318   : > { %v3068_v52 = vmax.f32 %v3036_v47, 0.0  ;;  %7709 = vmatmul.mubr.msk.f32.gmra.mrb[6].mxu1 %vm171_vm1, %v9716_v51 }
 0x319   : > { %v3067_v53 = vmax.f32 %v3035_v50, 0.0  ;;  %v7669_v54 = vpop.f32.mrb[12].mxu0  ;;  %v9728_v6 = vld [vmem:[#allocation2 + $0x69] sm:$0xff] }
 0x31a   : > { %3100 = vst.msk [vmem:[#allocation2 + $0x99] sm:$0xff] %vm171_vm1, %v3068_v52  ;;  %v3038_v55 = vadd.f32 %v7669_v54, %v9672_v21  ;;  %v2887_v56 = vpop.f32.mrb[13].mxu0  ;;  %v9722_v57 = vld [vmem:[#allocation2 + $0x61] sm:$0xff] }
 0x31b   : > { %3099 = vst.msk [vmem:[#allocation2 + $0x91] sm:$0xff] %vm171_vm1, %v3067_v53  ;;  %v3037_v10 = vadd.f32 %v9672_v21, %v2887_v56  ;;  %7711 = vmatprep.mubr.msk.f32.mxu1 %vm171_vm1, %v9722_v57 }
 0x31c   : > { %v3070_v11 = vmax.f32 %v3038_v55, 0.0  ;;  %7712 = vmatmul.mubr.msk.f32.gmra.mrb[8].mxu1 %vm171_vm1, %v9728_v6 }
 0x31d   : > { %v3069_v12 = vmax.f32 %v3037_v10, 0.0  ;;  %v7672_v13 = vpop.f32.mrb[14].mxu0  ;;  %v9740_v58 = vld [vmem:[#allocation2 + $0x81] sm:$0xff] }
 0x31e   : > { %3102 = vst.msk [vmem:[#allocation2 + $0xb1] sm:$0xff] %vm171_vm1, %v3070_v11  ;;  %v3040_v14 = vadd.f32 %v7672_v13, %v9672_v21  ;;  %v2897_v15 = vpop.f32.mrb[15].mxu0  ;;  %v9734_v16 = vld [vmem:[#allocation2 + $0x79] sm:$0xff] }
 0x31f   : > { %3101 = vst.msk [vmem:[#allocation2 + $0xa9] sm:$0xff] %vm171_vm1, %v3069_v12  ;;  %v3039_v17 = vadd.f32 %v9672_v21, %v2897_v15  ;;  %7714 = vmatprep.mubr.msk.f32.mxu1 %vm171_vm1, %v9734_v16 }
 0x320   : > { %v3072_v60 = vmax.f32 %v3040_v14, 0.0  ;;  %7715 = vmatmul.mubr.msk.f32.gmra.mrb[10].mxu1 %vm171_vm1, %v9740_v58 }
 0x321   : > { %v3071_v61 = vmax.f32 %v3039_v17, 0.0  ;;  %v7675_v59 = vpop.f32.mrb[16].mxu0  ;;  %v9752_v23 = vld [vmem:[#allocation2 + $0x99] sm:$0xff] }
 0x322   : > { %3104 = vst.msk [vmem:[#allocation2 + $0xc9] sm:$0xff] %vm171_vm1, %v3072_v60  ;;  %v3042_v0 = vadd.f32 %v7675_v59, %v9672_v21  ;;  %v2907_v18 = vpop.f32.mrb[17].mxu0  ;;  %v9746_v19 = vld [vmem:[#allocation2 + $0x91] sm:$0xff] }
 0x323   : > { %3103 = vst.msk [vmem:[#allocation2 + $0xc1] sm:$0xff] %vm171_vm1, %v3071_v61  ;;  %v3041_v22 = vadd.f32 %v9672_v21, %v2907_v18  ;;  %7717 = vmatprep.mubr.msk.f32.mxu1 %vm171_vm1, %v9746_v19 }
 0x324   : > { %v3074_v24 = vmax.f32 %v3042_v0, 0.0  ;;  %7718 = vmatmul.mubr.msk.f32.gmra.mrb[12].mxu1 %vm171_vm1, %v9752_v23 }
 0x325   : > { %v3073_v25 = vmax.f32 %v3041_v22, 0.0  ;;  %v7678_v26 = vpop.f32.mrb[18].mxu0  ;;  %v9764_v38 = vld [vmem:[#allocation2 + $0xb1] sm:$0xff] }
 0x326   : > { %3106 = vst.msk [vmem:[#allocation2 + $0xe1] sm:$0xff] %vm171_vm1, %v3074_v24  ;;  %v3044_v27 = vadd.f32 %v7678_v26, %v9672_v21  ;;  %v2917_v31 = vpop.f32.mrb[19].mxu0  ;;  %v9758_v32 = vld [vmem:[#allocation2 + $0xa9] sm:$0xff] }
 0x327   : > { %3105 = vst.msk [vmem:[#allocation2 + $0xd9] sm:$0xff] %vm171_vm1, %v3073_v25  ;;  %v3043_v37 = vadd.f32 %v9672_v21, %v2917_v31  ;;  %7720 = vmatprep.mubr.msk.f32.mxu1 %vm171_vm1, %v9758_v32 }
 0x328   : > { %v3076_v41 = vmax.f32 %v3044_v27, 0.0  ;;  %7721 = vmatmul.mubr.msk.f32.gmra.mrb[14].mxu1 %vm171_vm1, %v9764_v38 }
 0x329   : > { %v3075_v42 = vmax.f32 %v3043_v37, 0.0  ;;  %v7681_v2 = vpop.f32.mrb[20].mxu0  ;;  %v9776_v1 = vld [vmem:[#allocation2 + $0xc9] sm:$0xff] }
 0x32a   : > { %3108 = vst.msk [vmem:[#allocation2 + $0xf9] sm:$0xff] %vm171_vm1, %v3076_v41  ;;  %v3046_v40 = vadd.f32 %v7681_v2, %v9672_v21  ;;  %v2927_v3 = vpop.f32.mrb[21].mxu0  ;;  %v9770_v39 = vld [vmem:[#allocation2 + $0xc1] sm:$0xff] }
 0x32b   : > { %3107 = vst.msk [vmem:[#allocation2 + $0xf1] sm:$0xff] %vm171_vm1, %v3075_v42  ;;  %v3045_v5 = vadd.f32 %v9672_v21, %v2927_v3  ;;  %7723 = vmatprep.mubr.msk.f32.mxu1 %vm171_vm1, %v9770_v39  ;;  %v3121_v3 = vld [vmem:[#allocation2] sm:$0xff] }
 0x32c   : > { %v3078_v4 = vmax.f32 %v3046_v40, 0.0  ;;  %7724 = vmatmul.mubr.msk.f32.gmra.mrb[16].mxu1 %vm171_vm1, %v9776_v1 }
 0x32d   : > { %v3077_v29 = vmax.f32 %v3045_v5, 0.0  ;;  %v7684_v63 = vpop.f32.mrb[22].mxu0  ;;  %v9788_v33 = vld [vmem:[#allocation2 + $0xe1] sm:$0xff] }
 0x32e   : > { %3110 = vst.msk [vmem:[#allocation2 + $0x111] sm:$0xff] %vm171_vm1, %v3078_v4  ;;  %v3048_v28 = vadd.f32 %v7684_v63, %v9672_v21  ;;  %v2937_v8 = vpop.f32.mrb[23].mxu0  ;;  %v9782_v9 = vld [vmem:[#allocation2 + $0xd9] sm:$0xff]  ;;  %v3122_v4 = vld [vmem:[#allocation2 + $0x8] sm:$0xff] }
 0x32f   : > { %3109 = vst.msk [vmem:[#allocation2 + $0x109] sm:$0xff] %vm171_vm1, %v3077_v29  ;;  %v3047_v30 = vadd.f32 %v9672_v21, %v2937_v8  ;;  %7726 = vmatprep.mubr.msk.f32.mxu1 %vm171_vm1, %v9782_v9  ;;  %v9862_v29 = vld [vmem:[%s10676_s1 + $0xc] sm:$0xf]  ;;  %v9865_v63 = vld [vmem:[#allocation2 + $0x18] sm:$0xff]  ;;  %v9877_v8 = vld [vmem:[#allocation2 + $0x30] sm:$0xff] }
 0x330   : > { %v3080_v34 = vmax.f32 %v3048_v28, 0.0  ;;  %7727 = vmatmul.mubr.msk.f32.gmra.mrb[18].mxu1 %vm171_vm1, %v9788_v33  ;;  %v9873_v28 = vld [vmem:[#allocation2 + $0x20] sm:$0xff] }
 0x331   : > { %v3079_v36 = vmax.f32 %v3047_v30, 0.0  ;;  %v7687_v44 = vpop.f32.mrb[24].mxu0  ;;  %v9800_v50 = vld [vmem:[#allocation2 + $0xf9] sm:$0xff] }
 0x332   : > { %3112 = vst.msk [vmem:[#allocation2 + $0x129] sm:$0xff] %vm171_vm1, %v3080_v34  ;;  %v3050_v45 = vadd.f32 %v7687_v44, %v9672_v21  ;;  %v2947_v46 = vpop.f32.mrb[25].mxu0  ;;  %v9794_v47 = vld [vmem:[#allocation2 + $0xf1] sm:$0xff]  ;;  %v9897_v44 = vld [vmem:[#allocation2 + $0x68] sm:$0xff] }
 0x333   : > { %3111 = vst.msk [vmem:[#allocation2 + $0x121] sm:$0xff] %vm171_vm1, %v3079_v36  ;;  %v3049_v48 = vadd.f32 %v9672_v21, %v2947_v46  ;;  %7729 = vmatprep.mubr.msk.f32.mxu1 %vm171_vm1, %v9794_v47  ;;  %v9881_v30 = vld [vmem:[#allocation2 + $0x38] sm:$0xff]  ;;  %v9889_v34 = vld [vmem:[#allocation2 + $0x50] sm:$0xff]  ;;  %v9893_v36 = vld [vmem:[#allocation2 + $0x60] sm:$0xff] }
 0x334   : > { %v3082_v52 = vmax.f32 %v3050_v45, 0.0  ;;  %7730 = vmatmul.mubr.msk.f32.gmra.mrb[20].mxu1 %vm171_vm1, %v9800_v50  ;;  %v9901_v45 = vld [vmem:[#allocation2 + $0x78] sm:$0xff]  ;;  %v9905_v46 = vld [vmem:[#allocation2 + $0x80] sm:$0xff] }
 0x335   : > { %v3081_v53 = vmax.f32 %v3049_v48, 0.0  ;;  %v7690_v54 = vpop.f32.mrb[26].mxu0  ;;  %v9812_v12 = vld [vmem:[#allocation2 + $0x111] sm:$0xff] }
 0x336   : > { %3114 = vst.msk [vmem:[#allocation2 + $0x141] sm:$0xff] %vm171_vm1, %v3082_v52  ;;  %v3052_v55 = vadd.f32 %v7690_v54, %v9672_v21  ;;  %v2957_v56 = vpop.f32.mrb[27].mxu0  ;;  %v9806_v10 = vld [vmem:[#allocation2 + $0x109] sm:$0xff]  ;;  %v9913_v52 = vld [vmem:[#allocation2 + $0x98] sm:$0xff] }
 0x337   : > { %3113 = vst.msk [vmem:[#allocation2 + $0x139] sm:$0xff] %vm171_vm1, %v3081_v53  ;;  %v3051_v11 = vadd.f32 %v9672_v21, %v2957_v56  ;;  %7732 = vmatprep.mubr.msk.f32.mxu1 %vm171_vm1, %v9806_v10  ;;  %v9909_v48 = vld [vmem:[#allocation2 + $0x90] sm:$0xff]  ;;  %v9917_v53 = vld [vmem:[#allocation2 + $0xa8] sm:$0xff] }
 0x338   : > { %v3084_v13 = vmax.f32 %v3052_v55, 0.0  ;;  %7733 = vmatmul.mubr.msk.f32.gmra.mrb[22].mxu1 %vm171_vm1, %v9812_v12  ;;  %v9921_v54 = vld [vmem:[#allocation2 + $0xb0] sm:$0xff]  ;;  %v9925_v55 = vld [vmem:[#allocation2 + $0xc0] sm:$0xff]  ;;  %v9929_v56 = vld [vmem:[#allocation2 + $0xc8] sm:$0xff] }
 0x339   : > { %v3083_v14 = vmax.f32 %v3051_v11, 0.0  ;;  %v7693_v15 = vpop.f32.mrb[28].mxu0  ;;  %v9824_v0 = vld [vmem:[#allocation2 + $0x129] sm:$0xff]  ;;  %v9933_v11 = vld [vmem:[#allocation2 + $0xd8] sm:$0xff] }
 0x33a   : > { %3116 = vst.msk [vmem:[#allocation2 + $0x159] sm:$0xff] %vm171_vm1, %v3084_v13  ;;  %v3054_v17 = vadd.f32 %v7693_v15, %v9672_v21  ;;  %v2967_v60 = vpop.f32.mrb[29].mxu0  ;;  %v9818_v61 = vld [vmem:[#allocation2 + $0x121] sm:$0xff]  ;;  %10895 = vst [vmem:[#allocation11_spill] sm:$0xff] %v9824_v0  ;;  %v9945_v15 = vld [vmem:[#allocation2 + $0xf8] sm:$0xff] }
 0x33b   : > { %3115 = vst.msk [vmem:[#allocation2 + $0x151] sm:$0xff] %vm171_vm1, %v3083_v14  ;;  %v3053_v59 = vadd.f32 %v9672_v21, %v2967_v60  ;;  %7735 = vmatprep.mubr.msk.f32.mxu1 %vm171_vm1, %v9818_v61  ;;  %v9937_v13 = vld [vmem:[#allocation2 + $0xe0] sm:$0xff]  ;;  %v9941_v14 = vld [vmem:[#allocation2 + $0xf0] sm:$0xff] }
 0x33c   : > { %v3086_v18 = vmax.f32 %v3054_v17, 0.0  ;;  %7736 = vmatmul.mubr.msk.f32.gmra.mrb[24].mxu1 %vm171_vm1, %v9824_v0  ;;  %v9949_v17 = vld [vmem:[#allocation2 + $0x108] sm:$0xff]  ;;  %v9953_v60 = vld [vmem:[#allocation2 + $0x110] sm:$0xff] }
 0x33d   : > { %v3085_v22 = vmax.f32 %v3053_v59, 0.0  ;;  %v7696_v24 = vpop.f32.mrb[30].mxu0  ;;  %v9836_v37 = vld [vmem:[#allocation2 + $0x141] sm:$0xff] }
 0x33e   : > { %3118 = vst.msk [vmem:[#allocation2 + $0x171] sm:$0xff] %vm171_vm1, %v3086_v18  ;;  %v3056_v25 = vadd.f32 %v7696_v24, %v9672_v21  ;;  %v2977_v26 = vpop.f32.mrb[31].mxu0  ;;  %v9830_v27 = vld [vmem:[#allocation2 + $0x139] sm:$0xff]  ;;  %10897 = vst [vmem:[#allocation26_spill] sm:$0xff] %v9836_v37  ;;  %v9961_v18 = vld [vmem:[#allocation2 + $0x128] sm:$0xff] }
 0x33f   : > { %10896 = vst [vmem:[#allocation12_spill] sm:$0xff] %v9830_v27  ;;  %3117 = vst.msk [vmem:[#allocation2 + $0x169] sm:$0xff] %vm171_vm1, %v3085_v22  ;;  %v3055_v31 = vadd.f32 %v9672_v21, %v2977_v26  ;;  %7738 = vmatprep.mubr.msk.f32.mxu1 %vm171_vm1, %v9830_v27  ;;  %v9957_v59 = vld [vmem:[#allocation2 + $0x120] sm:$0xff]  ;;  %v9965_v22 = vld [vmem:[#allocation2 + $0x138] sm:$0xff] }
 0x340   : > { %v3088_v41 = vmax.f32 %v3056_v25, 0.0  ;;  %7739 = vmatmul.mubr.msk.f32.gmra.mrb[26].mxu1 %vm171_vm1, %v9836_v37  ;;  %v9969_v24 = vld [vmem:[#allocation2 + $0x140] sm:$0xff] }
 0x341   : > { %v3087_v42 = vmax.f32 %v3055_v31, 0.0  ;;  %v9846_v21 = vld [vmem:[#allocation2 + $0x159] sm:$0xff] }
 0x342   : > { %3120 = vst.msk [vmem:[#allocation2 + $0x189] sm:$0xff] %vm171_vm1, %v3088_v41  ;;  %v9841_v2 = vld [vmem:[#allocation2 + $0x151] sm:$0xff]  ;;  %10899 = vst [vmem:[#allocation30_spill] sm:$0xff] %v9846_v21  ;;  %v3193_v41 = vld [vmem:[#allocation2 + $0x2] sm:$0xff] }
 0x343   : > { %10898 = vst [vmem:[#allocation28_spill] sm:$0xff] %v9841_v2  ;;  %3119 = vst.msk [vmem:[#allocation2 + $0x181] sm:$0xff] %vm171_vm1, %v3087_v42  ;;  %7741 = vmatprep.mubr.msk.f32.mxu1 %vm171_vm1, %v9841_v2  ;;  %v9973_v25 = vld [vmem:[#allocation2 + $0x150] sm:$0xff]  ;;  %v9977_v26 = vld [vmem:[#allocation2 + $0x158] sm:$0xff] }
 0x344   : > { %7742 = vmatmul.mubr.msk.f32.gmra.mrb[28].mxu1 %vm171_vm1, %v9846_v21 }
 0x345   : > { %v9854_v5 = vld [vmem:[#allocation2 + $0x171] sm:$0xff] }
 0x346   : > { %v9850_v40 = vld [vmem:[#allocation2 + $0x169] sm:$0xff]  ;;  %10901 = vst [vmem:[#allocation33_spill] sm:$0xff] %v9854_v5 }
 0x347   : > { %10900 = vst [vmem:[#allocation31_spill] sm:$0xff] %v9850_v40  ;;  %7744 = vmatprep.mubr.msk.f32.mxu1 %vm171_vm1, %v9850_v40  ;;  %v9981_v31 = vld [vmem:[#allocation2 + $0x168] sm:$0xff]  ;;  %v9985_v42 = vld [vmem:[#allocation2 + $0x170] sm:$0xff] }
 0x348   : > { %7745 = vmatmul.mubr.msk.f32.gmra.mrb[30].mxu1 %vm171_vm1, %v9854_v5  ;;  %v9996_v5 = vld [vmem:[#allocation2 + $0x1a] sm:$0xff]  ;;  %v10008_v40 = vld [vmem:[#allocation2 + $0x32] sm:$0xff] }
 0x349   : > { %7749 = vmatprep.mubr.msk.f32.mxu1 %vm171_vm1, %v3121_v3  ;;  %v3194_v3 = vld [vmem:[#allocation2 + $0xa] sm:$0xff]  ;;  %10902 = vst [vmem:[#allocation35_spill] sm:$0xff] %v9996_v5  ;;  %10904 = vst [vmem:[#allocation4_spill] sm:$0xff] %v10008_v40 }
 0x34c   : > { %7750 = vmatmul.mubr.msk.f32.vlgmr.msra.gmra.mrb[0].mxu1 %vm171_vm1, %v3122_v4  ;;  %v9993_v4 = vld [vmem:[%s10676_s1 + $0x10] sm:$0xf] }
 0x34d   : > { %7798 = vmatpush3.msk.msra.mxu1 %vm499_vm0, %v9665_v20  ;;  %7752 = vmatprep.mubr.msk.f32.mxu1 %vm171_vm1, %v9865_v63  ;;  %v9885_v20 = vld [vmem:[#allocation2 + $0x48] sm:$0xff] }
 0x34e   : > { %7847 = vmatprep.subr.msk.mxu1 %vm499_vm0, %v9862_v29 }
 0x350   : > { %7753 = vmatmul.mubr.msk.f32.gmra.mrb[2].mxu1 %vm171_vm1, %v9873_v28 }
 0x351   : > { %7755 = vmatprep.mubr.msk.f32.mxu1 %vm171_vm1, %v9877_v8 }
 0x354   : > { %7756 = vmatmul.mubr.msk.f32.gmra.mrb[4].mxu1 %vm171_vm1, %v9881_v30 }
 0x355   : > { %7758 = vmatprep.mubr.msk.f32.mxu1 %vm171_vm1, %v9885_v20 }
 0x358   : > { %7759 = vmatmul.mubr.msk.f32.gmra.mrb[6].mxu1 %vm171_vm1, %v9889_v34 }
 0x359   : > { %7761 = vmatprep.mubr.msk.f32.mxu1 %vm171_vm1, %v9893_v36 }
 0x35c   : > { %7762 = vmatmul.mubr.msk.f32.gmra.mrb[8].mxu1 %vm171_vm1, %v9897_v44 }
 0x35d   : > { %7764 = vmatprep.mubr.msk.f32.mxu1 %vm171_vm1, %v9901_v45 }
 0x360   : > { %7765 = vmatmul.mubr.msk.f32.gmra.mrb[10].mxu1 %vm171_vm1, %v9905_v46 }
 0x361   : > { %7767 = vmatprep.mubr.msk.f32.mxu1 %vm171_vm1, %v9909_v48 }
 0x364   : > { %7768 = vmatmul.mubr.msk.f32.gmra.mrb[12].mxu1 %vm171_vm1, %v9913_v52 }
 0x365   : > { %7770 = vmatprep.mubr.msk.f32.mxu1 %vm171_vm1, %v9917_v53 }
 0x368   : > { %7771 = vmatmul.mubr.msk.f32.gmra.mrb[14].mxu1 %vm171_vm1, %v9921_v54 }
 0x369   : > { %7773 = vmatprep.mubr.msk.f32.mxu1 %vm171_vm1, %v9925_v55 }
 0x36c   : > { %7774 = vmatmul.mubr.msk.f32.gmra.mrb[16].mxu1 %vm171_vm1, %v9929_v56 }
 0x36d   : > { %7776 = vmatprep.mubr.msk.f32.mxu1 %vm171_vm1, %v9933_v11 }
 0x370   : > { %7777 = vmatmul.mubr.msk.f32.gmra.mrb[18].mxu1 %vm171_vm1, %v9937_v13 }
 0x371   : > { %7779 = vmatprep.mubr.msk.f32.mxu1 %vm171_vm1, %v9941_v14 }
 0x374   : > { %7780 = vmatmul.mubr.msk.f32.gmra.mrb[20].mxu1 %vm171_vm1, %v9945_v15 }
 0x375   : > { %7782 = vmatprep.mubr.msk.f32.mxu1 %vm171_vm1, %v9949_v17 }
 0x378   : > { %7783 = vmatmul.mubr.msk.f32.gmra.mrb[22].mxu1 %vm171_vm1, %v9953_v60 }
 0x379   : > { %7785 = vmatprep.mubr.msk.f32.mxu1 %vm171_vm1, %v9957_v59 }
 0x37c   : > { %7786 = vmatmul.mubr.msk.f32.gmra.mrb[24].mxu1 %vm171_vm1, %v9961_v18 }
 0x37d   : > { %7788 = vmatprep.mubr.msk.f32.mxu1 %vm171_vm1, %v9965_v22 }
 0x380   : > { %7789 = vmatmul.mubr.msk.f32.gmra.mrb[26].mxu1 %vm171_vm1, %v9969_v24 }
 0x381   : > { %7791 = vmatprep.mubr.msk.f32.mxu1 %vm171_vm1, %v9973_v25 }
 0x384   : > { %7792 = vmatmul.mubr.msk.f32.gmra.mrb[28].mxu1 %vm171_vm1, %v9977_v26 }
 0x385   : > { %7794 = vmatprep.mubr.msk.f32.mxu1 %vm171_vm1, %v9981_v31 }
 0x388   : > { %7795 = vmatmul.mubr.msk.f32.gmra.mrb[30].mxu1 %vm171_vm1, %v9985_v42 }
 0x389   : > { %7799 = vmatprep.mubr.msk.f32.mxu1 %vm171_vm1, %v3193_v41  ;;  %v10004_v41 = vld [vmem:[#allocation2 + $0x22] sm:$0xff] }
 0x38a   : > { %10903 = vst [vmem:[#allocation3_spill] sm:$0xff] %v10004_v41 }
 0x38c   : > { %7800 = vmatmul.mubr.msk.f32.vlgmr.msra.gmra.mrb[0].mxu1 %vm171_vm1, %v3194_v3  ;;  %v10012_v3 = vld [vmem:[#allocation2 + $0x3a] sm:$0xff] }
 0x38d   : > { %7848 = vmatpush3.msk.msra.mxu1 %vm499_vm0, %v9862_v29  ;;  %7802 = vmatprep.mubr.msk.f32.mxu1 %vm171_vm1, %v9996_v5  ;;  %10905 = vst [vmem:[#allocation5_spill] sm:$0xff] %v10012_v3  ;;  %v10016_v29 = vld [vmem:[#allocation2 + $0x4a] sm:$0xff]  ;;  %v10020_v5 = vld [vmem:[#allocation2 + $0x52] sm:$0xff] }
 0x38e   : > { %7897 = vmatprep.subr.msk.mxu1 %vm499_vm0, %v9993_v4  ;;  %10906 = vst [vmem:[#allocation6_spill] sm:$0xff] %v10016_v29  ;;  %10907 = vst [vmem:[#allocation7_spill] sm:$0xff] %v10020_v5 }
 0x390   : > { %7803 = vmatmul.mubr.msk.f32.gmra.mrb[2].mxu1 %vm171_vm1, %v10004_v41  ;;  %v10024_v41 = vld [vmem:[#allocation2 + $0x62] sm:$0xff] }
 0x391   : > { %7805 = vmatprep.mubr.msk.f32.mxu1 %vm171_vm1, %v10008_v40  ;;  %10908 = vst [vmem:[#allocation8_spill] sm:$0xff] %v10024_v41  ;;  %v10028_v40 = vld [vmem:[#allocation2 + $0x6a] sm:$0xff] }
 0x392   : > { %10909 = vst [vmem:[#allocation9_spill] sm:$0xff] %v10028_v40 }
 0x394   : > { %7806 = vmatmul.mubr.msk.f32.gmra.mrb[4].mxu1 %vm171_vm1, %v10012_v3  ;;  %v10032_v3 = vld [vmem:[#allocation2 + $0x7a] sm:$0xff] }
 0x395   : > { %7808 = vmatprep.mubr.msk.f32.mxu1 %vm171_vm1, %v10016_v29  ;;  %10910 = vst [vmem:[#allocation10_spill] sm:$0xff] %v10032_v3  ;;  %v10036_v29 = vld [vmem:[#allocation2 + $0x82] sm:$0xff] }
 0x396   : > { %10911 = vst [vmem:[#allocation37_spill] sm:$0xff] %v10036_v29 }
 0x398   : > { %7809 = vmatmul.mubr.msk.f32.gmra.mrb[6].mxu1 %vm171_vm1, %v10020_v5  ;;  %v10040_v5 = vld [vmem:[#allocation2 + $0x92] sm:$0xff] }
 0x399   : > { %7811 = vmatprep.mubr.msk.f32.mxu1 %vm171_vm1, %v10024_v41  ;;  %10912 = vst [vmem:[#allocation38_spill] sm:$0xff] %v10040_v5  ;;  %v10044_v41 = vld [vmem:[#allocation2 + $0x9a] sm:$0xff] }
 0x39a   : > { %10913 = vst [vmem:[#allocation13_spill] sm:$0xff] %v10044_v41 }
 0x39c   : > { %7812 = vmatmul.mubr.msk.f32.gmra.mrb[8].mxu1 %vm171_vm1, %v10028_v40  ;;  %v10048_v40 = vld [vmem:[#allocation2 + $0xaa] sm:$0xff] }
 0x39d   : > { %7814 = vmatprep.mubr.msk.f32.mxu1 %vm171_vm1, %v10032_v3  ;;  %10914 = vst [vmem:[#allocation14_spill] sm:$0xff] %v10048_v40  ;;  %v10052_v3 = vld [vmem:[#allocation2 + $0xb2] sm:$0xff] }
 0x39e   : > { %10915 = vst [vmem:[#allocation15_spill] sm:$0xff] %v10052_v3 }
 0x3a0   : > { %7815 = vmatmul.mubr.msk.f32.gmra.mrb[10].mxu1 %vm171_vm1, %v10036_v29  ;;  %v10056_v29 = vld [vmem:[#allocation2 + $0xc2] sm:$0xff] }
 0x3a1   : > { %7817 = vmatprep.mubr.msk.f32.mxu1 %vm171_vm1, %v10040_v5  ;;  %10916 = vst [vmem:[#allocation16_spill] sm:$0xff] %v10056_v29  ;;  %v10060_v5 = vld [vmem:[#allocation2 + $0xca] sm:$0xff] }
 0x3a2   : > { %10917 = vst [vmem:[#allocation17_spill] sm:$0xff] %v10060_v5 }
 0x3a4   : > { %7818 = vmatmul.mubr.msk.f32.gmra.mrb[12].mxu1 %vm171_vm1, %v10044_v41  ;;  %v10064_v41 = vld [vmem:[#allocation2 + $0xda] sm:$0xff] }
 0x3a5   : > { %7820 = vmatprep.mubr.msk.f32.mxu1 %vm171_vm1, %v10048_v40  ;;  %10918 = vst [vmem:[#allocation18_spill] sm:$0xff] %v10064_v41  ;;  %v10068_v40 = vld [vmem:[#allocation2 + $0xe2] sm:$0xff] }
 0x3a6   : > { %10919 = vst [vmem:[#allocation19_spill] sm:$0xff] %v10068_v40 }
 0x3a8   : > { %7821 = vmatmul.mubr.msk.f32.gmra.mrb[14].mxu1 %vm171_vm1, %v10052_v3  ;;  %v10072_v3 = vld [vmem:[#allocation2 + $0xf2] sm:$0xff] }
 0x3a9   : > { %7823 = vmatprep.mubr.msk.f32.mxu1 %vm171_vm1, %v10056_v29  ;;  %10920 = vst [vmem:[#allocation20_spill] sm:$0xff] %v10072_v3  ;;  %v10076_v29 = vld [vmem:[#allocation2 + $0xfa] sm:$0xff] }
 0x3aa   : > { %10921 = vst [vmem:[#allocation21_spill] sm:$0xff] %v10076_v29 }
 0x3ac   : > { %7824 = vmatmul.mubr.msk.f32.gmra.mrb[16].mxu1 %vm171_vm1, %v10060_v5  ;;  %v10080_v5 = vld [vmem:[#allocation2 + $0x10a] sm:$0xff] }
 0x3ad   : > { %7826 = vmatprep.mubr.msk.f32.mxu1 %vm171_vm1, %v10064_v41  ;;  %10922 = vst [vmem:[#allocation22_spill] sm:$0xff] %v10080_v5  ;;  %v10084_v41 = vld [vmem:[#allocation2 + $0x112] sm:$0xff] }
 0x3ae   : > { %10923 = vst [vmem:[#allocation23_spill] sm:$0xff] %v10084_v41 }
 0x3b0   : > { %7827 = vmatmul.mubr.msk.f32.gmra.mrb[18].mxu1 %vm171_vm1, %v10068_v40  ;;  %v10088_v40 = vld [vmem:[#allocation2 + $0x122] sm:$0xff] }
 0x3b1   : > { %7829 = vmatprep.mubr.msk.f32.mxu1 %vm171_vm1, %v10072_v3  ;;  %10924 = vst [vmem:[#allocation24_spill] sm:$0xff] %v10088_v40  ;;  %v10092_v3 = vld [vmem:[#allocation2 + $0x12a] sm:$0xff] }
 0x3b2   : > { %10925 = vst [vmem:[#allocation25_spill] sm:$0xff] %v10092_v3 }
 0x3b4   : > { %7830 = vmatmul.mubr.msk.f32.gmra.mrb[20].mxu1 %vm171_vm1, %v10076_v29  ;;  %v10096_v29 = vld [vmem:[#allocation2 + $0x13a] sm:$0xff] }
 0x3b5   : > { %7832 = vmatprep.mubr.msk.f32.mxu1 %vm171_vm1, %v10080_v5  ;;  %10926 = vst [vmem:[#allocation27_spill] sm:$0xff] %v10096_v29  ;;  %v10100_v5 = vld [vmem:[#allocation2 + $0x142] sm:$0xff] }
 0x3b8   : > { %7833 = vmatmul.mubr.msk.f32.gmra.mrb[22].mxu1 %vm171_vm1, %v10084_v41  ;;  %v10104_v41 = vld [vmem:[#allocation2 + $0x152] sm:$0xff] }
 0x3b9   : > { %7835 = vmatprep.mubr.msk.f32.mxu1 %vm171_vm1, %v10088_v40  ;;  %10927 = vst [vmem:[#allocation29_spill] sm:$0xff] %v10104_v41  ;;  %v10108_v40 = vld [vmem:[#allocation2 + $0x15a] sm:$0xff] }
 0x3bc   : > { %7836 = vmatmul.mubr.msk.f32.gmra.mrb[24].mxu1 %vm171_vm1, %v10092_v3  ;;  %v10112_v3 = vld [vmem:[#allocation2 + $0x16a] sm:$0xff] }
 0x3bd   : > { %7838 = vmatprep.mubr.msk.f32.mxu1 %vm171_vm1, %v10096_v29  ;;  %10928 = vst [vmem:[#allocation32_spill] sm:$0xff] %v10112_v3  ;;  %v10116_v29 = vld [vmem:[#allocation2 + $0x172] sm:$0xff] }
 0x3c0   : > { %7839 = vmatmul.mubr.msk.f32.gmra.mrb[26].mxu1 %vm171_vm1, %v10100_v5 }
 0x3c1   : > { %7841 = vmatprep.mubr.msk.f32.mxu1 %vm171_vm1, %v10104_v41  ;;  %v6512_v41 = vld [vmem:[%s10676_s1 + $0x14] sm:$0xf] }
 0x3c4   : > { %7842 = vmatmul.mubr.msk.f32.gmra.mrb[28].mxu1 %vm171_vm1, %v10108_v40 }
 0x3c5   : > { %7844 = vmatprep.mubr.msk.f32.mxu1 %vm171_vm1, %v10112_v3 }
 0x3c8   : > { %7845 = vmatmul.mubr.msk.f32.gmra.mrb[30].mxu1 %vm171_vm1, %v10116_v29 }
 0x3c9   : > { %7849 = vmatprep.mubr.msk.f32.mxu1 %vm171_vm1, %v9865_v63  ;;  %v10186_v63 = vld [vmem:[#allocation2 + $0x180] sm:$0xff] }
 0x3cc   : > { %7850 = vmatmul.mubr.msk.f32.vlgmr.msra.gmra.mrb[0].mxu1 %vm171_vm1, %v9873_v28  ;;  %v10190_v28 = vld [vmem:[#allocation2 + $0x188] sm:$0xff] }
 0x3cd   : > { %7898 = vmatpush3.msk.msra.mxu1 %vm499_vm0, %v9993_v4  ;;  %7852 = vmatprep.mubr.msk.f32.mxu1 %vm171_vm1, %v9877_v8  ;;  %v6546_v4 = vld [vmem:[%s10676_s1 + $0x18] sm:$0xf] }
 0x3ce   : > { %7947 = vmatprep.subr.msk.mxu1 %vm499_vm0, %v6512_v41 }
 0x3d0   : > { %7853 = vmatmul.mubr.msk.f32.gmra.mrb[2].mxu1 %vm171_vm1, %v9881_v30 }
 0x3d1   : > { %7855 = vmatprep.mubr.msk.f32.mxu1 %vm171_vm1, %v9885_v20 }
 0x3d4   : > { %7856 = vmatmul.mubr.msk.f32.gmra.mrb[4].mxu1 %vm171_vm1, %v9889_v34 }
 0x3d5   : > { %7858 = vmatprep.mubr.msk.f32.mxu1 %vm171_vm1, %v9893_v36 }
 0x3d8   : > { %7859 = vmatmul.mubr.msk.f32.gmra.mrb[6].mxu1 %vm171_vm1, %v9897_v44 }
 0x3d9   : > { %7861 = vmatprep.mubr.msk.f32.mxu1 %vm171_vm1, %v9901_v45 }
 0x3dc   : > { %7862 = vmatmul.mubr.msk.f32.gmra.mrb[8].mxu1 %vm171_vm1, %v9905_v46 }
 0x3dd   : > { %7864 = vmatprep.mubr.msk.f32.mxu1 %vm171_vm1, %v9909_v48 }
 0x3e0   : > { %7865 = vmatmul.mubr.msk.f32.gmra.mrb[10].mxu1 %vm171_vm1, %v9913_v52 }
 0x3e1   : > { %7867 = vmatprep.mubr.msk.f32.mxu1 %vm171_vm1, %v9917_v53 }
 0x3e4   : > { %7868 = vmatmul.mubr.msk.f32.gmra.mrb[12].mxu1 %vm171_vm1, %v9921_v54 }
 0x3e5   : > { %7870 = vmatprep.mubr.msk.f32.mxu1 %vm171_vm1, %v9925_v55 }
 0x3e8   : > { %7871 = vmatmul.mubr.msk.f32.gmra.mrb[14].mxu1 %vm171_vm1, %v9929_v56 }
 0x3e9   : > { %7873 = vmatprep.mubr.msk.f32.mxu1 %vm171_vm1, %v9933_v11 }
 0x3ec   : > { %7874 = vmatmul.mubr.msk.f32.gmra.mrb[16].mxu1 %vm171_vm1, %v9937_v13 }
 0x3ed   : > { %7876 = vmatprep.mubr.msk.f32.mxu1 %vm171_vm1, %v9941_v14 }
 0x3f0   : > { %7877 = vmatmul.mubr.msk.f32.gmra.mrb[18].mxu1 %vm171_vm1, %v9945_v15 }
 0x3f1   : > { %7879 = vmatprep.mubr.msk.f32.mxu1 %vm171_vm1, %v9949_v17 }
 0x3f4   : > { %7880 = vmatmul.mubr.msk.f32.gmra.mrb[20].mxu1 %vm171_vm1, %v9953_v60 }
 0x3f5   : > { %7882 = vmatprep.mubr.msk.f32.mxu1 %vm171_vm1, %v9957_v59 }
 0x3f8   : > { %7883 = vmatmul.mubr.msk.f32.gmra.mrb[22].mxu1 %vm171_vm1, %v9961_v18 }
 0x3f9   : > { %7885 = vmatprep.mubr.msk.f32.mxu1 %vm171_vm1, %v9965_v22 }
 0x3fc   : > { %7886 = vmatmul.mubr.msk.f32.gmra.mrb[24].mxu1 %vm171_vm1, %v9969_v24 }
 0x3fd   : > { %7888 = vmatprep.mubr.msk.f32.mxu1 %vm171_vm1, %v9973_v25 }
 0x400   : > { %7889 = vmatmul.mubr.msk.f32.gmra.mrb[26].mxu1 %vm171_vm1, %v9977_v26 }
 0x401   : > { %7891 = vmatprep.mubr.msk.f32.mxu1 %vm171_vm1, %v9981_v31 }
 0x404   : > { %7892 = vmatmul.mubr.msk.f32.gmra.mrb[28].mxu1 %vm171_vm1, %v9985_v42 }
 0x405   : > { %7894 = vmatprep.mubr.msk.f32.mxu1 %vm171_vm1, %v10186_v63 }
 0x408   : > { %7895 = vmatmul.mubr.msk.f32.gmra.mrb[30].mxu1 %vm171_vm1, %v10190_v28 }
 0x409   : > { %7899 = vmatprep.mubr.msk.f32.mxu1 %vm171_vm1, %v9686_v62  ;;  %v10929_v62 = vld [vmem:[#allocation31_spill] sm:$0xff] }
 0x40c   : > { %7900 = vmatmul.mubr.msk.f32.vlgmr.msra.gmra.mrb[0].mxu1 %vm171_vm1, %v9692_v7  ;;  %v10930_v7 = vld [vmem:[#allocation33_spill] sm:$0xff] }
 0x40d   : > { %7948 = vmatpush3.msk.msra.mxu1 %vm499_vm0, %v6512_v41  ;;  %7902 = vmatprep.mubr.msk.f32.mxu1 %vm171_vm1, %v9698_v35  ;;  %v10259_v41 = vld [vmem:[#allocation2 + $0x181] sm:$0xff] }
 0x40e   : > { %7997 = vmatprep.subr.msk.mxu1 %vm499_vm0, %v6546_v4  ;;  %10931 = vst [vmem:[#allocation34_spill] sm:$0xff] %v10259_v41 }
 0x410   : > { %7903 = vmatmul.mubr.msk.f32.gmra.mrb[2].mxu1 %vm171_vm1, %v9704_v43 }
 0x411   : > { %7905 = vmatprep.mubr.msk.f32.mxu1 %vm171_vm1, %v9710_v49 }
 0x414   : > { %7906 = vmatmul.mubr.msk.f32.gmra.mrb[4].mxu1 %vm171_vm1, %v9716_v51 }
 0x415   : > { %7908 = vmatprep.mubr.msk.f32.mxu1 %vm171_vm1, %v9722_v57 }
 0x418   : > { %7909 = vmatmul.mubr.msk.f32.gmra.mrb[6].mxu1 %vm171_vm1, %v9728_v6 }
 0x419   : > { %7911 = vmatprep.mubr.msk.f32.mxu1 %vm171_vm1, %v9734_v16 }
 0x41c   : > { %7912 = vmatmul.mubr.msk.f32.gmra.mrb[8].mxu1 %vm171_vm1, %v9740_v58 }
 0x41d   : > { %7914 = vmatprep.mubr.msk.f32.mxu1 %vm171_vm1, %v9746_v19 }
 0x420   : > { %7915 = vmatmul.mubr.msk.f32.gmra.mrb[10].mxu1 %vm171_vm1, %v9752_v23 }
 0x421   : > { %7917 = vmatprep.mubr.msk.f32.mxu1 %vm171_vm1, %v9758_v32 }
 0x424   : > { %7918 = vmatmul.mubr.msk.f32.gmra.mrb[12].mxu1 %vm171_vm1, %v9764_v38 }
 0x425   : > { %7920 = vmatprep.mubr.msk.f32.mxu1 %vm171_vm1, %v9770_v39 }
 0x428   : > { %7921 = vmatmul.mubr.msk.f32.gmra.mrb[14].mxu1 %vm171_vm1, %v9776_v1 }
 0x429   : > { %7923 = vmatprep.mubr.msk.f32.mxu1 %vm171_vm1, %v9782_v9 }
 0x42c   : > { %7924 = vmatmul.mubr.msk.f32.gmra.mrb[16].mxu1 %vm171_vm1, %v9788_v33 }
 0x42d   : > { %7926 = vmatprep.mubr.msk.f32.mxu1 %vm171_vm1, %v9794_v47 }
 0x430   : > { %7927 = vmatmul.mubr.msk.f32.gmra.mrb[18].mxu1 %vm171_vm1, %v9800_v50 }
 0x431   : > { %7929 = vmatprep.mubr.msk.f32.mxu1 %vm171_vm1, %v9806_v10 }
 0x434   : > { %7930 = vmatmul.mubr.msk.f32.gmra.mrb[20].mxu1 %vm171_vm1, %v9812_v12 }
 0x435   : > { %7932 = vmatprep.mubr.msk.f32.mxu1 %vm171_vm1, %v9818_v61 }
 0x438   : > { %7933 = vmatmul.mubr.msk.f32.gmra.mrb[22].mxu1 %vm171_vm1, %v9824_v0  ;;  %v10943_v0 = vld [vmem:[#allocation38_spill] sm:$0xff] }
 0x439   : > { %7935 = vmatprep.mubr.msk.f32.mxu1 %vm171_vm1, %v9830_v27  ;;  %v10263_v27 = vld [vmem:[#allocation2 + $0x189] sm:$0xff] }
 0x43a   : > { %10932 = vst [vmem:[#allocation36_spill] sm:$0xff] %v10263_v27 }
 0x43c   : > { %7936 = vmatmul.mubr.msk.f32.gmra.mrb[24].mxu1 %vm171_vm1, %v9836_v37  ;;  %v10939_v37 = vld [vmem:[#allocation8_spill] sm:$0xff] }
 0x43d   : > { %7938 = vmatprep.mubr.msk.f32.mxu1 %vm171_vm1, %v9841_v2  ;;  %v10933_v2 = vld [vmem:[#allocation35_spill] sm:$0xff] }
 0x440   : > { %7939 = vmatmul.mubr.msk.f32.gmra.mrb[26].mxu1 %vm171_vm1, %v9846_v21  ;;  %v10934_v21 = vld [vmem:[#allocation3_spill] sm:$0xff] }
 0x441   : > { %7941 = vmatprep.mubr.msk.f32.mxu1 %vm171_vm1, %v10929_v62  ;;  %v6580_v62 = vld [vmem:[%s10676_s1 + $0x1c] sm:$0xf] }
 0x444   : > { %7942 = vmatmul.mubr.msk.f32.gmra.mrb[28].mxu1 %vm171_vm1, %v10930_v7  ;;  %v10935_v7 = vld [vmem:[#allocation4_spill] sm:$0xff] }
 0x445   : > { %7944 = vmatprep.mubr.msk.f32.mxu1 %vm171_vm1, %v10259_v41  ;;  %v10936_v41 = vld [vmem:[#allocation5_spill] sm:$0xff] }
 0x448   : > { %7945 = vmatmul.mubr.msk.f32.gmra.mrb[30].mxu1 %vm171_vm1, %v10263_v27  ;;  %v10937_v27 = vld [vmem:[#allocation6_spill] sm:$0xff] }
 0x449   : > { %7949 = vmatprep.mubr.msk.f32.mxu1 %vm171_vm1, %v10933_v2  ;;  %v10938_v2 = vld [vmem:[#allocation7_spill] sm:$0xff] }
 0x44c   : > { %7950 = vmatmul.mubr.msk.f32.vlgmr.msra.gmra.mrb[0].mxu1 %vm171_vm1, %v10934_v21  ;;  %v10940_v21 = vld [vmem:[#allocation9_spill] sm:$0xff] }
 0x44d   : > { %7998 = vmatpush3.msk.msra.mxu1 %vm499_vm0, %v6546_v4  ;;  %7952 = vmatprep.mubr.msk.f32.mxu1 %vm171_vm1, %v10935_v7  ;;  %v10941_v4 = vld [vmem:[#allocation10_spill] sm:$0xff]  ;;  %v10942_v7 = vld [vmem:[#allocation37_spill] sm:$0xff] }
 0x44e   : > { %8047 = vmatprep.subr.msk.mxu1 %vm499_vm0, %v6580_v62 }
 0x450   : > { %7953 = vmatmul.mubr.msk.f32.gmra.mrb[2].mxu1 %vm171_vm1, %v10936_v41  ;;  %v10944_v41 = vld [vmem:[#allocation13_spill] sm:$0xff] }
 0x451   : > { %7955 = vmatprep.mubr.msk.f32.mxu1 %vm171_vm1, %v10937_v27  ;;  %v10945_v27 = vld [vmem:[#allocation14_spill] sm:$0xff] }
 0x454   : > { %7956 = vmatmul.mubr.msk.f32.gmra.mrb[4].mxu1 %vm171_vm1, %v10938_v2  ;;  %v10946_v2 = vld [vmem:[#allocation15_spill] sm:$0xff] }
 0x455   : > { %7958 = vmatprep.mubr.msk.f32.mxu1 %vm171_vm1, %v10939_v37  ;;  %v10947_v37 = vld [vmem:[#allocation16_spill] sm:$0xff] }
 0x458   : > { %7959 = vmatmul.mubr.msk.f32.gmra.mrb[6].mxu1 %vm171_vm1, %v10940_v21  ;;  %v10948_v21 = vld [vmem:[#allocation17_spill] sm:$0xff] }
 0x459   : > { %7961 = vmatprep.mubr.msk.f32.mxu1 %vm171_vm1, %v10941_v4  ;;  %v10949_v4 = vld [vmem:[#allocation18_spill] sm:$0xff] }
 0x45c   : > { %7962 = vmatmul.mubr.msk.f32.gmra.mrb[8].mxu1 %vm171_vm1, %v10942_v7  ;;  %v10950_v7 = vld [vmem:[#allocation19_spill] sm:$0xff] }
 0x45d   : > { %7964 = vmatprep.mubr.msk.f32.mxu1 %vm171_vm1, %v10943_v0  ;;  %v10951_v0 = vld [vmem:[#allocation20_spill] sm:$0xff] }
 0x460   : > { %7965 = vmatmul.mubr.msk.f32.gmra.mrb[10].mxu1 %vm171_vm1, %v10944_v41  ;;  %v10952_v41 = vld [vmem:[#allocation21_spill] sm:$0xff] }
 0x461   : > { %7967 = vmatprep.mubr.msk.f32.mxu1 %vm171_vm1, %v10945_v27  ;;  %v10953_v27 = vld [vmem:[#allocation22_spill] sm:$0xff] }
 0x464   : > { %7968 = vmatmul.mubr.msk.f32.gmra.mrb[12].mxu1 %vm171_vm1, %v10946_v2  ;;  %v10954_v2 = vld [vmem:[#allocation23_spill] sm:$0xff] }
 0x465   : > { %7970 = vmatprep.mubr.msk.f32.mxu1 %vm171_vm1, %v10947_v37  ;;  %v10955_v37 = vld [vmem:[#allocation24_spill] sm:$0xff] }
 0x468   : > { %7971 = vmatmul.mubr.msk.f32.gmra.mrb[14].mxu1 %vm171_vm1, %v10948_v21  ;;  %v10956_v21 = vld [vmem:[#allocation25_spill] sm:$0xff] }
 0x469   : > { %7973 = vmatprep.mubr.msk.f32.mxu1 %vm171_vm1, %v10949_v4  ;;  %v10957_v4 = vld [vmem:[#allocation27_spill] sm:$0xff] }
 0x46c   : > { %7974 = vmatmul.mubr.msk.f32.gmra.mrb[16].mxu1 %vm171_vm1, %v10950_v7 }
 0x46d   : > { %7976 = vmatprep.mubr.msk.f32.mxu1 %vm171_vm1, %v10951_v0  ;;  %v10958_v0 = vld [vmem:[#allocation29_spill] sm:$0xff] }
 0x470   : > { %7977 = vmatmul.mubr.msk.f32.gmra.mrb[18].mxu1 %vm171_vm1, %v10952_v41 }
 0x471   : > { %7979 = vmatprep.mubr.msk.f32.mxu1 %vm171_vm1, %v10953_v27 }
 0x474   : > { %7980 = vmatmul.mubr.msk.f32.gmra.mrb[20].mxu1 %vm171_vm1, %v10954_v2 }
 0x475   : > { %7982 = vmatprep.mubr.msk.f32.mxu1 %vm171_vm1, %v10955_v37  ;;  %v10332_v37 = vld [vmem:[#allocation2 + $0x182] sm:$0xff] }
 0x478   : > { %7983 = vmatmul.mubr.msk.f32.gmra.mrb[22].mxu1 %vm171_vm1, %v10956_v21 }
 0x479   : > { %7985 = vmatprep.mubr.msk.f32.mxu1 %vm171_vm1, %v10957_v4  ;;  %v10336_v4 = vld [vmem:[#allocation2 + $0x18a] sm:$0xff] }
 0x47c   : > { %7986 = vmatmul.mubr.msk.f32.gmra.mrb[24].mxu1 %vm171_vm1, %v10100_v5 }
 0x47d   : > { %7988 = vmatprep.mubr.msk.f32.mxu1 %vm171_vm1, %v10958_v0 }
 0x480   : > { %7989 = vmatmul.mubr.msk.f32.gmra.mrb[26].mxu1 %vm171_vm1, %v10108_v40 }
 0x481   : > { %7991 = vmatprep.mubr.msk.f32.mxu1 %vm171_vm1, %v10112_v3  ;;  %v6614_v3 = vld [vmem:[%s10676_s1 + $0x20] sm:$0xf] }
 0x484   : > { %7992 = vmatmul.mubr.msk.f32.gmra.mrb[28].mxu1 %vm171_vm1, %v10116_v29 }
 0x485   : > { %7994 = vmatprep.mubr.msk.f32.mxu1 %vm171_vm1, %v10332_v37 }
 0x488   : > { %7995 = vmatmul.mubr.msk.f32.gmra.mrb[30].mxu1 %vm171_vm1, %v10336_v4 }
 0x489   : > { %7999 = vmatprep.mubr.msk.f32.mxu1 %vm171_vm1, %v9877_v8  ;;  %v3155_v8 = vld [vmem:[#allocation2 + $0x198] sm:$0xff] }
 0x48c   : > { %8000 = vmatmul.mubr.msk.f32.vlgmr.msra.gmra.mrb[0].mxu1 %vm171_vm1, %v9881_v30  ;;  %v3156_v30 = vld [vmem:[#allocation2 + $0x1a0] sm:$0xff] }
 0x48d   : > { %8048 = vmatpush3.msk.msra.mxu1 %vm499_vm0, %v6580_v62  ;;  %8002 = vmatprep.mubr.msk.f32.mxu1 %vm171_vm1, %v9885_v20  ;;  %v10978_v20 = vld [vmem:[#allocation14_spill] sm:$0xff] }
 0x48e   : > { %8097 = vmatprep.subr.msk.mxu1 %vm499_vm0, %v6614_v3 }
 0x490   : > { %8003 = vmatmul.mubr.msk.f32.gmra.mrb[2].mxu1 %vm171_vm1, %v9889_v34  ;;  %v10979_v34 = vld [vmem:[#allocation15_spill] sm:$0xff] }
 0x491   : > { %8005 = vmatprep.mubr.msk.f32.mxu1 %vm171_vm1, %v9893_v36  ;;  %v10980_v36 = vld [vmem:[#allocation16_spill] sm:$0xff] }
 0x494   : > { %8006 = vmatmul.mubr.msk.f32.gmra.mrb[4].mxu1 %vm171_vm1, %v9897_v44  ;;  %v10981_v44 = vld [vmem:[#allocation17_spill] sm:$0xff] }
 0x495   : > { %8008 = vmatprep.mubr.msk.f32.mxu1 %vm171_vm1, %v9901_v45  ;;  %v10982_v45 = vld [vmem:[#allocation18_spill] sm:$0xff] }
 0x498   : > { %8009 = vmatmul.mubr.msk.f32.gmra.mrb[6].mxu1 %vm171_vm1, %v9905_v46  ;;  %v10983_v46 = vld [vmem:[#allocation20_spill] sm:$0xff] }
 0x499   : > { %8011 = vmatprep.mubr.msk.f32.mxu1 %vm171_vm1, %v9909_v48  ;;  %v10984_v48 = vld [vmem:[#allocation24_spill] sm:$0xff] }
 0x49c   : > { %8012 = vmatmul.mubr.msk.f32.gmra.mrb[8].mxu1 %vm171_vm1, %v9913_v52  ;;  %v10985_v52 = vld [vmem:[#allocation27_spill] sm:$0xff] }
 0x49d   : > { %8014 = vmatprep.mubr.msk.f32.mxu1 %vm171_vm1, %v9917_v53  ;;  %v3227_v53 = vld [vmem:[#allocation2 + $0x19a] sm:$0xff] }
 0x4a0   : > { %8015 = vmatmul.mubr.msk.f32.gmra.mrb[10].mxu1 %vm171_vm1, %v9921_v54  ;;  %v5878_v54 = vld [vmem:[%s8780_s21 + $0x8] sm:$0xff] }
 0x4a1   : > { %8017 = vmatprep.mubr.msk.f32.mxu1 %vm171_vm1, %v9925_v55 }
 0x4a4   : > { %8018 = vmatmul.mubr.msk.f32.gmra.mrb[12].mxu1 %vm171_vm1, %v9929_v56  ;;  %v5877_v56 = vld [vmem:[%s8780_s21] sm:$0xff] }
 0x4a5   : > { %8020 = vmatprep.mubr.msk.f32.mxu1 %vm171_vm1, %v9933_v11 }
 0x4a8   : > { %8021 = vmatmul.mubr.msk.f32.gmra.mrb[14].mxu1 %vm171_vm1, %v9937_v13 }
 0x4a9   : > { %8023 = vmatprep.mubr.msk.f32.mxu1 %vm171_vm1, %v9941_v14 }
 0x4ac   : > { %8024 = vmatmul.mubr.msk.f32.gmra.mrb[16].mxu1 %vm171_vm1, %v9945_v15 }
 0x4ad   : > { %8026 = vmatprep.mubr.msk.f32.mxu1 %vm171_vm1, %v9949_v17  ;;  %v5880_v17 = vld [vmem:[%s8780_s21 + $0x18] sm:$0xff] }
 0x4b0   : > { %8027 = vmatmul.mubr.msk.f32.gmra.mrb[18].mxu1 %vm171_vm1, %v9953_v60 }
 0x4b1   : > { %8029 = vmatprep.mubr.msk.f32.mxu1 %vm171_vm1, %v9957_v59 }
 0x4b4   : > { %8030 = vmatmul.mubr.msk.f32.gmra.mrb[20].mxu1 %vm171_vm1, %v9961_v18  ;;  %v5879_v18 = vld [vmem:[%s8780_s21 + $0x10] sm:$0xff] }
 0x4b5   : > { %8032 = vmatprep.mubr.msk.f32.mxu1 %vm171_vm1, %v9965_v22 }
 0x4b8   : > { %8033 = vmatmul.mubr.msk.f32.gmra.mrb[22].mxu1 %vm171_vm1, %v9969_v24 }
 0x4b9   : > { %8035 = vmatprep.mubr.msk.f32.mxu1 %vm171_vm1, %v9973_v25 }
 0x4bc   : > { %8036 = vmatmul.mubr.msk.f32.gmra.mrb[24].mxu1 %vm171_vm1, %v9977_v26 }
 0x4bd   : > { %8038 = vmatprep.mubr.msk.f32.mxu1 %vm171_vm1, %v9981_v31  ;;  %v5882_v31 = vld [vmem:[%s8780_s21 + $0x28] sm:$0xff] }
 0x4c0   : > { %8039 = vmatmul.mubr.msk.f32.gmra.mrb[26].mxu1 %vm171_vm1, %v9985_v42 }
 0x4c1   : > { %8041 = vmatprep.mubr.msk.f32.mxu1 %vm171_vm1, %v10186_v63 }
 0x4c4   : > { %8042 = vmatmul.mubr.msk.f32.gmra.mrb[28].mxu1 %vm171_vm1, %v10190_v28 }
 0x4c5   : > { %8044 = vmatprep.mubr.msk.f32.mxu1 %vm171_vm1, %v3155_v8 }
 0x4c8   : > { %8045 = vmatmul.mubr.msk.f32.gmra.mrb[30].mxu1 %vm171_vm1, %v3156_v30 }
 0x4c9   : > { %8049 = vmatprep.mubr.msk.f32.mxu1 %vm171_vm1, %v9698_v35  ;;  %v10959_v35 = vld [vmem:[#allocation11_spill] sm:$0xff] }
 0x4cc   : > { %8050 = vmatmul.mubr.msk.f32.vlgmr.msra.gmra.mrb[0].mxu1 %vm171_vm1, %v9704_v43  ;;  %v10960_v43 = vld [vmem:[#allocation12_spill] sm:$0xff] }
 0x4cd   : > { %8098 = vmatpush3.msk.msra.mxu1 %vm499_vm0, %v6614_v3  ;;  %8052 = vmatprep.mubr.msk.f32.mxu1 %vm171_vm1, %v9710_v49  ;;  %v10961_v49 = vld [vmem:[#allocation26_spill] sm:$0xff] }
 0x4d0   : > { %8053 = vmatmul.mubr.msk.f32.gmra.mrb[2].mxu1 %vm171_vm1, %v9716_v51  ;;  %v10962_v51 = vld [vmem:[#allocation28_spill] sm:$0xff] }
 0x4d1   : > { %8055 = vmatprep.mubr.msk.f32.mxu1 %vm171_vm1, %v9722_v57  ;;  %v10963_v57 = vld [vmem:[#allocation30_spill] sm:$0xff] }
 0x4d4   : > { %8056 = vmatmul.mubr.msk.f32.gmra.mrb[4].mxu1 %vm171_vm1, %v9728_v6  ;;  %v10964_v6 = vld [vmem:[#allocation31_spill] sm:$0xff] }
 0x4d5   : > { %8058 = vmatprep.mubr.msk.f32.mxu1 %vm171_vm1, %v9734_v16  ;;  %v10965_v16 = vld [vmem:[#allocation33_spill] sm:$0xff] }
 0x4d8   : > { %8059 = vmatmul.mubr.msk.f32.gmra.mrb[6].mxu1 %vm171_vm1, %v9740_v58  ;;  %v10966_v58 = vld [vmem:[#allocation34_spill] sm:$0xff] }
 0x4d9   : > { %8061 = vmatprep.mubr.msk.f32.mxu1 %vm171_vm1, %v9746_v19  ;;  %v3191_v19 = vld [vmem:[#allocation2 + $0x199] sm:$0xff] }
 0x4dc   : > { %8062 = vmatmul.mubr.msk.f32.gmra.mrb[8].mxu1 %vm171_vm1, %v9752_v23  ;;  %v10967_v23 = vld [vmem:[#allocation36_spill] sm:$0xff] }
 0x4dd   : > { %8064 = vmatprep.mubr.msk.f32.mxu1 %vm171_vm1, %v9758_v32  ;;  %v3192_v32 = vld [vmem:[#allocation2 + $0x1a1] sm:$0xff] }
 0x4e0   : > { %8065 = vmatmul.mubr.msk.f32.gmra.mrb[10].mxu1 %vm171_vm1, %v9764_v38  ;;  %v10968_v38 = vld [vmem:[#allocation4_spill] sm:$0xff] }
 0x4e1   : > { %8067 = vmatprep.mubr.msk.f32.mxu1 %vm171_vm1, %v9770_v39  ;;  %v10969_v39 = vld [vmem:[#allocation5_spill] sm:$0xff] }
 0x4e4   : > { %8068 = vmatmul.mubr.msk.f32.gmra.mrb[12].mxu1 %vm171_vm1, %v9776_v1  ;;  %v10970_v1 = vld [vmem:[#allocation6_spill] sm:$0xff] }
 0x4e5   : > { %8070 = vmatprep.mubr.msk.f32.mxu1 %vm171_vm1, %v9782_v9  ;;  %v10971_v9 = vld [vmem:[#allocation7_spill] sm:$0xff] }
 0x4e8   : > { %8071 = vmatmul.mubr.msk.f32.gmra.mrb[14].mxu1 %vm171_vm1, %v9788_v33  ;;  %v10972_v33 = vld [vmem:[#allocation8_spill] sm:$0xff] }
 0x4e9   : > { %8073 = vmatprep.mubr.msk.f32.mxu1 %vm171_vm1, %v9794_v47  ;;  %v10973_v47 = vld [vmem:[#allocation9_spill] sm:$0xff] }
 0x4ec   : > { %8074 = vmatmul.mubr.msk.f32.gmra.mrb[16].mxu1 %vm171_vm1, %v9800_v50  ;;  %v10974_v50 = vld [vmem:[#allocation10_spill] sm:$0xff] }
 0x4ed   : > { %8076 = vmatprep.mubr.msk.f32.mxu1 %vm171_vm1, %v9806_v10  ;;  %v10975_v10 = vld [vmem:[#allocation37_spill] sm:$0xff] }
 0x4f0   : > { %8077 = vmatmul.mubr.msk.f32.gmra.mrb[18].mxu1 %vm171_vm1, %v9812_v12  ;;  %v10976_v12 = vld [vmem:[#allocation38_spill] sm:$0xff] }
 0x4f1   : > { %8079 = vmatprep.mubr.msk.f32.mxu1 %vm171_vm1, %v9818_v61  ;;  %v10977_v61 = vld [vmem:[#allocation13_spill] sm:$0xff] }
 0x4f4   : > { %8080 = vmatmul.mubr.msk.f32.gmra.mrb[20].mxu1 %vm171_vm1, %v10959_v35 }
 0x4f5   : > { %8082 = vmatprep.mubr.msk.f32.mxu1 %vm171_vm1, %v10960_v43 }
 0x4f8   : > { %8083 = vmatmul.mubr.msk.f32.gmra.mrb[22].mxu1 %vm171_vm1, %v10961_v49  ;;  %v5886_v49 = vld [vmem:[%s8780_s21 + $0x48] sm:$0xff] }
 0x4f9   : > { %8085 = vmatprep.mubr.msk.f32.mxu1 %vm171_vm1, %v10962_v51 }
 0x4fc   : > { %8086 = vmatmul.mubr.msk.f32.gmra.mrb[24].mxu1 %vm171_vm1, %v10963_v57 }
 0x4fd   : > { %8088 = vmatprep.mubr.msk.f32.mxu1 %vm171_vm1, %v10964_v6  ;;  %v5885_v6 = vld [vmem:[%s8780_s21 + $0x40] sm:$0xff] }
 0x500   : > { %8089 = vmatmul.mubr.msk.f32.gmra.mrb[26].mxu1 %vm171_vm1, %v10965_v16 }
 0x501   : > { %8091 = vmatprep.mubr.msk.f32.mxu1 %vm171_vm1, %v10966_v58 }
 0x504   : > { %8092 = vmatmul.mubr.msk.f32.gmra.mrb[28].mxu1 %vm171_vm1, %v10967_v23 }
 0x505   : > { %8094 = vmatprep.mubr.msk.f32.mxu1 %vm171_vm1, %v3191_v19 }
 0x508   : > { %8095 = vmatmul.mubr.msk.f32.gmra.mrb[30].mxu1 %vm171_vm1, %v3192_v32  ;;  %v5888_v32 = vld [vmem:[%s8780_s21 + $0x58] sm:$0xff] }
 0x509   : > { %8099 = vmatprep.mubr.msk.f32.mxu1 %vm171_vm1, %v10968_v38 }
 0x50c   : > { %8100 = vmatmul.mubr.msk.f32.vlgmr.msra.gmra.mrb[0].mxu1 %vm171_vm1, %v10969_v39 }
 0x50d   : > { %8102 = vmatprep.mubr.msk.f32.mxu1 %vm171_vm1, %v10970_v1  ;;  %v5887_v1 = vld [vmem:[%s8780_s21 + $0x50] sm:$0xff] }
 0x510   : > { %8103 = vmatmul.mubr.msk.f32.gmra.mrb[2].mxu1 %vm171_vm1, %v10971_v9 }
 0x511   : > { %8105 = vmatprep.mubr.msk.f32.mxu1 %vm171_vm1, %v10972_v33 }
 0x514   : > { %8106 = vmatmul.mubr.msk.f32.gmra.mrb[4].mxu1 %vm171_vm1, %v10973_v47 }
 0x515   : > { %8108 = vmatprep.mubr.msk.f32.mxu1 %vm171_vm1, %v10974_v50 }
 0x518   : > { %8109 = vmatmul.mubr.msk.f32.gmra.mrb[6].mxu1 %vm171_vm1, %v10975_v10  ;;  %v5890_v10 = vld [vmem:[%s8780_s21 + $0x68] sm:$0xff] }
 0x519   : > { %8111 = vmatprep.mubr.msk.f32.mxu1 %vm171_vm1, %v10976_v12 }
 0x51c   : > { %8112 = vmatmul.mubr.msk.f32.gmra.mrb[8].mxu1 %vm171_vm1, %v10977_v61 }
 0x51d   : > { %8114 = vmatprep.mubr.msk.f32.mxu1 %vm171_vm1, %v10978_v20  ;;  %v5889_v20 = vld [vmem:[%s8780_s21 + $0x60] sm:$0xff] }
 0x520   : > { %8115 = vmatmul.mubr.msk.f32.gmra.mrb[10].mxu1 %vm171_vm1, %v10979_v34 }
 0x521   : > { %8117 = vmatprep.mubr.msk.f32.mxu1 %vm171_vm1, %v10980_v36 }
 0x524   : > { %8118 = vmatmul.mubr.msk.f32.gmra.mrb[12].mxu1 %vm171_vm1, %v10981_v44 }
 0x525   : > { %8120 = vmatprep.mubr.msk.f32.mxu1 %vm171_vm1, %v10982_v45 }
 0x528   : > { %8121 = vmatmul.mubr.msk.f32.gmra.mrb[14].mxu1 %vm171_vm1, %v10950_v7 }
 0x529   : > { %8123 = vmatprep.mubr.msk.f32.mxu1 %vm171_vm1, %v10983_v46  ;;  %v5892_v46 = vld [vmem:[%s8780_s21 + $0x78] sm:$0xff] }
 0x52c   : > { %8124 = vmatmul.mubr.msk.f32.gmra.mrb[16].mxu1 %vm171_vm1, %v10952_v41  ;;  %v5884_v41 = vld [vmem:[%s8780_s21 + $0x38] sm:$0xff] }
 0x52d   : > { %8126 = vmatprep.mubr.msk.f32.mxu1 %vm171_vm1, %v10953_v27  ;;  %v10986_v27 = vld [vmem:[#allocation32_spill] sm:$0xff] }
 0x530   : > { %8127 = vmatmul.mubr.msk.f32.gmra.mrb[18].mxu1 %vm171_vm1, %v10954_v2 }
 0x531   : > { %8129 = vmatprep.mubr.msk.f32.mxu1 %vm171_vm1, %v10984_v48 }
 0x534   : > { %8130 = vmatmul.mubr.msk.f32.gmra.mrb[20].mxu1 %vm171_vm1, %v10956_v21 }
 0x535   : > { %8132 = vmatprep.mubr.msk.f32.mxu1 %vm171_vm1, %v10985_v52 }
 0x538   : > { %8133 = vmatmul.mubr.msk.f32.gmra.mrb[22].mxu1 %vm171_vm1, %v10100_v5 }
 0x539   : > { %8135 = vmatprep.mubr.msk.f32.mxu1 %vm171_vm1, %v10958_v0  ;;  %v3228_v0 = vld [vmem:[#allocation2 + $0x1a2] sm:$0xff] }
 0x53c   : > { %8136 = vmatmul.mubr.msk.f32.gmra.mrb[24].mxu1 %vm171_vm1, %v10108_v40  ;;  %v10535_v40 = vld [vmem:[%s10677_s2] ss:$0 sm:$0xff] }
 0x53d   : > { %8138 = vmatprep.mubr.msk.f32.mxu1 %vm171_vm1, %v10986_v27  ;;  %v5891_v27 = vld [vmem:[%s8780_s21 + $0x70] sm:$0xff] }
 0x540   : > { %8139 = vmatmul.mubr.msk.f32.gmra.mrb[26].mxu1 %vm171_vm1, %v10116_v29  ;;  %v5881_v29 = vld [vmem:[%s8780_s21 + $0x20] sm:$0xff] }
 0x541   : > { %8141 = vmatprep.mubr.msk.f32.mxu1 %vm171_vm1, %v10332_v37 }
 0x544   : > { %8142 = vmatmul.mubr.msk.f32.gmra.mrb[28].mxu1 %vm171_vm1, %v10336_v4  ;;  %v5883_v4 = vld [vmem:[%s8780_s21 + $0x30] sm:$0xff] }
 0x545   : > { %8144 = vmatprep.mubr.msk.f32.mxu1 %vm171_vm1, %v3227_v53 }
 0x548   : > { %8145 = vmatmul.mubr.msk.f32.gmra.mrb[30].mxu1 %vm171_vm1, %v3228_v0 }
 0x5df   : > { %v8101_v5 = vpop.f32.mrb[0].mxu1 }
 0x5e0   : > { %v5846_v37 = vadd.f32 %v8101_v5, %v10535_v40  ;;  %v5647_v55 = vpop.f32.mrb[1].mxu1 }
 0x5e1   : > { %v5845_v11 = vadd.f32 %v10535_v40, %v5647_v55 }
 0x5e2   : > { %v5910_v13 = vadd.f32 %v5878_v54, %v5846_v37  ;;  %v5894_v37 = vld [vmem:[%s8780_s21 + $0x88] sm:$0xff] }
 0x5e3   : > { %v5909_v14 = vadd.f32 %v5877_v56, %v5845_v11  ;;  %v8104_v15 = vpop.f32.mrb[2].mxu1  ;;  %v5893_v11 = vld [vmem:[%s8780_s21 + $0x80] sm:$0xff] }
 0x5e4   : > { %5942 = vst.msk [vmem:[%s10545_s10 + $0x8] sm:$0xff] %vm171_vm1, %v5910_v13  ;;  %v5848_v60 = vadd.f32 %v8104_v15, %v10535_v40  ;;  %v5657_v59 = vpop.f32.mrb[3].mxu1 }
 0x5e5   : > { %5941 = vst.msk [vmem:[%s10545_s10] sm:$0xff] %vm171_vm1, %v5909_v14  ;;  %v5847_v22 = vadd.f32 %v10535_v40, %v5657_v59 }
 0x5e6   : > { %v5912_v24 = vadd.f32 %v5880_v17, %v5848_v60  ;;  %v5896_v60 = vld [vmem:[%s8780_s21 + $0x98] sm:$0xff] }
 0x5e7   : > { %v5911_v25 = vadd.f32 %v5879_v18, %v5847_v22  ;;  %v8107_v26 = vpop.f32.mrb[4].mxu1  ;;  %v5895_v22 = vld [vmem:[%s8780_s21 + $0x90] sm:$0xff] }
 0x5e8   : > { %5944 = vst.msk [vmem:[%s10545_s10 + $0x18] sm:$0xff] %vm171_vm1, %v5912_v24  ;;  %v5850_v42 = vadd.f32 %v8107_v26, %v10535_v40  ;;  %v5667_v3 = vpop.f32.mrb[5].mxu1 }
 0x5e9   : > { %5943 = vst.msk [vmem:[%s10545_s10 + $0x10] sm:$0xff] %vm171_vm1, %v5911_v25  ;;  %v5849_v63 = vadd.f32 %v10535_v40, %v5667_v3 }
 0x5ea   : > { %v5914_v28 = vadd.f32 %v5882_v31, %v5850_v42  ;;  %v5898_v42 = vld [vmem:[%s8780_s21 + $0xa8] sm:$0xff] }
 0x5eb   : > { %v5913_v62 = vadd.f32 %v5881_v29, %v5849_v63  ;;  %v8110_v7 = vpop.f32.mrb[6].mxu1  ;;  %v5897_v63 = vld [vmem:[%s8780_s21 + $0xa0] sm:$0xff] }
 0x5ec   : > { %5946 = vst.msk [vmem:[%s10545_s10 + $0x28] sm:$0xff] %vm171_vm1, %v5914_v28  ;;  %v5852_v2 = vadd.f32 %v8110_v7, %v10535_v40  ;;  %v5677_v21 = vpop.f32.mrb[7].mxu1 }
 0x5ed   : > { %5945 = vst.msk [vmem:[%s10545_s10 + $0x20] sm:$0xff] %vm171_vm1, %v5913_v62  ;;  %v5851_v8 = vadd.f32 %v10535_v40, %v5677_v21 }
 0x5ee   : > { %v5916_v30 = vadd.f32 %v5884_v41, %v5852_v2  ;;  %v5900_v2 = vld [vmem:[%s8780_s21 + $0xb8] sm:$0xff] }
 0x5ef   : > { %v5915_v35 = vadd.f32 %v5883_v4, %v5851_v8  ;;  %v8113_v43 = vpop.f32.mrb[8].mxu1  ;;  %v5899_v8 = vld [vmem:[%s8780_s21 + $0xb0] sm:$0xff] }
 0x5f0   : > { %5948 = vst.msk [vmem:[%s10545_s10 + $0x38] sm:$0xff] %vm171_vm1, %v5916_v30  ;;  %v5854_v51 = vadd.f32 %v8113_v43, %v10535_v40  ;;  %v5687_v57 = vpop.f32.mrb[9].mxu1 }
 0x5f1   : > { %5947 = vst.msk [vmem:[%s10545_s10 + $0x30] sm:$0xff] %vm171_vm1, %v5915_v35  ;;  %v5853_v16 = vadd.f32 %v10535_v40, %v5687_v57 }
 0x5f2   : > { %v5918_v58 = vadd.f32 %v5886_v49, %v5854_v51  ;;  %v5902_v51 = vld [vmem:[%s8780_s21 + $0xc8] sm:$0xff] }
 0x5f3   : > { %v5917_v19 = vadd.f32 %v5885_v6, %v5853_v16  ;;  %v8116_v23 = vpop.f32.mrb[10].mxu1  ;;  %v5901_v16 = vld [vmem:[%s8780_s21 + $0xc0] sm:$0xff] }
 0x5f4   : > { %5950 = vst.msk [vmem:[%s10545_s10 + $0x48] sm:$0xff] %vm171_vm1, %v5918_v58  ;;  %v5856_v38 = vadd.f32 %v8116_v23, %v10535_v40  ;;  %v5697_v39 = vpop.f32.mrb[11].mxu1 }
 0x5f5   : > { %5949 = vst.msk [vmem:[%s10545_s10 + $0x40] sm:$0xff] %vm171_vm1, %v5917_v19  ;;  %v5855_v9 = vadd.f32 %v10535_v40, %v5697_v39 }
 0x5f6   : > { %v5920_v33 = vadd.f32 %v5888_v32, %v5856_v38  ;;  %v5904_v38 = vld [vmem:[%s8780_s21 + $0xd8] sm:$0xff] }
 0x5f7   : > { %v5919_v47 = vadd.f32 %v5887_v1, %v5855_v9  ;;  %v8119_v50 = vpop.f32.mrb[12].mxu1  ;;  %v5903_v9 = vld [vmem:[%s8780_s21 + $0xd0] sm:$0xff] }
 0x5f8   : > { %5952 = vst.msk [vmem:[%s10545_s10 + $0x58] sm:$0xff] %vm171_vm1, %v5920_v33  ;;  %v5858_v12 = vadd.f32 %v8119_v50, %v10535_v40  ;;  %v5707_v61 = vpop.f32.mrb[13].mxu1 }
 0x5f9   : > { %5951 = vst.msk [vmem:[%s10545_s10 + $0x50] sm:$0xff] %vm171_vm1, %v5919_v47  ;;  %v5857_v34 = vadd.f32 %v10535_v40, %v5707_v61 }
 0x5fa   : > { %v5922_v36 = vadd.f32 %v5890_v10, %v5858_v12  ;;  %v5906_v12 = vld [vmem:[%s8780_s21 + $0xe8] sm:$0xff] }
 0x5fb   : > { %v5921_v44 = vadd.f32 %v5889_v20, %v5857_v34  ;;  %v8122_v45 = vpop.f32.mrb[14].mxu1  ;;  %v5905_v34 = vld [vmem:[%s8780_s21 + $0xe0] sm:$0xff] }
 0x5fc   : > { %5954 = vst.msk [vmem:[%s10545_s10 + $0x68] sm:$0xff] %vm171_vm1, %v5922_v36  ;;  %v5860_v48 = vadd.f32 %v8122_v45, %v10535_v40  ;;  %v5717_v52 = vpop.f32.mrb[15].mxu1 }
 0x5fd   : > { %5953 = vst.msk [vmem:[%s10545_s10 + $0x60] sm:$0xff] %vm171_vm1, %v5921_v44  ;;  %v5859_v53 = vadd.f32 %v10535_v40, %v5717_v52 }
 0x5fe   : > { %v5924_v0 = vadd.f32 %v5892_v46, %v5860_v48  ;;  %v5908_v48 = vld [vmem:[%s8780_s21 + $0xf8] sm:$0xff] }
 0x5ff   : > { %v5923_v5 = vadd.f32 %v5891_v27, %v5859_v53  ;;  %v8125_v54 = vpop.f32.mrb[16].mxu1  ;;  %v5907_v53 = vld [vmem:[%s8780_s21 + $0xf0] sm:$0xff] }
 0x600   : > { %5956 = vst.msk [vmem:[%s10545_s10 + $0x78] sm:$0xff] %vm171_vm1, %v5924_v0  ;;  %v5862_v55 = vadd.f32 %v8125_v54, %v10535_v40  ;;  %v5727_v56 = vpop.f32.mrb[17].mxu1 }
 0x601   : > { %5955 = vst.msk [vmem:[%s10545_s10 + $0x70] sm:$0xff] %vm171_vm1, %v5923_v5  ;;  %v5861_v13 = vadd.f32 %v10535_v40, %v5727_v56 }
 0x602   : > { %v5926_v14 = vadd.f32 %v5894_v37, %v5862_v55 }
 0x603   : > { %v5925_v15 = vadd.f32 %v5893_v11, %v5861_v13  ;;  %v8128_v17 = vpop.f32.mrb[18].mxu1 }
 0x604   : > { %5958 = vst.msk [vmem:[%s10545_s10 + $0x88] sm:$0xff] %vm171_vm1, %v5926_v14  ;;  %v5864_v59 = vadd.f32 %v8128_v17, %v10535_v40  ;;  %v5737_v18 = vpop.f32.mrb[19].mxu1 }
 0x605   : > { %5957 = vst.msk [vmem:[%s10545_s10 + $0x80] sm:$0xff] %vm171_vm1, %v5925_v15  ;;  %v5863_v24 = vadd.f32 %v10535_v40, %v5737_v18 }
 0x606   : > { %v5928_v25 = vadd.f32 %v5896_v60, %v5864_v59 }
 0x607   : > { %v5927_v26 = vadd.f32 %v5895_v22, %v5863_v24  ;;  %v8131_v31 = vpop.f32.mrb[20].mxu1 }
 0x608   : > { %5960 = vst.msk [vmem:[%s10545_s10 + $0x98] sm:$0xff] %vm171_vm1, %v5928_v25  ;;  %v5866_v3 = vadd.f32 %v8131_v31, %v10535_v40  ;;  %v5747_v29 = vpop.f32.mrb[21].mxu1 }
 0x609   : > { %5959 = vst.msk [vmem:[%s10545_s10 + $0x90] sm:$0xff] %vm171_vm1, %v5927_v26  ;;  %v5865_v28 = vadd.f32 %v10535_v40, %v5747_v29 }
 0x60a   : > { %v5930_v62 = vadd.f32 %v5898_v42, %v5866_v3 }
 0x60b   : > { %v5929_v7 = vadd.f32 %v5897_v63, %v5865_v28  ;;  %v8134_v41 = vpop.f32.mrb[22].mxu1 }
 0x60c   : > { %5962 = vst.msk [vmem:[%s10545_s10 + $0xa8] sm:$0xff] %vm171_vm1, %v5930_v62  ;;  %v5868_v21 = vadd.f32 %v8134_v41, %v10535_v40  ;;  %v5757_v4 = vpop.f32.mrb[23].mxu1 }
 0x60d   : > { %5961 = vst.msk [vmem:[%s10545_s10 + $0xa0] sm:$0xff] %vm171_vm1, %v5929_v7  ;;  %v5867_v30 = vadd.f32 %v10535_v40, %v5757_v4 }
 0x60e   : > { %v5932_v35 = vadd.f32 %v5900_v2, %v5868_v21 }
 0x60f   : > { %v5931_v43 = vadd.f32 %v5899_v8, %v5867_v30  ;;  %v8137_v49 = vpop.f32.mrb[24].mxu1 }
 0x610   : > { %5964 = vst.msk [vmem:[%s10545_s10 + $0xb8] sm:$0xff] %vm171_vm1, %v5932_v35  ;;  %v5870_v57 = vadd.f32 %v8137_v49, %v10535_v40  ;;  %v5767_v6 = vpop.f32.mrb[25].mxu1 }
 0x611   : > { %5963 = vst.msk [vmem:[%s10545_s10 + $0xb0] sm:$0xff] %vm171_vm1, %v5931_v43  ;;  %v5869_v58 = vadd.f32 %v10535_v40, %v5767_v6 }
 0x612   : > { %v5934_v19 = vadd.f32 %v5902_v51, %v5870_v57 }
 0x613   : > { %v5933_v23 = vadd.f32 %v5901_v16, %v5869_v58  ;;  %v8140_v32 = vpop.f32.mrb[26].mxu1 }
 0x614   : > { %5966 = vst.msk [vmem:[%s10545_s10 + $0xc8] sm:$0xff] %vm171_vm1, %v5934_v19  ;;  %v5872_v39 = vadd.f32 %v8140_v32, %v10535_v40  ;;  %v5777_v1 = vpop.f32.mrb[27].mxu1 }
 0x615   : > { %5965 = vst.msk [vmem:[%s10545_s10 + $0xc0] sm:$0xff] %vm171_vm1, %v5933_v23  ;;  %v5871_v33 = vadd.f32 %v10535_v40, %v5777_v1 }
 0x616   : > { %v5936_v47 = vadd.f32 %v5904_v38, %v5872_v39 }
 0x617   : > { %v5935_v50 = vadd.f32 %v5903_v9, %v5871_v33  ;;  %v8143_v10 = vpop.f32.mrb[28].mxu1 }
 0x618   : > { %5968 = vst.msk [vmem:[%s10545_s10 + $0xd8] sm:$0xff] %vm171_vm1, %v5936_v47  ;;  %v5874_v61 = vadd.f32 %v8143_v10, %v10535_v40  ;;  %v5787_v20 = vpop.f32.mrb[29].mxu1 }
 0x619   : > { %5967 = vst.msk [vmem:[%s10545_s10 + $0xd0] sm:$0xff] %vm171_vm1, %v5935_v50  ;;  %v5873_v36 = vadd.f32 %v10535_v40, %v5787_v20 }
 0x61a   : > { %v5938_v44 = vadd.f32 %v5906_v12, %v5874_v61 }
 0x61b   : > { %v5937_v45 = vadd.f32 %v5905_v34, %v5873_v36  ;;  %v8146_v46 = vpop.f32.mrb[30].mxu1 }
 0x61c   : > { %5970 = vst.msk [vmem:[%s10545_s10 + $0xe8] sm:$0xff] %vm171_vm1, %v5938_v44  ;;  %v5876_v52 = vadd.f32 %v8146_v46, %v10535_v40  ;;  %v5797_v27 = vpop.f32.mrb[31].mxu1 }
 0x61d   : > { %5969 = vst.msk [vmem:[%s10545_s10 + $0xe0] sm:$0xff] %vm171_vm1, %v5937_v45  ;;  %v5875_v0 = vadd.f32 %v10535_v40, %v5797_v27 }
 0x61e   : > { %v5940_v5 = vadd.f32 %v5908_v48, %v5876_v52 }
 0x61f   : > { %v5939_v54 = vadd.f32 %v5907_v53, %v5875_v0 }
 0x620   : > { %5972 = vst.msk [vmem:[%s10545_s10 + $0xf8] sm:$0xff] %vm171_vm1, %v5940_v5 }
 0x621   : > { %5971 = vst.msk [vmem:[%s10545_s10 + $0xf0] sm:$0xff] %vm171_vm1, %v5939_v54 }
 0x622 PF: > { %s13_s12 = sadd.s32 1, %s8674_s12  }
 0x623   : > { %p10_p4 = scmp.ge.s32.totalorder %s13_s12, 4  }
 0x625   :  { %12 = sbr.rel (!%p10_p4) target bundleno = 1 (0x1), region = 71 }

</bundles_post_ra>
